<compile_context>
chip_gen: v6e
topology: v6e:2x2x1
jax: 0.10.0
libtpu: 0.0.40
codegen_flags: <defaults>
</compile_context>

<pallas_src>
import jax
import jax.numpy as jnp
from jax.experimental import pallas as pl
from jax.experimental.pallas import tpu as pltpu


# Cast MXU operands to bf16 (keeping f32 accumulation via preferred_element_type)
# for 2-3x MXU throughput at realistic channel/vertex counts.  Left at f32 here:
# the review notes bf16 is noise at toy shapes, and f32 keeps the numerical
# check far inside tolerance.
_MXU_IN_DTYPE = jnp.float32

# Number of grid steps the batch is split into.  2 => one fused chunk per
# TensorCore on v7x (megacore, dimension_semantics="parallel"); on single-TC
# v5e/v6e it costs one extra ~0.35us step while batch is still folded into the
# matmul M dimension.  Set to 1 to fully collapse the grid on single-TC chips.
_GRID_CHUNKS = 2


# --------------------------------------------------------------------------
# in-kernel helpers (operate on VMEM-resident values / weight refs)
# --------------------------------------------------------------------------
def _mm(a, b):
    """(M, K) @ (K, N) on the MXU; K == 1 falls back to a VPU broadcast mul."""
    if a.shape[-1] == 1:
        return a * b                                   # (M,1)*(1,N) -> (M,N)
    return jnp.dot(a.astype(_MXU_IN_DTYPE), b.astype(_MXU_IN_DTYPE),
                   preferred_element_type=jnp.float32)


def _temporal_glu(x4, w_tc_ref, b_tc, w_al, b_al):
    """Causal temporal conv (kernel Kt) + GLU gating with aligned residual.

    x4:       (Bc, T_in, V, C_in) f32 value
    w_tc_ref: Ref (Kt, C_in, 2*C_out) -- indexed per tap (stays in VMEM)
    b_tc:     (1, 2*C_out);  w_al: (C_in, C_out) (eye for pad/identity); b_al: (1, C_out)
    returns:  (Bc, T_in - Kt + 1, V, C_out)

    Each tap is ONE batched (Bc*T_out*V, C_in) @ (C_in, 2*C_out) matmul.
    """
    bc, t_in, v, c_in = x4.shape
    kt = w_tc_ref.shape[0]
    t_out = t_in - kt + 1
    c_out = w_al.shape[1]
    m = bc * t_out * v

    conv = None
    for k in range(kt):                                # Kt shifted-slab dots
        xk = x4[:, k:k + t_out].reshape(m, c_in)
        term = _mm(xk, w_tc_ref[k])
        conv = term if conv is None else conv + term
    conv = conv + b_tc                                 # (m, 2*c_out)

    res = _mm(x4[:, kt - 1:].reshape(m, c_in), w_al) + b_al
    gated = (conv[:, :c_out] + res) * jax.nn.sigmoid(conv[:, c_out:])
    return gated.reshape(bc, t_out, v, c_out)


def _graph_conv_relu(h4, gso_t, w_al, b_al, w_gc, b_gc):
    """Align -> graph shift (ONE matmul) -> channel matmul + bias + residual -> ReLU."""
    bc, t, v, c_prev = h4.shape
    c = w_al.shape[1]
    n = bc * t
    m = n * v

    g = _mm(h4.reshape(m, c_prev), w_al) + b_al        # aligned input, (m, c)

    if c % 8 == 0 and v % 8 == 0:
        # V-minor excursion (last-two-dims swaps only): one (n*c, V) @ (V, V)
        # MXU matmul replaces n tiny (V,V)@(V,c) dots.
        gt = jnp.swapaxes(g.reshape(n, v, c), 1, 2).reshape(n * c, v)
        fm = _mm(gt, gso_t)                            # fm[(n,c), u] = sum_v g[n,v,c]*gso[u,v]
        fm = jnp.swapaxes(fm.reshape(n, c, v), 1, 2).reshape(m, c)
    else:
        # Fallback for sublane-unaligned channel counts: per-(b,t)-slab matmuls.
        gso = gso_t.T
        g3 = g.reshape(n, v, c)
        fm = jnp.concatenate(
            [_mm(gso, g3[i]) for i in range(n)], axis=0)   # (m, c)

    y = _mm(fm, w_gc) + b_gc + g                       # second mul + bias + residual
    return jnp.maximum(y, 0.0).reshape(bc, t, v, c)    # block ReLU


def _mean_vc(x4):
    """Mean over the (V, C) axes, batched over all (b, t) slabs at once."""
    return jnp.mean(jnp.mean(x4, axis=3, keepdims=True), axis=2, keepdims=True)


def _layer_norm(h4, gamma, beta, eps=1e-5):
    """nn.LayerNorm([V, C]) batched over every (b, t) slab in one pass."""
    mu = _mean_vc(h4)
    var = _mean_vc(jnp.square(h4 - mu))
    return (h4 - mu) * jax.lax.rsqrt(var + eps) * gamma + beta


def _fc_head(h4, w1, b1, w2, b2):
    """FC1 -> ReLU -> FC2 on the flattened (Bc*T*V, C) slab."""
    bc, t, v, c = h4.shape
    hf = h4.reshape(bc * t * v, c)
    hf = jnp.maximum(_mm(hf, w1) + b1, 0.0)
    out = _mm(hf, w2) + b2
    return out.reshape(bc, t, v, w2.shape[1])


# --------------------------------------------------------------------------
# the single fused kernel (one grid step == one batch chunk, all in VMEM)
# --------------------------------------------------------------------------
def _build_kernel(n_st, mode):
    """Fused kernel for n_st STConvBlocks followed by the output head."""

    def kernel(*refs):
        x_ref, gso_t_ref = refs[0], refs[1]
        w = refs[2:-1]
        o_ref = refs[-1]

        h = x_ref[...].astype(jnp.float32)             # (Bc, T, V, C_in)
        gso_t = gso_t_ref[...].astype(jnp.float32)     # (V, V) == gso.T

        it = iter(w)
        nxt = lambda: next(it)                         # noqa: E731

        for _ in range(n_st):
            w_al1, b_al1, w_tc1, b_tc1 = nxt(), nxt(), nxt(), nxt()
            w_algc, b_algc, w_gc, b_gc = nxt(), nxt(), nxt(), nxt()
            w_al2, b_al2, w_tc2, b_tc2 = nxt(), nxt(), nxt(), nxt()
            ln_g, ln_b = nxt(), nxt()
            h = _temporal_glu(h, w_tc1, b_tc1[...], w_al1[...], b_al1[...])
            h = _graph_conv_relu(h, gso_t, w_algc[...], b_algc[...],
                                 w_gc[...], b_gc[...])
            h = _temporal_glu(h, w_tc2, b_tc2[...], w_al2[...], b_al2[...])
            h = _layer_norm(h, ln_g[...], ln_b[...])
            # Dropout == identity at inference.

        if mode == "output":                           # OutputBlock (Ko > 1)
            w_al, b_al, w_tc, b_tc = nxt(), nxt(), nxt(), nxt()
            ln_g, ln_b = nxt(), nxt()
            w_fc1, b_fc1, w_fc2, b_fc2 = nxt(), nxt(), nxt(), nxt()
            h = _temporal_glu(h, w_tc, b_tc[...], w_al[...], b_al[...])
            h = _layer_norm(h, ln_g[...], ln_b[...])
            h = _fc_head(h, w_fc1[...], b_fc1[...], w_fc2[...], b_fc2[...])
        elif mode == "fc":                             # Ko == 0 head
            w_fc1, b_fc1, w_fc2, b_fc2 = nxt(), nxt(), nxt(), nxt()
            h = _fc_head(h, w_fc1[...], b_fc1[...], w_fc2[...], b_fc2[...])
        # mode == "none" (Ko == 1): ST-block output is the model output.

        o_ref[...] = h.astype(o_ref.dtype)

    return kernel


# --------------------------------------------------------------------------
# pallas_call wrapper
# --------------------------------------------------------------------------
def _resident(a):
    """Full-array block with a constant index_map -> operand stays VMEM-resident."""
    nd = a.ndim
    return pl.BlockSpec(a.shape, lambda i, _nd=nd: (0,) * _nd)


def _row(b):
    return b.reshape(1, -1)


def stgcn_forward_pallas(x_btvc, params):
    B, T, V, Cin = x_btvc.shape
    Kt, Ko = params["Kt"], params["Ko"]
    n_st = len(params["st_blocks"])
    gso_t = params["gso"].T                            # precompute gso^T in XLA

    weights = []
    for p in params["st_blocks"]:
        weights += [p["w_al1"], _row(p["b_al1"]), p["w_tc1"], _row(p["b_tc1"]),
                    p["w_algc"], _row(p["b_algc"]), p["w_gc"], _row(p["b_gc"]),
                    p["w_al2"], _row(p["b_al2"]), p["w_tc2"], _row(p["b_tc2"]),
                    p["ln_g"], p["ln_b"]]

    t_after = T - n_st * 2 * (Kt - 1)                  # == Ko
    if Ko > 1:
        po = params["output"]
        weights += [po["w_al"], _row(po["b_al"]), po["w_tc"], _row(po["b_tc"]),
                    po["ln_g"], po["ln_b"],
                    po["w_fc1"], _row(po["b_fc1"]), po["w_fc2"], _row(po["b_fc2"])]
        mode, T_f, Cend = "output", 1, po["w_fc2"].shape[1]
    elif Ko == 0:
        weights += [params["w_fc1"], _row(params["b_fc1"]),
                    params["w_fc2"], _row(params["b_fc2"])]
        mode, T_f, Cend = "fc", t_after, params["w_fc2"].shape[1]
    else:                                              # Ko == 1: passthrough
        mode, T_f, Cend = "none", t_after, params["st_blocks"][-1]["ln_g"].shape[1]

    G = _GRID_CHUNKS if (B % _GRID_CHUNKS == 0 and B >= _GRID_CHUNKS) else 1
    Bc = B // G

    in_specs = ([pl.BlockSpec((Bc, T, V, Cin), lambda i: (i, 0, 0, 0)),
                 _resident(gso_t)]
                + [_resident(w_) for w_ in weights])

    return pl.pallas_call(
        _build_kernel(n_st, mode),
        out_shape=jax.ShapeDtypeStruct((B, T_f, V, Cend), x_btvc.dtype),
        grid=(G,),
        in_specs=in_specs,
        out_specs=pl.BlockSpec((Bc, T_f, V, Cend), lambda i: (i, 0, 0, 0)),
        compiler_params=pltpu.CompilerParams(dimension_semantics=("parallel",)),
    )(x_btvc, gso_t, *weights)


# --------------------------------------------------------------------------
# pure-JAX reference path (same parameters, same math)
# --------------------------------------------------------------------------
def _ref_einmm(x, w):
    return jnp.einsum('btvc,cd->btvd', x, w, precision=jax.lax.Precision.HIGHEST)


def ref_temporal_glu(x, w, b, w_al, b_al):
    kt = w.shape[0]
    c_out = w_al.shape[1]
    t_out = x.shape[1] - kt + 1
    res = _ref_einmm(x[:, kt - 1:], w_al) + b_al
    conv = b
    for k in range(kt):
        conv = conv + _ref_einmm(x[:, k:k + t_out], w[k])
    return (conv[..., :c_out] + res) * jax.nn.sigmoid(conv[..., c_out:])


def ref_layernorm(x, g, b):
    mu = jnp.mean(x, axis=(2, 3), keepdims=True)
    var = jnp.mean(jnp.square(x - mu), axis=(2, 3), keepdims=True)
    return (x - mu) * jax.lax.rsqrt(var + 1e-5) * g + b


def ref_st_block(x, gso, p):
    h = ref_temporal_glu(x, p["w_tc1"], p["b_tc1"], p["w_al1"], p["b_al1"])
    g = _ref_einmm(h, p["w_algc"]) + p["b_algc"]
    fm = jnp.einsum('uv,btvc->btuc', gso, g, precision=jax.lax.Precision.HIGHEST)
    y = jnp.maximum(_ref_einmm(fm, p["w_gc"]) + p["b_gc"] + g, 0.0)
    h = ref_temporal_glu(y, p["w_tc2"], p["b_tc2"], p["w_al2"], p["b_al2"])
    return ref_layernorm(h, p["ln_g"], p["ln_b"])


def ref_output_block(x, p):
    h = ref_temporal_glu(x, p["w_tc"], p["b_tc"], p["w_al"], p["b_al"])
    h = ref_layernorm(h, p["ln_g"], p["ln_b"])
    h = jnp.maximum(_ref_einmm(h, p["w_fc1"]) + p["b_fc1"], 0.0)
    return _ref_einmm(h, p["w_fc2"]) + p["b_fc2"]


def stgcn_forward_ref(x_btvc, params):
    x = x_btvc
    for p in params["st_blocks"]:
        x = ref_st_block(x, params["gso"], p)
    if params["Ko"] > 1:
        x = ref_output_block(x, params["output"])
    elif params["Ko"] == 0:
        h = jnp.maximum(_ref_einmm(x, params["w_fc1"]) + params["b_fc1"], 0.0)
        x = _ref_einmm(h, params["w_fc2"]) + params["b_fc2"]
    return x


# --------------------------------------------------------------------------
# full model forward (NCHW in / NCHW out, like the PyTorch module)
# --------------------------------------------------------------------------
def stgcn_forward(x_nchw, params, use_pallas=True):
    x = jnp.transpose(x_nchw, (0, 2, 3, 1))            # (B, C, T, V) -> (B, T, V, C)
    y = stgcn_forward_pallas(x, params) if use_pallas else stgcn_forward_ref(x, params)
    # Final transpose to NCHW is on a tiny (B, 1, V, 1) tensor (size-1 dims) and
    # is effectively a free reshape; all intermediates stayed inside the kernel.
    return jnp.transpose(y, (0, 3, 1, 2))


# --------------------------------------------------------------------------
# deterministic parameter initialization (shapes follow the module __init__)
# --------------------------------------------------------------------------
def init_params(key, Kt, blocks, T, n_vertex):
    keys = iter(jax.random.split(key, 128))

    def w(shape, scale=0.1):
        return (scale * jax.random.normal(next(keys), shape)).astype(jnp.float32)

    def align_w(c_in, c_out):
        # c_in > c_out: learned 1x1 conv.  c_in <= c_out: eye == zero-channel-pad
        # / identity, so Align is always a single in-kernel dot.
        if c_in > c_out:
            return w((c_in, c_out)), w((c_out,))
        return (jnp.eye(c_in, c_out, dtype=jnp.float32),
                jnp.zeros((c_out,), jnp.float32))

    n_st = len(blocks) - 3
    Ko = T - n_st * 2 * (Kt - 1)
    params = {"Kt": Kt, "Ko": Ko}

    # deterministic normalized-adjacency graph shift operator (the `filter` arg)
    a = jax.random.uniform(next(keys), (n_vertex, n_vertex))
    a = (a + a.T) * 0.5
    a = (a > 0.5).astype(jnp.float32) + jnp.eye(n_vertex, dtype=jnp.float32)
    d = jnp.sum(a, axis=1)
    params["gso"] = (a / jnp.sqrt(d[:, None] * d[None, :])).astype(jnp.float32)

    st_params = []
    last_c = blocks[0][-1]
    for l in range(n_st):
        ch = blocks[l + 1]
        p = {}
        p["w_al1"], p["b_al1"] = align_w(last_c, ch[0])
        p["w_tc1"] = w((Kt, last_c, 2 * ch[0]))          # (Kt, C_in, 2*C_out)
        p["b_tc1"] = w((2 * ch[0],))
        p["w_algc"], p["b_algc"] = align_w(ch[0], ch[1])
        p["w_gc"] = w((ch[1], ch[1]))
        p["b_gc"] = w((ch[1],))
        p["w_al2"], p["b_al2"] = align_w(ch[1], ch[2])
        p["w_tc2"] = w((Kt, ch[1], 2 * ch[2]))
        p["b_tc2"] = w((2 * ch[2],))
        p["ln_g"] = jnp.ones((n_vertex, ch[2]), jnp.float32)
        p["ln_b"] = jnp.zeros((n_vertex, ch[2]), jnp.float32)
        st_params.append(p)
        last_c = ch[2]
    params["st_blocks"] = st_params

    if Ko > 1:
        c0, c1 = blocks[-2][0], blocks[-2][1]
        end_c = blocks[-1][0]
        po = {}
        po["w_al"], po["b_al"] = align_w(last_c, c0)
        po["w_tc"] = w((Ko, last_c, 2 * c0))
        po["b_tc"] = w((2 * c0,))
        po["ln_g"] = jnp.ones((n_vertex, c0), jnp.float32)
        po["ln_b"] = jnp.zeros((n_vertex, c0), jnp.float32)
        po["w_fc1"], po["b_fc1"] = w((c0, c1)), w((c1,))
        po["w_fc2"], po["b_fc2"] = w((c1, end_c)), w((end_c,))
        params["output"] = po
    elif Ko == 0:
        params["w_fc1"] = w((last_c, blocks[-2][0]))
        params["b_fc1"] = w((blocks[-2][0],))
        params["w_fc2"] = w((blocks[-2][0], blocks[-1][0]))
        params["b_fc2"] = w((blocks[-1][0],))
    return params


# --------------------------------------------------------------------------
if __name__ == "__main__":
    Kt, Ks = 3, 3                                  # Ks unused for graph_conv_type='graph_conv'
    # Scaled-down version of the standard STGCN config [[1],[64,16,64],[128,128],[1]];
    # channel counts kept multiples of 8 so every in-kernel reshape is a
    # layout-preserving leading-dim split/merge.
    blocks = [[1], [16, 8, 16], [32, 32], [1]]     # 1 STConvBlock + OutputBlock
    T, n_vertex = 8, 16
    batch = 4

    key = jax.random.PRNGKey(0)
    kx, kp = jax.random.split(key)
    x = jax.random.normal(kx, (batch, blocks[0][-1], T, n_vertex), dtype=jnp.float32)
    params = init_params(kp, Kt, blocks, T, n_vertex)
    assert params["Ko"] == 4                       # > 1  ->  OutputBlock path

    fwd = jax.jit(lambda xx: stgcn_forward(xx, params, use_pallas=True))
    out = jax.block_until_ready(fwd(x))
    ref = jax.block_until_ready(stgcn_forward(x, params, use_pallas=False))

    assert out.shape == (batch, blocks[-1][0], 1, n_vertex), out.shape
    max_err = float(jnp.max(jnp.abs(out - ref)))
    assert jnp.allclose(out, ref, atol=1e-2, rtol=1e-2), max_err
    print("KERNEL_OK")
</pallas_src>

<mosaic_0001>
module attributes {stable_mosaic.version = 11 : i64} {
  func.func @kernel(%arg0: i32, %arg1: memref<2x8x16x1xf32, #tpu.memory_space<vmem>>, %arg2: memref<16x16xf32, #tpu.memory_space<vmem>>, %arg3: memref<1x16xf32, #tpu.memory_space<vmem>>, %arg4: memref<1x16xf32, #tpu.memory_space<vmem>>, %arg5: memref<3x1x32xf32, #tpu.memory_space<vmem>>, %arg6: memref<1x32xf32, #tpu.memory_space<vmem>>, %arg7: memref<16x8xf32, #tpu.memory_space<vmem>>, %arg8: memref<1x8xf32, #tpu.memory_space<vmem>>, %arg9: memref<8x8xf32, #tpu.memory_space<vmem>>, %arg10: memref<1x8xf32, #tpu.memory_space<vmem>>, %arg11: memref<8x16xf32, #tpu.memory_space<vmem>>, %arg12: memref<1x16xf32, #tpu.memory_space<vmem>>, %arg13: memref<3x8x32xf32, #tpu.memory_space<vmem>>, %arg14: memref<1x32xf32, #tpu.memory_space<vmem>>, %arg15: memref<16x16xf32, #tpu.memory_space<vmem>>, %arg16: memref<16x16xf32, #tpu.memory_space<vmem>>, %arg17: memref<16x32xf32, #tpu.memory_space<vmem>>, %arg18: memref<1x32xf32, #tpu.memory_space<vmem>>, %arg19: memref<4x16x64xf32, #tpu.memory_space<vmem>>, %arg20: memref<1x64xf32, #tpu.memory_space<vmem>>, %arg21: memref<16x32xf32, #tpu.memory_space<vmem>>, %arg22: memref<16x32xf32, #tpu.memory_space<vmem>>, %arg23: memref<32x32xf32, #tpu.memory_space<vmem>>, %arg24: memref<1x32xf32, #tpu.memory_space<vmem>>, %arg25: memref<32x1xf32, #tpu.memory_space<vmem>>, %arg26: memref<1x1xf32, #tpu.memory_space<vmem>>, %arg27: memref<2x1x16x1xf32, #tpu.memory_space<vmem>>) attributes {dimension_semantics = [#tpu.dimension_semantics<parallel>], iteration_bounds = array<i64: 2>, scalar_prefetch = 0 : i64, scratch_operands = 0 : i64, tpu.core_type = #tpu.core_type<tc>, window_params = [{transform_indices = @transform_0, window_bounds = array<i64: 2, 8, 16, 1>}, {pipeline_mode = #tpu.pipeline_mode<synchronous>, transform_indices = @transform_1, window_bounds = array<i64: 16, 16>}, {pipeline_mode = #tpu.pipeline_mode<synchronous>, transform_indices = @transform_2, window_bounds = array<i64: 1, 16>}, {pipeline_mode = #tpu.pipeline_mode<synchronous>, transform_indices = @transform_3, window_bounds = array<i64: 1, 16>}, {pipeline_mode = #tpu.pipeline_mode<synchronous>, transform_indices = @transform_4, window_bounds = array<i64: 3, 1, 32>}, {pipeline_mode = #tpu.pipeline_mode<synchronous>, transform_indices = @transform_5, window_bounds = array<i64: 1, 32>}, {pipeline_mode = #tpu.pipeline_mode<synchronous>, transform_indices = @transform_6, window_bounds = array<i64: 16, 8>}, {pipeline_mode = #tpu.pipeline_mode<synchronous>, transform_indices = @transform_7, window_bounds = array<i64: 1, 8>}, {pipeline_mode = #tpu.pipeline_mode<synchronous>, transform_indices = @transform_8, window_bounds = array<i64: 8, 8>}, {pipeline_mode = #tpu.pipeline_mode<synchronous>, transform_indices = @transform_9, window_bounds = array<i64: 1, 8>}, {pipeline_mode = #tpu.pipeline_mode<synchronous>, transform_indices = @transform_10, window_bounds = array<i64: 8, 16>}, {pipeline_mode = #tpu.pipeline_mode<synchronous>, transform_indices = @transform_11, window_bounds = array<i64: 1, 16>}, {pipeline_mode = #tpu.pipeline_mode<synchronous>, transform_indices = @transform_12, window_bounds = array<i64: 3, 8, 32>}, {pipeline_mode = #tpu.pipeline_mode<synchronous>, transform_indices = @transform_13, window_bounds = array<i64: 1, 32>}, {pipeline_mode = #tpu.pipeline_mode<synchronous>, transform_indices = @transform_14, window_bounds = array<i64: 16, 16>}, {pipeline_mode = #tpu.pipeline_mode<synchronous>, transform_indices = @transform_15, window_bounds = array<i64: 16, 16>}, {pipeline_mode = #tpu.pipeline_mode<synchronous>, transform_indices = @transform_16, window_bounds = array<i64: 16, 32>}, {pipeline_mode = #tpu.pipeline_mode<synchronous>, transform_indices = @transform_17, window_bounds = array<i64: 1, 32>}, {pipeline_mode = #tpu.pipeline_mode<synchronous>, transform_indices = @transform_18, window_bounds = array<i64: 4, 16, 64>}, {pipeline_mode = #tpu.pipeline_mode<synchronous>, transform_indices = @transform_19, window_bounds = array<i64: 1, 64>}, {pipeline_mode = #tpu.pipeline_mode<synchronous>, transform_indices = @transform_20, window_bounds = array<i64: 16, 32>}, {pipeline_mode = #tpu.pipeline_mode<synchronous>, transform_indices = @transform_21, window_bounds = array<i64: 16, 32>}, {pipeline_mode = #tpu.pipeline_mode<synchronous>, transform_indices = @transform_22, window_bounds = array<i64: 32, 32>}, {pipeline_mode = #tpu.pipeline_mode<synchronous>, transform_indices = @transform_23, window_bounds = array<i64: 1, 32>}, {pipeline_mode = #tpu.pipeline_mode<synchronous>, transform_indices = @transform_24, window_bounds = array<i64: 32, 1>}, {pipeline_mode = #tpu.pipeline_mode<synchronous>, transform_indices = @transform_25, window_bounds = array<i64: 1, 1>}, {transform_indices = @transform_26, window_bounds = array<i64: 2, 1, 16, 1>}]} {
    %c0 = arith.constant 0 : index
    %c0_0 = arith.constant 0 : index
    %c0_1 = arith.constant 0 : index
    %c0_2 = arith.constant 0 : index
    %0 = vector.load %arg1[%c0, %c0_0, %c0_1, %c0_2] : memref<2x8x16x1xf32, #tpu.memory_space<vmem>>, vector<2x8x16x1xf32>
    %c0_3 = arith.constant 0 : index
    %c0_4 = arith.constant 0 : index
    %1 = vector.load %arg2[%c0_3, %c0_4] : memref<16x16xf32, #tpu.memory_space<vmem>>, vector<16x16xf32>
    %c0_5 = arith.constant 0 : index
    %c0_6 = arith.constant 0 : index
    %2 = vector.load %arg6[%c0_5, %c0_6] : memref<1x32xf32, #tpu.memory_space<vmem>>, vector<1x32xf32>
    %c0_7 = arith.constant 0 : index
    %c0_8 = arith.constant 0 : index
    %3 = vector.load %arg3[%c0_7, %c0_8] : memref<1x16xf32, #tpu.memory_space<vmem>>, vector<1x16xf32>
    %c0_9 = arith.constant 0 : index
    %c0_10 = arith.constant 0 : index
    %4 = vector.load %arg4[%c0_9, %c0_10] : memref<1x16xf32, #tpu.memory_space<vmem>>, vector<1x16xf32>
    %5 = vector.extract_strided_slice %0 {offsets = [0, 0, 0, 0], sizes = [2, 6, 16, 1], strides = [1, 1, 1, 1]} : vector<2x8x16x1xf32> to vector<2x6x16x1xf32>
    %6 = vector.shape_cast %5 : vector<2x6x16x1xf32> to vector<192x1xf32>
    %c0_11 = arith.constant 0 : index
    %c0_12 = arith.constant 0 : index
    %c0_13 = arith.constant 0 : index
    %7 = vector.load %arg5[%c0_11, %c0_12, %c0_13] : memref<3x1x32xf32, #tpu.memory_space<vmem>>, vector<1x1x32xf32>
    %8 = vector.shape_cast %7 : vector<1x1x32xf32> to vector<1x32xf32>
    %9 = vector.broadcast %6 : vector<192x1xf32> to vector<192x32xf32>
    %10 = vector.broadcast %8 : vector<1x32xf32> to vector<192x32xf32>
    %11 = arith.mulf %9, %10 : vector<192x32xf32>
    %12 = vector.extract_strided_slice %0 {offsets = [0, 1, 0, 0], sizes = [2, 6, 16, 1], strides = [1, 1, 1, 1]} : vector<2x8x16x1xf32> to vector<2x6x16x1xf32>
    %13 = vector.shape_cast %12 : vector<2x6x16x1xf32> to vector<192x1xf32>
    %c1 = arith.constant 1 : index
    %c0_14 = arith.constant 0 : index
    %c0_15 = arith.constant 0 : index
    %14 = vector.load %arg5[%c1, %c0_14, %c0_15] : memref<3x1x32xf32, #tpu.memory_space<vmem>>, vector<1x1x32xf32>
    %15 = vector.shape_cast %14 : vector<1x1x32xf32> to vector<1x32xf32>
    %16 = vector.broadcast %13 : vector<192x1xf32> to vector<192x32xf32>
    %17 = vector.broadcast %15 : vector<1x32xf32> to vector<192x32xf32>
    %18 = arith.mulf %16, %17 : vector<192x32xf32>
    %19 = arith.addf %11, %18 : vector<192x32xf32>
    %20 = vector.extract_strided_slice %0 {offsets = [0, 2, 0, 0], sizes = [2, 6, 16, 1], strides = [1, 1, 1, 1]} : vector<2x8x16x1xf32> to vector<2x6x16x1xf32>
    %21 = vector.shape_cast %20 : vector<2x6x16x1xf32> to vector<192x1xf32>
    %c2 = arith.constant 2 : index
    %c0_16 = arith.constant 0 : index
    %c0_17 = arith.constant 0 : index
    %22 = vector.load %arg5[%c2, %c0_16, %c0_17] : memref<3x1x32xf32, #tpu.memory_space<vmem>>, vector<1x1x32xf32>
    %23 = vector.shape_cast %22 : vector<1x1x32xf32> to vector<1x32xf32>
    %24 = vector.broadcast %21 : vector<192x1xf32> to vector<192x32xf32>
    %25 = vector.broadcast %23 : vector<1x32xf32> to vector<192x32xf32>
    %26 = arith.mulf %24, %25 : vector<192x32xf32>
    %27 = arith.addf %19, %26 : vector<192x32xf32>
    %28 = vector.broadcast %2 : vector<1x32xf32> to vector<192x32xf32>
    %29 = arith.addf %27, %28 : vector<192x32xf32>
    %30 = vector.extract_strided_slice %0 {offsets = [0, 2, 0, 0], sizes = [2, 6, 16, 1], strides = [1, 1, 1, 1]} : vector<2x8x16x1xf32> to vector<2x6x16x1xf32>
    %31 = vector.shape_cast %30 : vector<2x6x16x1xf32> to vector<192x1xf32>
    %32 = vector.broadcast %31 : vector<192x1xf32> to vector<192x16xf32>
    %33 = vector.broadcast %3 : vector<1x16xf32> to vector<192x16xf32>
    %34 = arith.mulf %32, %33 : vector<192x16xf32>
    %35 = vector.broadcast %4 : vector<1x16xf32> to vector<192x16xf32>
    %36 = arith.addf %34, %35 : vector<192x16xf32>
    %37 = vector.extract_strided_slice %29 {offsets = [0, 0], sizes = [192, 16], strides = [1, 1]} : vector<192x32xf32> to vector<192x16xf32>
    %38 = arith.addf %37, %36 : vector<192x16xf32>
    %39 = vector.extract_strided_slice %29 {offsets = [0, 16], sizes = [192, 16], strides = [1, 1]} : vector<192x32xf32> to vector<192x16xf32>
    %40 = arith.negf %39 : vector<192x16xf32>
    %41 = math.exp %40 : vector<192x16xf32>
    %cst = arith.constant 1.000000e+00 : f32
    %42 = vector.broadcast %cst : f32 to vector<192x16xf32>
    %43 = arith.addf %42, %41 : vector<192x16xf32>
    %44 = arith.divf %42, %43 : vector<192x16xf32>
    %45 = arith.mulf %38, %44 : vector<192x16xf32>
    %46 = vector.shape_cast %45 : vector<192x16xf32> to vector<2x6x16x16xf32>
    %c0_18 = arith.constant 0 : index
    %c0_19 = arith.constant 0 : index
    %47 = vector.load %arg7[%c0_18, %c0_19] : memref<16x8xf32, #tpu.memory_space<vmem>>, vector<16x8xf32>
    %c0_20 = arith.constant 0 : index
    %c0_21 = arith.constant 0 : index
    %48 = vector.load %arg8[%c0_20, %c0_21] : memref<1x8xf32, #tpu.memory_space<vmem>>, vector<1x8xf32>
    %c0_22 = arith.constant 0 : index
    %c0_23 = arith.constant 0 : index
    %49 = vector.load %arg9[%c0_22, %c0_23] : memref<8x8xf32, #tpu.memory_space<vmem>>, vector<8x8xf32>
    %c0_24 = arith.constant 0 : index
    %c0_25 = arith.constant 0 : index
    %50 = vector.load %arg10[%c0_24, %c0_25] : memref<1x8xf32, #tpu.memory_space<vmem>>, vector<1x8xf32>
    %51 = vector.shape_cast %46 : vector<2x6x16x16xf32> to vector<192x16xf32>
    %cst_26 = arith.constant dense<0.000000e+00> : vector<192x8xf32>
    %52 = tpu.matmul %51, %47, %cst_26 {dimension_numbers = #tpu.dot_dimension_numbers<[1], [0], [0], [1], [0, 0, 1, 1], [], []>} : vector<192x16xf32>, vector<16x8xf32>, vector<192x8xf32> -> vector<192x8xf32>
    %53 = vector.broadcast %48 : vector<1x8xf32> to vector<192x8xf32>
    %54 = arith.addf %52, %53 : vector<192x8xf32>
    %55 = vector.shape_cast %54 : vector<192x8xf32> to vector<12x16x8xf32>
    %56 = tpu.transpose %55, [0, 2, 1] : vector<12x16x8xf32> -> vector<12x8x16xf32>
    %57 = vector.shape_cast %56 : vector<12x8x16xf32> to vector<96x16xf32>
    %cst_27 = arith.constant dense<0.000000e+00> : vector<96x16xf32>
    %58 = tpu.matmul %57, %1, %cst_27 {dimension_numbers = #tpu.dot_dimension_numbers<[1], [0], [0], [1], [0, 0, 1, 1], [], []>} : vector<96x16xf32>, vector<16x16xf32>, vector<96x16xf32> -> vector<96x16xf32>
    %59 = vector.shape_cast %58 : vector<96x16xf32> to vector<12x8x16xf32>
    %60 = tpu.transpose %59, [0, 2, 1] : vector<12x8x16xf32> -> vector<12x16x8xf32>
    %61 = vector.shape_cast %60 : vector<12x16x8xf32> to vector<192x8xf32>
    %cst_28 = arith.constant dense<0.000000e+00> : vector<192x8xf32>
    %62 = tpu.matmul %61, %49, %cst_28 {dimension_numbers = #tpu.dot_dimension_numbers<[1], [0], [0], [1], [0, 0, 1, 1], [], []>} : vector<192x8xf32>, vector<8x8xf32>, vector<192x8xf32> -> vector<192x8xf32>
    %63 = vector.broadcast %50 : vector<1x8xf32> to vector<192x8xf32>
    %64 = arith.addf %62, %63 : vector<192x8xf32>
    %65 = arith.addf %64, %54 : vector<192x8xf32>
    %cst_29 = arith.constant 0.000000e+00 : f32
    %66 = vector.broadcast %cst_29 : f32 to vector<192x8xf32>
    %67 = arith.maximumf %65, %66 : vector<192x8xf32>
    %68 = vector.shape_cast %67 : vector<192x8xf32> to vector<2x6x16x8xf32>
    %c0_30 = arith.constant 0 : index
    %c0_31 = arith.constant 0 : index
    %69 = vector.load %arg14[%c0_30, %c0_31] : memref<1x32xf32, #tpu.memory_space<vmem>>, vector<1x32xf32>
    %c0_32 = arith.constant 0 : index
    %c0_33 = arith.constant 0 : index
    %70 = vector.load %arg11[%c0_32, %c0_33] : memref<8x16xf32, #tpu.memory_space<vmem>>, vector<8x16xf32>
    %c0_34 = arith.constant 0 : index
    %c0_35 = arith.constant 0 : index
    %71 = vector.load %arg12[%c0_34, %c0_35] : memref<1x16xf32, #tpu.memory_space<vmem>>, vector<1x16xf32>
    %72 = vector.extract_strided_slice %68 {offsets = [0, 0, 0, 0], sizes = [2, 4, 16, 8], strides = [1, 1, 1, 1]} : vector<2x6x16x8xf32> to vector<2x4x16x8xf32>
    %73 = vector.shape_cast %72 : vector<2x4x16x8xf32> to vector<128x8xf32>
    %c0_36 = arith.constant 0 : index
    %c0_37 = arith.constant 0 : index
    %c0_38 = arith.constant 0 : index
    %74 = vector.load %arg13[%c0_36, %c0_37, %c0_38] : memref<3x8x32xf32, #tpu.memory_space<vmem>>, vector<1x8x32xf32>
    %75 = vector.shape_cast %74 : vector<1x8x32xf32> to vector<8x32xf32>
    %cst_39 = arith.constant dense<0.000000e+00> : vector<128x32xf32>
    %76 = tpu.matmul %73, %75, %cst_39 {dimension_numbers = #tpu.dot_dimension_numbers<[1], [0], [0], [1], [0, 0, 1, 1], [], []>} : vector<128x8xf32>, vector<8x32xf32>, vector<128x32xf32> -> vector<128x32xf32>
    %77 = vector.extract_strided_slice %68 {offsets = [0, 1, 0, 0], sizes = [2, 4, 16, 8], strides = [1, 1, 1, 1]} : vector<2x6x16x8xf32> to vector<2x4x16x8xf32>
    %78 = vector.shape_cast %77 : vector<2x4x16x8xf32> to vector<128x8xf32>
    %c1_40 = arith.constant 1 : index
    %c0_41 = arith.constant 0 : index
    %c0_42 = arith.constant 0 : index
    %79 = vector.load %arg13[%c1_40, %c0_41, %c0_42] : memref<3x8x32xf32, #tpu.memory_space<vmem>>, vector<1x8x32xf32>
    %80 = vector.shape_cast %79 : vector<1x8x32xf32> to vector<8x32xf32>
    %cst_43 = arith.constant dense<0.000000e+00> : vector<128x32xf32>
    %81 = tpu.matmul %78, %80, %cst_43 {dimension_numbers = #tpu.dot_dimension_numbers<[1], [0], [0], [1], [0, 0, 1, 1], [], []>} : vector<128x8xf32>, vector<8x32xf32>, vector<128x32xf32> -> vector<128x32xf32>
    %82 = arith.addf %76, %81 : vector<128x32xf32>
    %83 = vector.extract_strided_slice %68 {offsets = [0, 2, 0, 0], sizes = [2, 4, 16, 8], strides = [1, 1, 1, 1]} : vector<2x6x16x8xf32> to vector<2x4x16x8xf32>
    %84 = vector.shape_cast %83 : vector<2x4x16x8xf32> to vector<128x8xf32>
    %c2_44 = arith.constant 2 : index
    %c0_45 = arith.constant 0 : index
    %c0_46 = arith.constant 0 : index
    %85 = vector.load %arg13[%c2_44, %c0_45, %c0_46] : memref<3x8x32xf32, #tpu.memory_space<vmem>>, vector<1x8x32xf32>
    %86 = vector.shape_cast %85 : vector<1x8x32xf32> to vector<8x32xf32>
    %cst_47 = arith.constant dense<0.000000e+00> : vector<128x32xf32>
    %87 = tpu.matmul %84, %86, %cst_47 {dimension_numbers = #tpu.dot_dimension_numbers<[1], [0], [0], [1], [0, 0, 1, 1], [], []>} : vector<128x8xf32>, vector<8x32xf32>, vector<128x32xf32> -> vector<128x32xf32>
    %88 = arith.addf %82, %87 : vector<128x32xf32>
    %89 = vector.broadcast %69 : vector<1x32xf32> to vector<128x32xf32>
    %90 = arith.addf %88, %89 : vector<128x32xf32>
    %91 = vector.extract_strided_slice %68 {offsets = [0, 2, 0, 0], sizes = [2, 4, 16, 8], strides = [1, 1, 1, 1]} : vector<2x6x16x8xf32> to vector<2x4x16x8xf32>
    %92 = vector.shape_cast %91 : vector<2x4x16x8xf32> to vector<128x8xf32>
    %cst_48 = arith.constant dense<0.000000e+00> : vector<128x16xf32>
    %93 = tpu.matmul %92, %70, %cst_48 {dimension_numbers = #tpu.dot_dimension_numbers<[1], [0], [0], [1], [0, 0, 1, 1], [], []>} : vector<128x8xf32>, vector<8x16xf32>, vector<128x16xf32> -> vector<128x16xf32>
    %94 = vector.broadcast %71 : vector<1x16xf32> to vector<128x16xf32>
    %95 = arith.addf %93, %94 : vector<128x16xf32>
    %96 = vector.extract_strided_slice %90 {offsets = [0, 0], sizes = [128, 16], strides = [1, 1]} : vector<128x32xf32> to vector<128x16xf32>
    %97 = arith.addf %96, %95 : vector<128x16xf32>
    %98 = vector.extract_strided_slice %90 {offsets = [0, 16], sizes = [128, 16], strides = [1, 1]} : vector<128x32xf32> to vector<128x16xf32>
    %99 = arith.negf %98 : vector<128x16xf32>
    %100 = math.exp %99 : vector<128x16xf32>
    %cst_49 = arith.constant 1.000000e+00 : f32
    %101 = vector.broadcast %cst_49 : f32 to vector<128x16xf32>
    %102 = arith.addf %101, %100 : vector<128x16xf32>
    %103 = arith.divf %101, %102 : vector<128x16xf32>
    %104 = arith.mulf %97, %103 : vector<128x16xf32>
    %105 = vector.shape_cast %104 : vector<128x16xf32> to vector<2x4x16x16xf32>
    %c0_50 = arith.constant 0 : index
    %c0_51 = arith.constant 0 : index
    %106 = vector.load %arg15[%c0_50, %c0_51] : memref<16x16xf32, #tpu.memory_space<vmem>>, vector<16x16xf32>
    %c0_52 = arith.constant 0 : index
    %c0_53 = arith.constant 0 : index
    %107 = vector.load %arg16[%c0_52, %c0_53] : memref<16x16xf32, #tpu.memory_space<vmem>>, vector<16x16xf32>
    %cst_54 = arith.constant dense<0.000000e+00> : vector<2x4x16xf32>
    %108 = vector.multi_reduction <add>, %105, %cst_54 [3] : vector<2x4x16x16xf32> to vector<2x4x16xf32>
    %109 = vector.shape_cast %108 : vector<2x4x16xf32> to vector<2x4x16x1xf32>
    %cst_55 = arith.constant 1.600000e+01 : f32
    %110 = vector.broadcast %cst_55 : f32 to vector<2x4x16x1xf32>
    %111 = arith.divf %109, %110 : vector<2x4x16x1xf32>
    %cst_56 = arith.constant dense<0.000000e+00> : vector<2x4x1xf32>
    %112 = vector.multi_reduction <add>, %111, %cst_56 [2] : vector<2x4x16x1xf32> to vector<2x4x1xf32>
    %113 = vector.shape_cast %112 : vector<2x4x1xf32> to vector<2x4x1x1xf32>
    %cst_57 = arith.constant 1.600000e+01 : f32
    %114 = vector.broadcast %cst_57 : f32 to vector<2x4x1x1xf32>
    %115 = arith.divf %113, %114 : vector<2x4x1x1xf32>
    %116 = vector.broadcast %115 : vector<2x4x1x1xf32> to vector<2x4x16x16xf32>
    %117 = arith.subf %105, %116 : vector<2x4x16x16xf32>
    %118 = arith.mulf %117, %117 : vector<2x4x16x16xf32>
    %cst_58 = arith.constant dense<0.000000e+00> : vector<2x4x16xf32>
    %119 = vector.multi_reduction <add>, %118, %cst_58 [3] : vector<2x4x16x16xf32> to vector<2x4x16xf32>
    %120 = vector.shape_cast %119 : vector<2x4x16xf32> to vector<2x4x16x1xf32>
    %cst_59 = arith.constant 1.600000e+01 : f32
    %121 = vector.broadcast %cst_59 : f32 to vector<2x4x16x1xf32>
    %122 = arith.divf %120, %121 : vector<2x4x16x1xf32>
    %cst_60 = arith.constant dense<0.000000e+00> : vector<2x4x1xf32>
    %123 = vector.multi_reduction <add>, %122, %cst_60 [2] : vector<2x4x16x1xf32> to vector<2x4x1xf32>
    %124 = vector.shape_cast %123 : vector<2x4x1xf32> to vector<2x4x1x1xf32>
    %cst_61 = arith.constant 1.600000e+01 : f32
    %125 = vector.broadcast %cst_61 : f32 to vector<2x4x1x1xf32>
    %126 = arith.divf %124, %125 : vector<2x4x1x1xf32>
    %127 = vector.broadcast %115 : vector<2x4x1x1xf32> to vector<2x4x16x16xf32>
    %128 = arith.subf %105, %127 : vector<2x4x16x16xf32>
    %cst_62 = arith.constant 9.99999974E-6 : f32
    %129 = vector.broadcast %cst_62 : f32 to vector<2x4x1x1xf32>
    %130 = arith.addf %126, %129 : vector<2x4x1x1xf32>
    %131 = math.rsqrt %130 : vector<2x4x1x1xf32>
    %132 = vector.broadcast %131 : vector<2x4x1x1xf32> to vector<2x4x16x16xf32>
    %133 = arith.mulf %128, %132 : vector<2x4x16x16xf32>
    %134 = vector.shape_cast %106 : vector<16x16xf32> to vector<1x1x16x16xf32>
    %135 = vector.broadcast %134 : vector<1x1x16x16xf32> to vector<2x4x16x16xf32>
    %136 = arith.mulf %133, %135 : vector<2x4x16x16xf32>
    %137 = vector.shape_cast %107 : vector<16x16xf32> to vector<1x1x16x16xf32>
    %138 = vector.broadcast %137 : vector<1x1x16x16xf32> to vector<2x4x16x16xf32>
    %139 = arith.addf %136, %138 : vector<2x4x16x16xf32>
    %c0_63 = arith.constant 0 : index
    %c0_64 = arith.constant 0 : index
    %140 = vector.load %arg20[%c0_63, %c0_64] : memref<1x64xf32, #tpu.memory_space<vmem>>, vector<1x64xf32>
    %c0_65 = arith.constant 0 : index
    %c0_66 = arith.constant 0 : index
    %141 = vector.load %arg17[%c0_65, %c0_66] : memref<16x32xf32, #tpu.memory_space<vmem>>, vector<16x32xf32>
    %c0_67 = arith.constant 0 : index
    %c0_68 = arith.constant 0 : index
    %142 = vector.load %arg18[%c0_67, %c0_68] : memref<1x32xf32, #tpu.memory_space<vmem>>, vector<1x32xf32>
    %143 = vector.extract_strided_slice %139 {offsets = [0, 0, 0, 0], sizes = [2, 1, 16, 16], strides = [1, 1, 1, 1]} : vector<2x4x16x16xf32> to vector<2x1x16x16xf32>
    %144 = vector.shape_cast %143 : vector<2x1x16x16xf32> to vector<32x16xf32>
    %c0_69 = arith.constant 0 : index
    %c0_70 = arith.constant 0 : index
    %c0_71 = arith.constant 0 : index
    %145 = vector.load %arg19[%c0_69, %c0_70, %c0_71] : memref<4x16x64xf32, #tpu.memory_space<vmem>>, vector<1x16x64xf32>
    %146 = vector.shape_cast %145 : vector<1x16x64xf32> to vector<16x64xf32>
    %cst_72 = arith.constant dense<0.000000e+00> : vector<32x64xf32>
    %147 = tpu.matmul %144, %146, %cst_72 {dimension_numbers = #tpu.dot_dimension_numbers<[1], [0], [0], [1], [0, 0, 1, 1], [], []>} : vector<32x16xf32>, vector<16x64xf32>, vector<32x64xf32> -> vector<32x64xf32>
    %148 = vector.extract_strided_slice %139 {offsets = [0, 1, 0, 0], sizes = [2, 1, 16, 16], strides = [1, 1, 1, 1]} : vector<2x4x16x16xf32> to vector<2x1x16x16xf32>
    %149 = vector.shape_cast %148 : vector<2x1x16x16xf32> to vector<32x16xf32>
    %c1_73 = arith.constant 1 : index
    %c0_74 = arith.constant 0 : index
    %c0_75 = arith.constant 0 : index
    %150 = vector.load %arg19[%c1_73, %c0_74, %c0_75] : memref<4x16x64xf32, #tpu.memory_space<vmem>>, vector<1x16x64xf32>
    %151 = vector.shape_cast %150 : vector<1x16x64xf32> to vector<16x64xf32>
    %cst_76 = arith.constant dense<0.000000e+00> : vector<32x64xf32>
    %152 = tpu.matmul %149, %151, %cst_76 {dimension_numbers = #tpu.dot_dimension_numbers<[1], [0], [0], [1], [0, 0, 1, 1], [], []>} : vector<32x16xf32>, vector<16x64xf32>, vector<32x64xf32> -> vector<32x64xf32>
    %153 = arith.addf %147, %152 : vector<32x64xf32>
    %154 = vector.extract_strided_slice %139 {offsets = [0, 2, 0, 0], sizes = [2, 1, 16, 16], strides = [1, 1, 1, 1]} : vector<2x4x16x16xf32> to vector<2x1x16x16xf32>
    %155 = vector.shape_cast %154 : vector<2x1x16x16xf32> to vector<32x16xf32>
    %c2_77 = arith.constant 2 : index
    %c0_78 = arith.constant 0 : index
    %c0_79 = arith.constant 0 : index
    %156 = vector.load %arg19[%c2_77, %c0_78, %c0_79] : memref<4x16x64xf32, #tpu.memory_space<vmem>>, vector<1x16x64xf32>
    %157 = vector.shape_cast %156 : vector<1x16x64xf32> to vector<16x64xf32>
    %cst_80 = arith.constant dense<0.000000e+00> : vector<32x64xf32>
    %158 = tpu.matmul %155, %157, %cst_80 {dimension_numbers = #tpu.dot_dimension_numbers<[1], [0], [0], [1], [0, 0, 1, 1], [], []>} : vector<32x16xf32>, vector<16x64xf32>, vector<32x64xf32> -> vector<32x64xf32>
    %159 = arith.addf %153, %158 : vector<32x64xf32>
    %160 = vector.extract_strided_slice %139 {offsets = [0, 3, 0, 0], sizes = [2, 1, 16, 16], strides = [1, 1, 1, 1]} : vector<2x4x16x16xf32> to vector<2x1x16x16xf32>
    %161 = vector.shape_cast %160 : vector<2x1x16x16xf32> to vector<32x16xf32>
    %c3 = arith.constant 3 : index
    %c0_81 = arith.constant 0 : index
    %c0_82 = arith.constant 0 : index
    %162 = vector.load %arg19[%c3, %c0_81, %c0_82] : memref<4x16x64xf32, #tpu.memory_space<vmem>>, vector<1x16x64xf32>
    %163 = vector.shape_cast %162 : vector<1x16x64xf32> to vector<16x64xf32>
    %cst_83 = arith.constant dense<0.000000e+00> : vector<32x64xf32>
    %164 = tpu.matmul %161, %163, %cst_83 {dimension_numbers = #tpu.dot_dimension_numbers<[1], [0], [0], [1], [0, 0, 1, 1], [], []>} : vector<32x16xf32>, vector<16x64xf32>, vector<32x64xf32> -> vector<32x64xf32>
    %165 = arith.addf %159, %164 : vector<32x64xf32>
    %166 = vector.broadcast %140 : vector<1x64xf32> to vector<32x64xf32>
    %167 = arith.addf %165, %166 : vector<32x64xf32>
    %168 = vector.extract_strided_slice %139 {offsets = [0, 3, 0, 0], sizes = [2, 1, 16, 16], strides = [1, 1, 1, 1]} : vector<2x4x16x16xf32> to vector<2x1x16x16xf32>
    %169 = vector.shape_cast %168 : vector<2x1x16x16xf32> to vector<32x16xf32>
    %cst_84 = arith.constant dense<0.000000e+00> : vector<32x32xf32>
    %170 = tpu.matmul %169, %141, %cst_84 {dimension_numbers = #tpu.dot_dimension_numbers<[1], [0], [0], [1], [0, 0, 1, 1], [], []>} : vector<32x16xf32>, vector<16x32xf32>, vector<32x32xf32> -> vector<32x32xf32>
    %171 = vector.broadcast %142 : vector<1x32xf32> to vector<32x32xf32>
    %172 = arith.addf %170, %171 : vector<32x32xf32>
    %173 = vector.extract_strided_slice %167 {offsets = [0, 0], sizes = [32, 32], strides = [1, 1]} : vector<32x64xf32> to vector<32x32xf32>
    %174 = arith.addf %173, %172 : vector<32x32xf32>
    %175 = vector.extract_strided_slice %167 {offsets = [0, 32], sizes = [32, 32], strides = [1, 1]} : vector<32x64xf32> to vector<32x32xf32>
    %176 = arith.negf %175 : vector<32x32xf32>
    %177 = math.exp %176 : vector<32x32xf32>
    %cst_85 = arith.constant 1.000000e+00 : f32
    %178 = vector.broadcast %cst_85 : f32 to vector<32x32xf32>
    %179 = arith.addf %178, %177 : vector<32x32xf32>
    %180 = arith.divf %178, %179 : vector<32x32xf32>
    %181 = arith.mulf %174, %180 : vector<32x32xf32>
    %182 = vector.shape_cast %181 : vector<32x32xf32> to vector<2x1x16x32xf32>
    %c0_86 = arith.constant 0 : index
    %c0_87 = arith.constant 0 : index
    %183 = vector.load %arg21[%c0_86, %c0_87] : memref<16x32xf32, #tpu.memory_space<vmem>>, vector<16x32xf32>
    %c0_88 = arith.constant 0 : index
    %c0_89 = arith.constant 0 : index
    %184 = vector.load %arg22[%c0_88, %c0_89] : memref<16x32xf32, #tpu.memory_space<vmem>>, vector<16x32xf32>
    %cst_90 = arith.constant dense<0.000000e+00> : vector<2x1x16xf32>
    %185 = vector.multi_reduction <add>, %182, %cst_90 [3] : vector<2x1x16x32xf32> to vector<2x1x16xf32>
    %186 = vector.shape_cast %185 : vector<2x1x16xf32> to vector<2x1x16x1xf32>
    %cst_91 = arith.constant 3.200000e+01 : f32
    %187 = vector.broadcast %cst_91 : f32 to vector<2x1x16x1xf32>
    %188 = arith.divf %186, %187 : vector<2x1x16x1xf32>
    %cst_92 = arith.constant dense<0.000000e+00> : vector<2x1x1xf32>
    %189 = vector.multi_reduction <add>, %188, %cst_92 [2] : vector<2x1x16x1xf32> to vector<2x1x1xf32>
    %190 = vector.shape_cast %189 : vector<2x1x1xf32> to vector<2x1x1x1xf32>
    %cst_93 = arith.constant 1.600000e+01 : f32
    %191 = vector.broadcast %cst_93 : f32 to vector<2x1x1x1xf32>
    %192 = arith.divf %190, %191 : vector<2x1x1x1xf32>
    %193 = vector.broadcast %192 : vector<2x1x1x1xf32> to vector<2x1x16x32xf32>
    %194 = arith.subf %182, %193 : vector<2x1x16x32xf32>
    %195 = arith.mulf %194, %194 : vector<2x1x16x32xf32>
    %cst_94 = arith.constant dense<0.000000e+00> : vector<2x1x16xf32>
    %196 = vector.multi_reduction <add>, %195, %cst_94 [3] : vector<2x1x16x32xf32> to vector<2x1x16xf32>
    %197 = vector.shape_cast %196 : vector<2x1x16xf32> to vector<2x1x16x1xf32>
    %cst_95 = arith.constant 3.200000e+01 : f32
    %198 = vector.broadcast %cst_95 : f32 to vector<2x1x16x1xf32>
    %199 = arith.divf %197, %198 : vector<2x1x16x1xf32>
    %cst_96 = arith.constant dense<0.000000e+00> : vector<2x1x1xf32>
    %200 = vector.multi_reduction <add>, %199, %cst_96 [2] : vector<2x1x16x1xf32> to vector<2x1x1xf32>
    %201 = vector.shape_cast %200 : vector<2x1x1xf32> to vector<2x1x1x1xf32>
    %cst_97 = arith.constant 1.600000e+01 : f32
    %202 = vector.broadcast %cst_97 : f32 to vector<2x1x1x1xf32>
    %203 = arith.divf %201, %202 : vector<2x1x1x1xf32>
    %204 = vector.broadcast %192 : vector<2x1x1x1xf32> to vector<2x1x16x32xf32>
    %205 = arith.subf %182, %204 : vector<2x1x16x32xf32>
    %cst_98 = arith.constant 9.99999974E-6 : f32
    %206 = vector.broadcast %cst_98 : f32 to vector<2x1x1x1xf32>
    %207 = arith.addf %203, %206 : vector<2x1x1x1xf32>
    %208 = math.rsqrt %207 : vector<2x1x1x1xf32>
    %209 = vector.broadcast %208 : vector<2x1x1x1xf32> to vector<2x1x16x32xf32>
    %210 = arith.mulf %205, %209 : vector<2x1x16x32xf32>
    %211 = vector.shape_cast %183 : vector<16x32xf32> to vector<1x1x16x32xf32>
    %212 = vector.broadcast %211 : vector<1x1x16x32xf32> to vector<2x1x16x32xf32>
    %213 = arith.mulf %210, %212 : vector<2x1x16x32xf32>
    %214 = vector.shape_cast %184 : vector<16x32xf32> to vector<1x1x16x32xf32>
    %215 = vector.broadcast %214 : vector<1x1x16x32xf32> to vector<2x1x16x32xf32>
    %216 = arith.addf %213, %215 : vector<2x1x16x32xf32>
    %c0_99 = arith.constant 0 : index
    %c0_100 = arith.constant 0 : index
    %217 = vector.load %arg23[%c0_99, %c0_100] : memref<32x32xf32, #tpu.memory_space<vmem>>, vector<32x32xf32>
    %c0_101 = arith.constant 0 : index
    %c0_102 = arith.constant 0 : index
    %218 = vector.load %arg24[%c0_101, %c0_102] : memref<1x32xf32, #tpu.memory_space<vmem>>, vector<1x32xf32>
    %c0_103 = arith.constant 0 : index
    %c0_104 = arith.constant 0 : index
    %219 = vector.load %arg25[%c0_103, %c0_104] : memref<32x1xf32, #tpu.memory_space<vmem>>, vector<32x1xf32>
    %c0_105 = arith.constant 0 : index
    %c0_106 = arith.constant 0 : index
    %220 = vector.load %arg26[%c0_105, %c0_106] : memref<1x1xf32, #tpu.memory_space<vmem>>, vector<1x1xf32>
    %221 = vector.shape_cast %216 : vector<2x1x16x32xf32> to vector<32x32xf32>
    %cst_107 = arith.constant dense<0.000000e+00> : vector<32x32xf32>
    %222 = tpu.matmul %221, %217, %cst_107 {dimension_numbers = #tpu.dot_dimension_numbers<[1], [0], [0], [1], [0, 0, 1, 1], [], []>} : vector<32x32xf32>, vector<32x32xf32>, vector<32x32xf32> -> vector<32x32xf32>
    %223 = vector.broadcast %218 : vector<1x32xf32> to vector<32x32xf32>
    %224 = arith.addf %222, %223 : vector<32x32xf32>
    %cst_108 = arith.constant 0.000000e+00 : f32
    %225 = vector.broadcast %cst_108 : f32 to vector<32x32xf32>
    %226 = arith.maximumf %224, %225 : vector<32x32xf32>
    %cst_109 = arith.constant dense<0.000000e+00> : vector<32x1xf32>
    %227 = tpu.matmul %226, %219, %cst_109 {dimension_numbers = #tpu.dot_dimension_numbers<[1], [0], [0], [1], [0, 0, 1, 1], [], []>} : vector<32x32xf32>, vector<32x1xf32>, vector<32x1xf32> -> vector<32x1xf32>
    %228 = vector.broadcast %220 : vector<1x1xf32> to vector<32x1xf32>
    %229 = arith.addf %227, %228 : vector<32x1xf32>
    %230 = vector.shape_cast %229 : vector<32x1xf32> to vector<2x1x16x1xf32>
    %c0_110 = arith.constant 0 : index
    %c0_111 = arith.constant 0 : index
    %c0_112 = arith.constant 0 : index
    %c0_113 = arith.constant 0 : index
    %231 = vector.load %arg27[%c0_110, %c0_111, %c0_112, %c0_113] : memref<2x1x16x1xf32, #tpu.memory_space<vmem>>, vector<2x1x16x1xf32>
    tpu.vector_store %arg27[%c0_110, %c0_111, %c0_112, %c0_113], %230 {strides = array<i32>} : memref<2x1x16x1xf32, #tpu.memory_space<vmem>>, vector<2x1x16x1xf32>,
    return
  }
  func.func @transform_0(%arg0: i32) -> (i32, i32, i32, i32) {
    %c0_i32 = arith.constant 0 : i32
    %c0_i32_0 = arith.constant 0 : i32
    %c0_i32_1 = arith.constant 0 : i32
    %c0_i32_2 = arith.constant 0 : i32
    return %arg0, %c0_i32, %c0_i32_0, %c0_i32_1 : i32, i32, i32, i32
  }
  func.func @transform_1(%arg0: i32) -> (i32, i32) {
    %c0_i32 = arith.constant 0 : i32
    %c0_i32_0 = arith.constant 0 : i32
    %c0_i32_1 = arith.constant 0 : i32
    return %c0_i32, %c0_i32_0 : i32, i32
  }
  func.func @transform_2(%arg0: i32) -> (i32, i32) {
    %c0_i32 = arith.constant 0 : i32
    %c0_i32_0 = arith.constant 0 : i32
    %c0_i32_1 = arith.constant 0 : i32
    return %c0_i32, %c0_i32_0 : i32, i32
  }
  func.func @transform_3(%arg0: i32) -> (i32, i32) {
    %c0_i32 = arith.constant 0 : i32
    %c0_i32_0 = arith.constant 0 : i32
    %c0_i32_1 = arith.constant 0 : i32
    return %c0_i32, %c0_i32_0 : i32, i32
  }
  func.func @transform_4(%arg0: i32) -> (i32, i32, i32) {
    %c0_i32 = arith.constant 0 : i32
    %c0_i32_0 = arith.constant 0 : i32
    %c0_i32_1 = arith.constant 0 : i32
    %c0_i32_2 = arith.constant 0 : i32
    return %c0_i32, %c0_i32_0, %c0_i32_1 : i32, i32, i32
  }
  func.func @transform_5(%arg0: i32) -> (i32, i32) {
    %c0_i32 = arith.constant 0 : i32
    %c0_i32_0 = arith.constant 0 : i32
    %c0_i32_1 = arith.constant 0 : i32
    return %c0_i32, %c0_i32_0 : i32, i32
  }
  func.func @transform_6(%arg0: i32) -> (i32, i32) {
    %c0_i32 = arith.constant 0 : i32
    %c0_i32_0 = arith.constant 0 : i32
    %c0_i32_1 = arith.constant 0 : i32
    return %c0_i32, %c0_i32_0 : i32, i32
  }
  func.func @transform_7(%arg0: i32) -> (i32, i32) {
    %c0_i32 = arith.constant 0 : i32
    %c0_i32_0 = arith.constant 0 : i32
    %c0_i32_1 = arith.constant 0 : i32
    return %c0_i32, %c0_i32_0 : i32, i32
  }
  func.func @transform_8(%arg0: i32) -> (i32, i32) {
    %c0_i32 = arith.constant 0 : i32
    %c0_i32_0 = arith.constant 0 : i32
    %c0_i32_1 = arith.constant 0 : i32
    return %c0_i32, %c0_i32_0 : i32, i32
  }
  func.func @transform_9(%arg0: i32) -> (i32, i32) {
    %c0_i32 = arith.constant 0 : i32
    %c0_i32_0 = arith.constant 0 : i32
    %c0_i32_1 = arith.constant 0 : i32
    return %c0_i32, %c0_i32_0 : i32, i32
  }
  func.func @transform_10(%arg0: i32) -> (i32, i32) {
    %c0_i32 = arith.constant 0 : i32
    %c0_i32_0 = arith.constant 0 : i32
    %c0_i32_1 = arith.constant 0 : i32
    return %c0_i32, %c0_i32_0 : i32, i32
  }
  func.func @transform_11(%arg0: i32) -> (i32, i32) {
    %c0_i32 = arith.constant 0 : i32
    %c0_i32_0 = arith.constant 0 : i32
    %c0_i32_1 = arith.constant 0 : i32
    return %c0_i32, %c0_i32_0 : i32, i32
  }
  func.func @transform_12(%arg0: i32) -> (i32, i32, i32) {
    %c0_i32 = arith.constant 0 : i32
    %c0_i32_0 = arith.constant 0 : i32
    %c0_i32_1 = arith.constant 0 : i32
    %c0_i32_2 = arith.constant 0 : i32
    return %c0_i32, %c0_i32_0, %c0_i32_1 : i32, i32, i32
  }
  func.func @transform_13(%arg0: i32) -> (i32, i32) {
    %c0_i32 = arith.constant 0 : i32
    %c0_i32_0 = arith.constant 0 : i32
    %c0_i32_1 = arith.constant 0 : i32
    return %c0_i32, %c0_i32_0 : i32, i32
  }
  func.func @transform_14(%arg0: i32) -> (i32, i32) {
    %c0_i32 = arith.constant 0 : i32
    %c0_i32_0 = arith.constant 0 : i32
    %c0_i32_1 = arith.constant 0 : i32
    return %c0_i32, %c0_i32_0 : i32, i32
  }
  func.func @transform_15(%arg0: i32) -> (i32, i32) {
    %c0_i32 = arith.constant 0 : i32
    %c0_i32_0 = arith.constant 0 : i32
    %c0_i32_1 = arith.constant 0 : i32
    return %c0_i32, %c0_i32_0 : i32, i32
  }
  func.func @transform_16(%arg0: i32) -> (i32, i32) {
    %c0_i32 = arith.constant 0 : i32
    %c0_i32_0 = arith.constant 0 : i32
    %c0_i32_1 = arith.constant 0 : i32
    return %c0_i32, %c0_i32_0 : i32, i32
  }
  func.func @transform_17(%arg0: i32) -> (i32, i32) {
    %c0_i32 = arith.constant 0 : i32
    %c0_i32_0 = arith.constant 0 : i32
    %c0_i32_1 = arith.constant 0 : i32
    return %c0_i32, %c0_i32_0 : i32, i32
  }
  func.func @transform_18(%arg0: i32) -> (i32, i32, i32) {
    %c0_i32 = arith.constant 0 : i32
    %c0_i32_0 = arith.constant 0 : i32
    %c0_i32_1 = arith.constant 0 : i32
    %c0_i32_2 = arith.constant 0 : i32
    return %c0_i32, %c0_i32_0, %c0_i32_1 : i32, i32, i32
  }
  func.func @transform_19(%arg0: i32) -> (i32, i32) {
    %c0_i32 = arith.constant 0 : i32
    %c0_i32_0 = arith.constant 0 : i32
    %c0_i32_1 = arith.constant 0 : i32
    return %c0_i32, %c0_i32_0 : i32, i32
  }
  func.func @transform_20(%arg0: i32) -> (i32, i32) {
    %c0_i32 = arith.constant 0 : i32
    %c0_i32_0 = arith.constant 0 : i32
    %c0_i32_1 = arith.constant 0 : i32
    return %c0_i32, %c0_i32_0 : i32, i32
  }
  func.func @transform_21(%arg0: i32) -> (i32, i32) {
    %c0_i32 = arith.constant 0 : i32
    %c0_i32_0 = arith.constant 0 : i32
    %c0_i32_1 = arith.constant 0 : i32
    return %c0_i32, %c0_i32_0 : i32, i32
  }
  func.func @transform_22(%arg0: i32) -> (i32, i32) {
    %c0_i32 = arith.constant 0 : i32
    %c0_i32_0 = arith.constant 0 : i32
    %c0_i32_1 = arith.constant 0 : i32
    return %c0_i32, %c0_i32_0 : i32, i32
  }
  func.func @transform_23(%arg0: i32) -> (i32, i32) {
    %c0_i32 = arith.constant 0 : i32
    %c0_i32_0 = arith.constant 0 : i32
    %c0_i32_1 = arith.constant 0 : i32
    return %c0_i32, %c0_i32_0 : i32, i32
  }
  func.func @transform_24(%arg0: i32) -> (i32, i32) {
    %c0_i32 = arith.constant 0 : i32
    %c0_i32_0 = arith.constant 0 : i32
    %c0_i32_1 = arith.constant 0 : i32
    return %c0_i32, %c0_i32_0 : i32, i32
  }
  func.func @transform_25(%arg0: i32) -> (i32, i32) {
    %c0_i32 = arith.constant 0 : i32
    %c0_i32_0 = arith.constant 0 : i32
    %c0_i32_1 = arith.constant 0 : i32
    return %c0_i32, %c0_i32_0 : i32, i32
  }
  func.func @transform_26(%arg0: i32) -> (i32, i32, i32, i32) {
    %c0_i32 = arith.constant 0 : i32
    %c0_i32_0 = arith.constant 0 : i32
    %c0_i32_1 = arith.constant 0 : i32
    %c0_i32_2 = arith.constant 0 : i32
    return %arg0, %c0_i32, %c0_i32_0, %c0_i32_1 : i32, i32, i32, i32
  }
}

</mosaic_0001>

<bundles_post_ra>
// kernel: _lambda_.1
= control target key start
LH: loop header
LB: loop body
LE: loop exit
PB: predicated region body
PF: predicated region fallthrough
CT: control target
= control target key end

     0   :  { %s7610_s0 = inlined_call_operand.vmem [shape: f32[4,8,16,1], index: 0, kind: input, shape index: {}]   ;;  %s7611_s1 = inlined_call_operand.vmem [shape: f32[16,16], index: 1, kind: input, shape index: {}]   ;;  %s7612_s2 = inlined_call_operand.vmem [shape: f32[1,16], index: 2, kind: input, shape index: {}]   ;;  %s7613_s3 = inlined_call_operand.vmem [shape: f32[1,16], index: 3, kind: input, shape index: {}, may-alias: {3,11}]   ;;  %s7614_s4 = inlined_call_operand.vmem [shape: f32[3,1,32], index: 4, kind: input, shape index: {}]   ;;  %s7615_s5 = inlined_call_operand.vmem [shape: f32[1,32], index: 5, kind: input, shape index: {}]   ;;  %s7616_s6 = inlined_call_operand.vmem [shape: f32[16,8], index: 6, kind: input, shape index: {}]   ;;  %s7617_s7 = inlined_call_operand.vmem [shape: f32[1,8], index: 7, kind: input, shape index: {}]   ;;  %s7618_s8 = inlined_call_operand.vmem [shape: f32[8,8], index: 8, kind: input, shape index: {}]   ;;  %s7619_s9 = inlined_call_operand.vmem [shape: f32[1,8], index: 9, kind: input, shape index: {}]   ;;  %s7620_s10 = inlined_call_operand.vmem [shape: f32[8,16], index: 10, kind: input, shape index: {}]   ;;  %s7621_s11 = inlined_call_operand.vmem [shape: f32[1,16], index: 11, kind: input, shape index: {}, may-alias: {3,11}]   ;;  %s7622_s12 = inlined_call_operand.vmem [shape: f32[3,8,32], index: 12, kind: input, shape index: {}]   ;;  %s7623_s13 = inlined_call_operand.vmem [shape: f32[1,32], index: 13, kind: input, shape index: {}]   ;;  %s7624_s14 = inlined_call_operand.vmem [shape: f32[16,16], index: 14, kind: input, shape index: {}]   ;;  %s7625_s15 = inlined_call_operand.vmem [shape: f32[16,16], index: 15, kind: input, shape index: {}]   ;;  %s7626_s16 = inlined_call_operand.vmem [shape: f32[16,32], index: 16, kind: input, shape index: {}]   ;;  %s7627_s17 = inlined_call_operand.vmem [shape: f32[1,32], index: 17, kind: input, shape index: {}]   ;;  %s7628_s18 = inlined_call_operand.vmem [shape: f32[4,16,64], index: 18, kind: input, shape index: {}]   ;;  %s7629_s19 = inlined_call_operand.vmem [shape: f32[1,64], index: 19, kind: input, shape index: {}]   ;;  %s7630_s20 = inlined_call_operand.vmem [shape: f32[16,32], index: 20, kind: input, shape index: {}]   ;;  %s7631_s21 = inlined_call_operand.vmem [shape: f32[16,32], index: 21, kind: input, shape index: {}]   ;;  %s7632_s22 = inlined_call_operand.vmem [shape: f32[32,32], index: 22, kind: input, shape index: {}]   ;;  %s7633_s23 = inlined_call_operand.vmem [shape: f32[1,32], index: 23, kind: input, shape index: {}]   ;;  %s7634_s24 = inlined_call_operand.vmem [shape: f32[32,1], index: 24, kind: input, shape index: {}]   ;;  %s7635_s25 = inlined_call_operand.<no memory space> [shape: f32[1,1], index: 25, kind: input, shape index: {}]   ;;  %s7636_s26 = inlined_call_operand.vmem [shape: f32[4,1,16,1], index: 26, kind: output, shape index: {}]  }
   0x1   :  { %7642 = sst [smem:[#allocation5_spill]] %s7610_s0  ;;  %v31_v0 = vstv %s7635_s25 }
   0x2   :  { %7643 = sst [smem:[#allocation6_spill]] %s7611_s1  ;;  %32 = vst [vmem:[#allocation2] sm:$0x1] %v31_v0 }
   0x3   :  { %7644 = sst [smem:[#allocation7_spill]] %s7612_s2 }
   0x4   :  { %7645 = sst [smem:[#allocation8_spill]] %s7613_s3 }
   0x5   :  { %7646 = sst [smem:[#allocation9_spill]] %s7614_s4 }
   0x6   :  { %7647 = sst [smem:[#allocation10_spill]] %s7615_s5 }
   0x7   :  { %7648 = sst [smem:[#allocation11_spill]] %s7616_s6 }
   0x8   :  { %7649 = sst [smem:[#allocation12_spill]] %s7617_s7  ;;  %s6275_s7 = smov 0  }
   0x9   :  { %7650 = sst [smem:[#allocation13_spill]] %s7618_s8 }
   0xa   :  { %7651 = sst [smem:[#allocation14_spill]] %s7619_s9 }
   0xb   :  { %7652 = sst [smem:[#allocation15_spill]] %s7620_s10 }
   0xc LB: > { %s5220_s28 = sadd.s32 4294967295, %s6132_s7   ;;  %p5224_p0 = scmp.ge.s32.totalorder %s6132_s7, 1  ;;  %s6132_s7 = sphi %s6275_s7, %s38_s7  }
   0xd   : > { %p716_p1 = scmp.lt.s32.totalorder %s6132_s7, 3 }
   0xf   : > { %p717_p2 = pnand %p5224_p0, %p716_p1 }
  0x11   : > { %720 = sbr.rel (%p717_p2) target bundleno = 3057 (0xbf1), region = 124 }
  0x16   : > { %s5225_s8 = sshll.u32 %s5220_s28, 1  ;;  %v6134_v1 = vmov 0   ;;  %s7653_s0 = sld [smem:[#allocation5_spill]]  ;;  %vm1531_vm0 = vcmask 130048   ;;  %vm2724_vm1 = vcmask 64512   ;;  %vm4847_vm2 = vcmask 261120  }
  0x17   : > { %5929 = vset.pattern.permute.xlu1 %v6134_v1  ;;  %5928 = vset.pattern.permute.xlu0 %v6134_v1  ;;  %p789_p3 = scmp.lt.s32.totalorder %s5225_s8, 3  ;;  %s7654_s5 = sld [smem:[#allocation11_spill]]  ;;  %vm5157_vm3 = vcmask 7168  }
  0x18   : > { %s7655_s1 = sld [smem:[#allocation9_spill]]  ;;  %s6135_s2 = smov 112  }
  0x19   : > { %s7669_s8 = smov (!%p789_p3, %s5225_s8), 3  ;;  %s7659_s27 = sld [smem:[#allocation7_spill]] }
  0x1a   : > { %s5453_s25 = sshll.u32 %s7669_s8, 7  ;;  %s7666_s28 = sld [smem:[#allocation15_spill]] }
  0x1b   : > { %s7667_s29 = sld [smem:[#allocation14_spill]]  ;;  %s6136_s30 = smov 96  }
  0x1c   : > { %s6289_s9 = scalar_lea.vmem %s7653_s0, %s5453_s25  ;;  %s7656_s0 = sld [smem:[#allocation10_spill]] }
  0x1d   : > { %v803_v2 = vld [vmem:[%s6289_s9 + $0x8] sm:$0xff]  ;;  %v802_v3 = vld [vmem:[%s6289_s9] sm:$0xff]  ;;  %v805_v4 = vld [vmem:[%s6289_s9 + $0x18] sm:$0xff]  ;;  %s7660_s25 = sld [smem:[#allocation8_spill]] }
  0x1e   : > { %847 = vperm.xlu1 %5929, %v803_v2   ;;  %842 = vperm.xlu0 %5928, %v802_v3   ;;  %v804_v5 = vld [vmem:[%s6289_s9 + $0x10] sm:$0xff]  ;;  %v807_v6 = vld [vmem:[%s6289_s9 + $0x28] sm:$0xff]  ;;  %v806_v7 = vld [vmem:[%s6289_s9 + $0x20] sm:$0xff] }
  0x1f   : > { %v809_v8 = vld [vmem:[%s6289_s9 + $0x38] sm:$0xff]  ;;  %v808_v9 = vld [vmem:[%s6289_s9 + $0x30] sm:$0xff]  ;;  %v811_v10 = vld [vmem:[%s6289_s9 + $0x48] sm:$0xff] }
  0x20   : > { %v810_v11 = vld [vmem:[%s6289_s9 + $0x40] sm:$0xff]  ;;  %v813_v12 = vld [vmem:[%s6289_s9 + $0x58] sm:$0xff]  ;;  %v812_v13 = vld [vmem:[%s6289_s9 + $0x50] sm:$0xff] }
  0x21   : > { %v815_v14 = vld [vmem:[%s6289_s9 + $0x68] sm:$0xff]  ;;  %v814_v15 = vld [vmem:[%s6289_s9 + $0x60] sm:$0xff]  ;;  %v817_v16 = vld [vmem:[%s6289_s9 + $0x78] sm:$0xff] }
  0x22   : > { %857 = vperm.xlu1 %5929, %v805_v4   ;;  %852 = vperm.xlu0 %5928, %v804_v5   ;;  %v816_v17 = vld [vmem:[%s6289_s9 + $0x70] sm:$0xff]  ;;  %v818_v19 = vld [vmem:[%s6289_s9 + $0x80] sm:$0xff]  ;;  %v821_v20 = vld [vmem:[%s6289_s9 + $0x98] sm:$0xff] }
  0x23   : > { %v820_v18 = vld [vmem:[%s6289_s9 + $0x90] sm:$0xff]  ;;  %v819_v21 = vld [vmem:[%s6289_s9 + $0x88] sm:$0xff]  ;;  %v822_v23 = vld [vmem:[%s6289_s9 + $0xa0] sm:$0xff] }
  0x24   : > { %v823_v22 = vld [vmem:[%s6289_s9 + $0xa8] sm:$0xff]  ;;  %v825_v24 = vld [vmem:[%s6289_s9 + $0xb8] sm:$0xff]  ;;  %v824_v25 = vld [vmem:[%s6289_s9 + $0xb0] sm:$0xff] }
  0x25   : > { %v827_v26 = vld [vmem:[%s6289_s9 + $0xc8] sm:$0xff]  ;;  %v826_v27 = vld [vmem:[%s6289_s9 + $0xc0] sm:$0xff]  ;;  %v829_v28 = vld [vmem:[%s6289_s9 + $0xd8] sm:$0xff] }
  0x26   : > { %867 = vperm.xlu1 %5929, %v807_v6   ;;  %862 = vperm.xlu0 %5928, %v806_v7   ;;  %v828_v29 = vld [vmem:[%s6289_s9 + $0xd0] sm:$0xff]  ;;  %v831_v30 = vld [vmem:[%s6289_s9 + $0xe8] sm:$0xff]  ;;  %v830_v31 = vld [vmem:[%s6289_s9 + $0xe0] sm:$0xff] }
  0x27   : > { %v833_v32 = vld [vmem:[%s6289_s9 + $0xf8] sm:$0xff]  ;;  %v832_v33 = vld [vmem:[%s6289_s9 + $0xf0] sm:$0xff]  ;;  %v1521_v34 = vld [vmem:[%s7654_s5 + $0x8] sm:$0xff] }
  0x28   : > { %5634 = vmatprep.subr.mxu0 %v1521_v34  ;;  %v6329_v37 = vld [vmem:[%s7655_s1 + $0x1] ss:$0 sm:$0xff]  ;;  %v6334_v38 = vld [vmem:[%s7655_s1] ss:$0 sm:$0xff]  ;;  %v6341_v43 = vld [vmem:[%s7655_s1 + $0x2] ss:$0 sm:$0xff] }
  0x29   : > { %5635 = vmatpush3.msra.mxu0 %v1521_v34  ;;  %v6356_v52 = vld [vmem:[%s7656_s0] ss:$0 sm:$0xff]  ;;  %s7663_s0 = sld [smem:[#allocation6_spill]] }
  0x2a   : > { %877 = vperm.xlu1 %5929, %v809_v8   ;;  %872 = vperm.xlu0 %5928, %v808_v9  }
  0x2e   : > { %887 = vperm.xlu1 %5929, %v811_v10   ;;  %882 = vperm.xlu0 %5928, %v810_v11  }
  0x32   : > { %897 = vperm.xlu1 %5929, %v813_v12   ;;  %892 = vperm.xlu0 %5928, %v812_v13  }
  0x36   : > { %999 = vperm.xlu1 %5929, %v815_v14   ;;  %994 = vperm.xlu0 %5928, %v814_v15  }
  0x3a   : > { %1075 = vperm.xlu1 %5929, %v817_v16   ;;  %1070 = vperm.xlu0 %5928, %v816_v17  }
  0x3e   : > { %912 = vperm.xlu1 %5929, %v820_v18   ;;  %902 = vperm.xlu0 %5928, %v818_v19  }
  0x42   : > { %917 = vperm.xlu1 %5929, %v821_v20   ;;  %907 = vperm.xlu0 %5928, %v819_v21  }
  0x46   : > { %927 = vperm.xlu1 %5929, %v823_v22   ;;  %922 = vperm.xlu0 %5928, %v822_v23  }
  0x4a   : > { %937 = vperm.xlu1 %5929, %v825_v24   ;;  %932 = vperm.xlu0 %5928, %v824_v25  }
  0x4e   : > { %947 = vperm.xlu1 %5929, %v827_v26   ;;  %942 = vperm.xlu0 %5928, %v826_v27  }
  0x52   : > { %957 = vperm.xlu1 %5929, %v829_v28   ;;  %952 = vperm.xlu0 %5928, %v828_v29  }
  0x56   : > { %1009 = vperm.xlu1 %5929, %v831_v30   ;;  %1004 = vperm.xlu0 %5928, %v830_v31  }
  0x5a   : > { %1085 = vperm.xlu1 %5929, %v833_v32   ;;  %1080 = vperm.xlu0 %5928, %v832_v33  }
  0x99   : > { %v848_v35 = vpop.permute.xlu1 %847  ;;  %v843_v36 = vpop.permute.xlu0 %842 }
  0x9a   : > { %v967_v44 = vmul.f32 %v6334_v38, %v848_v35  ;;  %v966_v45 = vmul.f32 %v6334_v38, %v843_v36 }
  0x9d   : > { %v858_v39 = vpop.permute.xlu1 %857  ;;  %v853_v40 = vpop.permute.xlu0 %852 }
  0x9e   : > { %v1019_v41 = vmul.f32 %v6329_v37, %v858_v39  ;;  %v1018_v42 = vmul.f32 %v6329_v37, %v853_v40  ;;  %v969_v55 = vmul.f32 %v6334_v38, %v858_v39  ;;  %v968_v57 = vmul.f32 %v6334_v38, %v853_v40 }
  0xa0   : > { %v1043_v48 = vadd.f32 %v1019_v41, %v967_v44  ;;  %v1042_v51 = vadd.f32 %v1018_v42, %v966_v45 }
  0xa1   : > { %v6345_v46 = vpop.permute.xlu1 %867  ;;  %v6347_v47 = vpop.permute.xlu0 %862 }
  0xa2   : > { %v1021_v49 = vmul.f32 %v6329_v37, %v6345_v46  ;;  %v1095_v50 = vmul.f32 %v6341_v43, %v6345_v46  ;;  %v1020_v53 = vmul.f32 %v6329_v37, %v6347_v47  ;;  %v1094_v54 = vmul.f32 %v6341_v43, %v6347_v47 }
  0xa3   : > { %v971_v7 = vmul.f32 %v6334_v38, %v6345_v46  ;;  %v970_v8 = vmul.f32 %v6334_v38, %v6347_v47 }
  0xa4   : > { %v1119_v56 = vadd.f32 %v1095_v50, %v1043_v48  ;;  %v1118_v58 = vadd.f32 %v1094_v54, %v1042_v51  ;;  %v1045_v61 = vadd.f32 %v1021_v49, %v969_v55  ;;  %v1044_v0 = vadd.f32 %v1020_v53, %v968_v57 }
  0xa5   : > { %v6364_v59 = vpop.permute.xlu1 %877  ;;  %v6366_v60 = vpop.permute.xlu0 %872 }
  0xa6   : > { %v6369_v62 = vadd.f32 %v6356_v52, %v1119_v56  ;;  %v1097_v63 = vmul.f32 %v6341_v43, %v6364_v59  ;;  %v6374_v1 = vadd.f32 %v6356_v52, %v1118_v58  ;;  %v1023_v2 = vmul.f32 %v6329_v37, %v6364_v59 }
  0xa7   : > { %v1096_v3 = vmul.f32 %v6341_v43, %v6366_v60  ;;  %v1022_v6 = vmul.f32 %v6329_v37, %v6366_v60  ;;  %v973_v13 = vmul.f32 %v6334_v38, %v6364_v59  ;;  %v972_v23 = vmul.f32 %v6334_v38, %v6366_v60 }
  0xa8   : > { %v5240_v4 = vmul.f32 -1.442695, %v6369_v62  ;;  %v1121_v5 = vadd.f32 %v1097_v63, %v1045_v61  ;;  %v5239_v9 = vmul.f32 -1.442695, %v6374_v1  ;;  %v1047_v16 = vadd.f32 %v1023_v2, %v971_v7 }
  0xa9   : > { %v1120_v10 = vadd.f32 %v1096_v3, %v1044_v0  ;;  %v6388_v11 = vpop.permute.xlu1 %887  ;;  %v6390_v12 = vpop.permute.xlu0 %882  ;;  %v1046_v20 = vadd.f32 %v1022_v6, %v970_v8 }
  0xaa   : > { %5930 = vpow2.f32 %v5240_v4  ;;  %v6395_v14 = vadd.f32 %v6356_v52, %v1121_v5  ;;  %v1025_v15 = vmul.f32 %v6329_v37, %v6388_v11  ;;  %v1099_v18 = vmul.f32 %v6341_v43, %v6388_v11 }
  0xab   : > { %5932 = vpow2.f32 %v5239_v9  ;;  %v6400_v17 = vadd.f32 %v6356_v52, %v1120_v10  ;;  %v1024_v21 = vmul.f32 %v6329_v37, %v6390_v12  ;;  %v1098_v22 = vmul.f32 %v6341_v43, %v6390_v12 }
  0xac   : > { %v5242_v19 = vmul.f32 -1.442695, %v6395_v14  ;;  %v1123_v25 = vadd.f32 %v1099_v18, %v1047_v16  ;;  %v975_v28 = vmul.f32 %v6334_v38, %v6388_v11  ;;  %v1049_v29 = vadd.f32 %v1025_v15, %v973_v13 }
  0xad   : > { %v5241_v24 = vmul.f32 -1.442695, %v6400_v17  ;;  %v6412_v26 = vpop.permute.xlu1 %897  ;;  %v6414_v27 = vpop.permute.xlu0 %892  ;;  %v1122_v30 = vadd.f32 %v1098_v22, %v1046_v20  ;;  %v1048_v34 = vadd.f32 %v1024_v21, %v972_v23  ;;  %v974_v53 = vmul.f32 %v6334_v38, %v6390_v12 }
  0xae   : > { %5934 = vpow2.f32 %v5242_v19  ;;  %v6419_v31 = vadd.f32 %v6356_v52, %v1123_v25  ;;  %v1027_v32 = vmul.f32 %v6329_v37, %v6412_v26  ;;  %v1101_v33 = vmul.f32 %v6341_v43, %v6412_v26 }
  0xaf   : > { %5936 = vpow2.f32 %v5241_v24  ;;  %v6426_v35 = vadd.f32 %v6356_v52, %v1122_v30  ;;  %v1100_v36 = vmul.f32 %v6341_v43, %v6414_v27  ;;  %v1026_v41 = vmul.f32 %v6329_v37, %v6414_v27 }
  0xb0   : > { %v5244_v39 = vmul.f32 -1.442695, %v6419_v31  ;;  %v1125_v40 = vadd.f32 %v1101_v33, %v1049_v29  ;;  %v1051_v42 = vadd.f32 %v1027_v32, %v975_v28  ;;  %v977_v54 = vmul.f32 %v6334_v38, %v6412_v26  ;;  %v1520_v33 = vld [vmem:[%s7654_s5] sm:$0xff] }
  0xb1   : > { %v6433_v44 = vpop.permute.xlu1 %999  ;;  %v6435_v45 = vpop.permute.xlu0 %994  ;;  %v5243_v48 = vmul.f32 -1.442695, %v6426_v35  ;;  %v1124_v49 = vadd.f32 %v1100_v36, %v1048_v34  ;;  %v976_v63 = vmul.f32 %v6334_v38, %v6414_v27  ;;  %v1050_v0 = vadd.f32 %v1026_v41, %v974_v53  ;;  %5636 = vmatprep.subr.mxu0 %v1520_v33 }
  0xb2   : > { %v1029_v50 = vmul.f32 %v6329_v37, %v6433_v44  ;;  %v1103_v51 = vmul.f32 %v6341_v43, %v6433_v44  ;;  %5938 = vpow2.f32 %v5244_v39  ;;  %v6447_v55 = vadd.f32 %v6356_v52, %v1125_v40  ;;  %5637 = vmatpush3.msra.mxu0 %v1520_v33 }
  0xb3   : > { %5940 = vpow2.f32 %v5243_v48  ;;  %v6450_v56 = vadd.f32 %v6356_v52, %v1124_v49  ;;  %v1028_v58 = vmul.f32 %v6329_v37, %v6435_v45  ;;  %v1102_v2 = vmul.f32 %v6341_v43, %v6435_v45 }
  0xb4   : > { %v1127_v57 = vadd.f32 %v1103_v51, %v1051_v42  ;;  %v5246_v61 = vmul.f32 -1.442695, %v6447_v55  ;;  %v1053_v7 = vadd.f32 %v1029_v50, %v977_v54 }
  0xb5   : > { %v6459_v3 = vpop.permute.xlu1 %1075  ;;  %v6461_v4 = vpop.permute.xlu0 %1070  ;;  %v5245_v5 = vmul.f32 -1.442695, %v6450_v56  ;;  %v1126_v10 = vadd.f32 %v1102_v2, %v1050_v0  ;;  %v1052_v13 = vadd.f32 %v1028_v58, %v976_v63 }
  0xb6   : > { %v6465_v6 = vadd.f32 %v6356_v52, %v1127_v57  ;;  %v1105_v8 = vmul.f32 %v6341_v43, %v6459_v3  ;;  %5942 = vpow2.f32 %v5246_v61  ;;  %v1104_v15 = vmul.f32 %v6341_v43, %v6461_v4 }
  0xb7   : > { %v5931_v9 = vpop.eup %5930  ;;  %5944 = vpow2.f32 %v5245_v5  ;;  %v6473_v22 = vadd.f32 %v6356_v52, %v1126_v10 }
  0xb8   : > { %v5933_v16 = vpop.eup %5932  ;;  %v1329_v18 = vadd.f32 1.0, %v5931_v9  ;;  %v5248_v19 = vmul.f32 -1.442695, %v6465_v6  ;;  %v1129_v20 = vadd.f32 %v1105_v8, %v1053_v7  ;;  %v1128_v23 = vadd.f32 %v1104_v15, %v1052_v13 }
  0xb9   : > { %v1328_v21 = vadd.f32 1.0, %v5933_v16  ;;  %v913_v24 = vpop.permute.xlu1 %912  ;;  %v903_v25 = vpop.permute.xlu0 %902  ;;  %v5247_v30 = vmul.f32 -1.442695, %v6473_v22 }
  0xba   : > { %5946 = vrcp.f32 %v1329_v18  ;;  %v6476_v28 = vadd.f32 %v6356_v52, %v1129_v20  ;;  %v6480_v32 = vadd.f32 %v6356_v52, %v1128_v23  ;;  %v1030_v51 = vmul.f32 %v6329_v37, %v913_v24 }
  0xbb   : > { %v5935_v29 = vpop.eup %5934  ;;  %5948 = vrcp.f32 %v1328_v21  ;;  %v978_v53 = vmul.f32 %v6334_v38, %v903_v25  ;;  %v980_v13 = vmul.f32 %v6334_v38, %v913_v24 }
  0xbc   : > { %v5937_v34 = vpop.eup %5936  ;;  %v1331_v36 = vadd.f32 1.0, %v5935_v29  ;;  %5950 = vpow2.f32 %v5248_v19  ;;  %v5250_v39 = vmul.f32 -1.442695, %v6476_v28  ;;  %v5249_v41 = vmul.f32 -1.442695, %v6480_v32 }
  0xbd   : > { %v1330_v40 = vadd.f32 1.0, %v5937_v34  ;;  %5952 = vpow2.f32 %v5247_v30  ;;  %v918_v42 = vpop.permute.xlu1 %917  ;;  %v908_v48 = vpop.permute.xlu0 %907  ;;  %v1054_v7 = vadd.f32 %v1030_v51, %v978_v53 }
  0xbe   : > { %5954 = vrcp.f32 %v1331_v36  ;;  %v1031_v49 = vmul.f32 %v6329_v37, %v918_v42  ;;  %v979_v50 = vmul.f32 %v6334_v38, %v908_v48  ;;  %v981_v19 = vmul.f32 %v6334_v38, %v918_v42 }
  0xbf   : > { %5956 = vrcp.f32 %v1330_v40  ;;  %v5939_v54 = vpop.eup %5938 }
  0xc0   : > { %5958 = vpow2.f32 %v5250_v39  ;;  %v5941_v57 = vpop.eup %5940  ;;  %v1333_v58 = vadd.f32 1.0, %v5939_v54  ;;  %v1055_v2 = vadd.f32 %v1031_v49, %v979_v50 }
  0xc1   : > { %5960 = vpow2.f32 %v5249_v41  ;;  %v6491_v61 = vpop.permute.xlu1 %927  ;;  %v6493_v63 = vpop.permute.xlu0 %922  ;;  %v1332_v0 = vadd.f32 1.0, %v5941_v57 }
  0xc2   : > { %v1107_v5 = vmul.f32 %v6341_v43, %v6491_v61  ;;  %5962 = vrcp.f32 %v1333_v58  ;;  %v1033_v8 = vmul.f32 %v6329_v37, %v6491_v61  ;;  %v1106_v9 = vmul.f32 %v6341_v43, %v6493_v63 }
  0xc3   : > { %v5943_v10 = vpop.eup %5942  ;;  %5964 = vrcp.f32 %v1332_v0  ;;  %v1032_v20 = vmul.f32 %v6329_v37, %v6493_v63  ;;  %v983_v30 = vmul.f32 %v6334_v38, %v6491_v61  ;;  %v982_v24 = vmul.f32 %v6334_v38, %v6493_v63 }
  0xc4   : > { %v1131_v15 = vadd.f32 %v1107_v5, %v1055_v2  ;;  %v5945_v16 = vpop.eup %5944  ;;  %v1335_v18 = vadd.f32 1.0, %v5943_v10  ;;  %v1130_v21 = vadd.f32 %v1106_v9, %v1054_v7  ;;  %v1057_v36 = vadd.f32 %v1033_v8, %v981_v19 }
  0xc5   : > { %v6505_v23 = vpop.permute.xlu1 %937  ;;  %v6507_v25 = vpop.permute.xlu0 %932  ;;  %v1334_v29 = vadd.f32 1.0, %v5945_v16  ;;  %v1056_v51 = vadd.f32 %v1032_v20, %v980_v13 }
  0xc6   : > { %v6512_v33 = vadd.f32 %v6356_v52, %v1131_v15  ;;  %5966 = vrcp.f32 %v1335_v18  ;;  %v6517_v39 = vadd.f32 %v6356_v52, %v1130_v21  ;;  %v1109_v40 = vmul.f32 %v6341_v43, %v6505_v23 }
  0xc7   : > { %v5947_v34 = vpop.eup %5946  ;;  %5968 = vrcp.f32 %v1334_v29  ;;  %v1035_v48 = vmul.f32 %v6329_v37, %v6505_v23  ;;  %v1034_v49 = vmul.f32 %v6329_v37, %v6507_v25  ;;  %v1108_v57 = vmul.f32 %v6341_v43, %v6507_v25 }
  0xc8   : > { %v5949_v41 = vpop.eup %5948  ;;  %v5252_v42 = vmul.f32 -1.442695, %v6512_v33  ;;  %1426 = vrot.lane.b32.xlu1 %v5947_v34, %s6135_s2  ;;  %v5251_v53 = vmul.f32 -1.442695, %v6517_v39  ;;  %v1133_v54 = vadd.f32 %v1109_v40, %v1057_v36  ;;  %v985_v7 = vmul.f32 %v6334_v38, %v6505_v23 }
  0xc9   : > { %v5951_v50 = vpop.eup %5950  ;;  %1424 = vrot.lane.b32.xlu0 %v5949_v41, %s6135_s2  ;;  %v6531_v58 = vpop.permute.xlu1 %947  ;;  %v984_v8 = vmul.f32 %v6334_v38, %v6507_v25  ;;  %v1132_v15 = vadd.f32 %v1108_v57, %v1056_v51  ;;  %v1059_v18 = vadd.f32 %v1035_v48, %v983_v30  ;;  %v1058_v19 = vadd.f32 %v1034_v49, %v982_v24 }
  0xca   : > { %v6533_v0 = vpop.permute.xlu0 %942  ;;  %v5953_v2 = vpop.eup %5952  ;;  %v1337_v5 = vadd.f32 1.0, %v5951_v50  ;;  %5970 = vpow2.f32 %v5252_v42  ;;  %v6540_v13 = vadd.f32 %v6356_v52, %v1133_v54  ;;  %v1111_v20 = vmul.f32 %v6341_v43, %v6531_v58 }
  0xcb   : > { %v5955_v9 = vpop.eup %5954  ;;  %v1336_v10 = vadd.f32 1.0, %v5953_v2  ;;  %5972 = vpow2.f32 %v5251_v53  ;;  %v6547_v34 = vadd.f32 %v6356_v52, %v1132_v15  ;;  %v1037_v36 = vmul.f32 %v6329_v37, %v6531_v58 }
  0xcc   : > { %v5957_v16 = vpop.eup %5956  ;;  %5974 = vrcp.f32 %v1337_v5  ;;  %1430 = vrot.lane.b32.xlu1 %v5955_v9, %s6135_s2  ;;  %v5254_v29 = vmul.f32 -1.442695, %v6540_v13  ;;  %v987_v42 = vmul.f32 %v6334_v38, %v6531_v58  ;;  %v1135_v48 = vadd.f32 %v1111_v20, %v1059_v18 }
  0xcd   : > { %v5959_v21 = vpop.eup %5958  ;;  %5976 = vrcp.f32 %v1336_v10  ;;  %1428 = vrot.lane.b32.xlu0 %v5957_v16, %s6135_s2  ;;  %v6552_v40 = vpop.permute.xlu1 %957  ;;  %v1110_v49 = vmul.f32 %v6341_v43, %v6533_v0  ;;  %v5253_v51 = vmul.f32 -1.442695, %v6547_v34  ;;  %v1036_v53 = vmul.f32 %v6329_v37, %v6533_v0 }
  0xce   : > { %v6554_v30 = vpop.permute.xlu0 %952  ;;  %v5961_v24 = vpop.eup %5960  ;;  %v1339_v41 = vadd.f32 1.0, %v5959_v21  ;;  %5978 = vpow2.f32 %v5254_v29  ;;  %v6564_v57 = vadd.f32 %v6356_v52, %v1135_v48  ;;  %v986_v2 = vmul.f32 %v6334_v38, %v6533_v0 }
  0xcf   : > { %v1338_v50 = vadd.f32 1.0, %v5961_v24  ;;  %v5963_v54 = vpop.eup %5962  ;;  %v1134_v5 = vadd.f32 %v1110_v49, %v1058_v19  ;;  %v1061_v10 = vadd.f32 %v1037_v36, %v985_v7  ;;  %v1039_v15 = vmul.f32 %v6329_v37, %v6552_v40 }
  0xd0   : > { %5980 = vrcp.f32 %v1339_v41  ;;  %v5965_v9 = vpop.eup %5964  ;;  %v1113_v16 = vmul.f32 %v6341_v43, %v6552_v40  ;;  %1434 = vrot.lane.b32.xlu1 %v5963_v54, %s6135_s2  ;;  %v5256_v20 = vmul.f32 -1.442695, %v6564_v57  ;;  %v1038_v19 = vmul.f32 %v6329_v37, %v6554_v30 }
  0xd1   : > { %5982 = vrcp.f32 %v1338_v50  ;;  %v6573_v18 = vpop.permute.xlu1 %1009  ;;  %v6577_v21 = vadd.f32 %v6356_v52, %v1134_v5  ;;  %1432 = vrot.lane.b32.xlu0 %v5965_v9, %s6135_s2  ;;  %v1060_v29 = vadd.f32 %v1036_v53, %v984_v8  ;;  %v1112_v24 = vmul.f32 %v6341_v43, %v6554_v30 }
  0xd2   : > { %5984 = vpow2.f32 %v5253_v51  ;;  %v6582_v7 = vpop.permute.xlu0 %1004  ;;  %v1137_v36 = vadd.f32 %v1113_v16, %v1061_v10  ;;  %v1041_v41 = vmul.f32 %v6329_v37, %v6573_v18  ;;  %v1063_v50 = vadd.f32 %v1039_v15, %v987_v42 }
  0xd3   : > { %v5967_v48 = vpop.eup %5966  ;;  %5986 = vpow2.f32 %v5256_v20  ;;  %v5255_v49 = vmul.f32 -1.442695, %v6577_v21  ;;  %v1115_v51 = vmul.f32 %v6341_v43, %v6573_v18  ;;  %v989_v5 = vmul.f32 %v6334_v38, %v6552_v40 }
  0xd4   : > { %v5969_v54 = vpop.eup %5968  ;;  %v6594_v8 = vadd.f32 %v6356_v52, %v1137_v36  ;;  %v1136_v53 = vadd.f32 %v1112_v24, %v1060_v29  ;;  %v1062_v9 = vadd.f32 %v1038_v19, %v986_v2  ;;  %1438 = vrot.lane.b32.xlu1 %v5967_v48, %s6135_s2  ;;  %v1040_v42 = vmul.f32 %v6329_v37, %v6582_v7 }
  0xd5   : > { %v6597_v10 = vpop.permute.xlu1 %1085  ;;  %5988 = vpow2.f32 %v5255_v49  ;;  %v1139_v16 = vadd.f32 %v1115_v51, %v1063_v50  ;;  %v1114_v15 = vmul.f32 %v6341_v43, %v6582_v7  ;;  %1436 = vrot.lane.b32.xlu0 %v5969_v54, %s6135_s2  ;;  %v1065_v2 = vadd.f32 %v1041_v41, %v989_v5 }
  0xd6   : > { %7657 = vst [vmem:[#allocation3_spill] sm:$0xff] %v6594_v8  ;;  %7658 = vst [vmem:[#allocation4_spill] sm:$0xff] %v6597_v10  ;;  %v5258_v36 = vmul.f32 -1.442695, %v6594_v8  ;;  %v6606_v29 = vadd.f32 %v6356_v52, %v1136_v53  ;;  %v1117_v19 = vmul.f32 %v6341_v43, %v6597_v10  ;;  %v988_v37 = vmul.f32 %v6334_v38, %v6554_v30  ;;  %v6615_v51 = vpop.permute.xlu0 %1080 }
  0xd7   : > { %v5971_v20 = vpop.eup %5970  ;;  %v6613_v49 = vadd.f32 %v6356_v52, %v1139_v16  ;;  %v1138_v50 = vadd.f32 %v1114_v15, %v1062_v9  ;;  %v1116_v16 = vmul.f32 %v6341_v43, %v6615_v51 }
  0xd8   : > { %v5973_v24 = vpop.eup %5972  ;;  %v1341_v48 = vadd.f32 1.0, %v5971_v20  ;;  %5990 = vpow2.f32 %v5258_v36  ;;  %v5257_v53 = vmul.f32 -1.442695, %v6606_v29  ;;  %v1141_v41 = vadd.f32 %v1117_v19, %v1065_v2 }
  0xd9   : > { %v5975_v54 = vpop.eup %5974  ;;  %v1340_v8 = vadd.f32 1.0, %v5973_v24  ;;  %v5260_v10 = vmul.f32 -1.442695, %v6613_v49  ;;  %v6620_v20 = vadd.f32 %v6356_v52, %v1138_v50  ;;  %v1064_v9 = vadd.f32 %v1040_v42, %v988_v37 }
  0xda   : > { %v5977_v5 = vpop.eup %5976  ;;  %5992 = vrcp.f32 %v1341_v48  ;;  %1442 = vrot.lane.b32.xlu1 %v5975_v54, %s6135_s2  ;;  %v6624_v38 = vadd.f32 %v6356_v52, %v1141_v41 }
  0xdb   : > { %5994 = vrcp.f32 %v1340_v8  ;;  %1440 = vrot.lane.b32.xlu0 %v5977_v5, %s6135_s2  ;;  %v5979_v15 = vpop.eup %5978  ;;  %v5259_v36 = vmul.f32 -1.442695, %v6620_v20  ;;  %v1140_v48 = vadd.f32 %v1116_v16, %v1064_v9 }
  0xdc   : > { %5996 = vpow2.f32 %v5257_v53  ;;  %v1343_v19 = vadd.f32 1.0, %v5979_v15  ;;  %v5262_v24 = vmul.f32 -1.442695, %v6624_v38 }
  0xdd   : > { %v5981_v2 = vpop.eup %5980  ;;  %5998 = vpow2.f32 %v5260_v10  ;;  %v6633_v43 = vadd.f32 %v6356_v52, %v1140_v48 }
  0xde   : > { %v5983_v8 = vpop.eup %5982  ;;  %6000 = vpow2.f32 %v5259_v36  ;;  %1446 = vrot.lane.b32.xlu1 %v5981_v2, %s6135_s2 }
  0xdf   : > { %v5985_v42 = vpop.eup %5984  ;;  %6002 = vrcp.f32 %v1343_v19  ;;  %1444 = vrot.lane.b32.xlu0 %v5983_v8, %s6135_s2  ;;  %v5261_v54 = vmul.f32 -1.442695, %v6633_v43 }
  0xe0   : > { %v1342_v37 = vadd.f32 1.0, %v5985_v42  ;;  %6004 = vpow2.f32 %v5262_v24  ;;  %v5987_v50 = vpop.eup %5986 }
  0xe1   : > { %v1345_v10 = vadd.f32 1.0, %v5987_v50 }
  0xe2   : > { %6006 = vrcp.f32 %v1342_v37  ;;  %v5989_v53 = vpop.eup %5988 }
  0xe3   : > { %6008 = vpow2.f32 %v5261_v54  ;;  %v1344_v41 = vadd.f32 1.0, %v5989_v53 }
  0xe4   : > { %6010 = vrcp.f32 %v1345_v10 }
  0xe5   : > { %v5991_v5 = vpop.eup %5990  ;;  %6012 = vrcp.f32 %v1344_v41 }
  0xe6   : > { %v1347_v16 = vadd.f32 1.0, %v5991_v5 }
  0xe7   : > { %v5993_v9 = vpop.eup %5992 }
  0xe8   : > { %v5995_v15 = vpop.eup %5994  ;;  %1450 = vrot.lane.b32.xlu1 %v5993_v9, %s6135_s2  ;;  %6014 = vrcp.f32 %v1347_v16 }
  0xe9   : > { %v5997_v52 = vpop.eup %5996  ;;  %1448 = vrot.lane.b32.xlu0 %v5995_v15, %s6135_s2 }
  0xea   : > { %v5999_v36 = vpop.eup %5998  ;;  %v1346_v2 = vadd.f32 1.0, %v5997_v52 }
  0xeb   : > { %v6001_v19 = vpop.eup %6000  ;;  %v1349_v24 = vadd.f32 1.0, %v5999_v36 }
  0xec   : > { %v6003_v48 = vpop.eup %6002  ;;  %6016 = vrcp.f32 %v1346_v2  ;;  %v1348_v8 = vadd.f32 1.0, %v6001_v19  ;;  %v6652_v2 = vld [vmem:[%s7659_s27] ss:$0 sm:$0xff]  ;;  %s7664_s27 = sld [smem:[#allocation12_spill]] }
  0xed   : > { %v6005_v42 = vpop.eup %6004  ;;  %6018 = vrcp.f32 %v1349_v24  ;;  %1454 = vrot.lane.b32.xlu1 %v6003_v48, %s6135_s2  ;;  %v1179_v19 = vmul.f32 %v6652_v2, %v6345_v46  ;;  %v6659_v24 = vld [vmem:[%s7660_s25] ss:$0 sm:$0xff]  ;;  %v1178_v48 = vmul.f32 %v6652_v2, %v6347_v47  ;;  %s7665_s25 = sld [smem:[#allocation13_spill]] }
  0xee   : > { %6020 = vrcp.f32 %v1348_v8  ;;  %v1351_v37 = vadd.f32 1.0, %v6005_v42  ;;  %v1181_v42 = vmul.f32 %v6652_v2, %v6364_v59  ;;  %v1183_v59 = vmul.f32 %v6652_v2, %v6388_v11 }
  0xef   : > { %v6007_v50 = vpop.eup %6006  ;;  %v1209_v8 = vadd.f32 %v6659_v24, %v1179_v19  ;;  %v1185_v11 = vmul.f32 %v6652_v2, %v6412_v26  ;;  %v1187_v26 = vmul.f32 %v6652_v2, %v6433_v44  ;;  %v1189_v44 = vmul.f32 %v6652_v2, %v6459_v3 }
  0xf0   : > { %v6009_v54 = vpop.eup %6008  ;;  %6022 = vrcp.f32 %v1351_v37  ;;  %1452 = vrot.lane.b32.xlu0 %v6007_v50, %s6135_s2  ;;  %v1208_v37 = vadd.f32 %v6659_v24, %v1178_v48  ;;  %v1180_v50 = vmul.f32 %v6652_v2, %v6366_v60  ;;  %v1211_v47 = vadd.f32 %v6659_v24, %v1181_v42 }
  0xf1   : > { %v6011_v10 = vpop.eup %6010  ;;  %v1350_v53 = vadd.f32 1.0, %v6009_v54  ;;  %v1233_v46 = vadd.f32 %v1209_v8, %v6369_v62  ;;  %v1182_v60 = vmul.f32 %v6652_v2, %v6390_v12  ;;  %v1213_v19 = vadd.f32 %v6659_v24, %v1183_v59 }
  0xf2   : > { %1458 = vrot.lane.b32.xlu1 %v6011_v10, %s6135_s2  ;;  %v6013_v41 = vpop.eup %6012  ;;  %v1232_v10 = vadd.f32 %v1208_v37, %v6374_v1  ;;  %v1184_v12 = vmul.f32 %v6652_v2, %v6414_v27  ;;  %v1186_v27 = vmul.f32 %v6652_v2, %v6435_v45  ;;  %v1188_v45 = vmul.f32 %v6652_v2, %v6461_v4 }
  0xf3   : > { %6024 = vrcp.f32 %v1350_v53  ;;  %v1237_v48 = vadd.f32 %v1213_v19, %v6419_v31 }
  0xf4   : > { %1456 = vrot.lane.b32.xlu0 %v6013_v41, %s6135_s2 }
  0xf5   : > { %v6015_v5 = vpop.eup %6014 }
  0xf6   : > { %1462 = vrot.lane.b32.xlu1 %v6015_v5, %s6135_s2 }
  0xf9   : > { %v6017_v9 = vpop.eup %6016 }
  0xfa   : > { %v6019_v16 = vpop.eup %6018  ;;  %1460 = vrot.lane.b32.xlu0 %v6017_v9, %s6135_s2  ;;  %v1210_v9 = vadd.f32 %v6659_v24, %v1180_v50  ;;  %v1215_v50 = vadd.f32 %v6659_v24, %v1185_v11  ;;  %v1190_v11 = vmul.f32 %v6652_v2, %v6493_v63 }
  0xfb   : > { %v6021_v15 = vpop.eup %6020  ;;  %1466 = vrot.lane.b32.xlu1 %v6019_v16, %s6135_s2  ;;  %v1235_v16 = vadd.f32 %v1211_v47, %v6395_v14  ;;  %v1212_v14 = vadd.f32 %v6659_v24, %v1182_v60 }
  0xfc   : > { %v1234_v1 = vadd.f32 %v1210_v9, %v6400_v17  ;;  %v1239_v31 = vadd.f32 %v1215_v50, %v6447_v55  ;;  %v1216_v55 = vadd.f32 %v6659_v24, %v1186_v27  ;;  %v1195_v50 = vmul.f32 %v6652_v2, %v6531_v58 }
  0xfd   : > { %v6023_v52 = vpop.eup %6022  ;;  %v1236_v8 = vadd.f32 %v1212_v14, %v6426_v35  ;;  %v1220_v14 = vadd.f32 %v6659_v24, %v1190_v11  ;;  %v835_v11 = vld [vmem:[%s7663_s0 + $0x8] sm:$0xff] }
  0xfe   : > { %1464 = vrot.lane.b32.xlu0 %v6021_v15, %s6135_s2  ;;  %v1240_v59 = vadd.f32 %v1216_v55, %v6473_v22  ;;  %v1191_v22 = vmul.f32 %v6652_v2, %v6491_v61  ;;  %v1225_v27 = vadd.f32 %v6659_v24, %v1195_v50  ;;  %5674 = vmatprep.subr.mxu1 %v835_v11 }
  0xff   : > { %1470 = vrot.lane.b32.xlu1 %v6023_v52, %s6135_s2  ;;  %5675 = vmatpush3.msra.mxu1 %v835_v11 }
 0x100   : > { %v6025_v36 = vpop.eup %6024  ;;  %v1249_v58 = vadd.f32 %v1225_v27, %v6564_v57 }
 0x102   : > { %1468 = vrot.lane.b32.xlu0 %v6025_v36, %s6135_s2 }
 0x13a   : > { %v1427_v54 = vpop.permute.xlu1 %1426 }
 0x13b   : > { %v1497_v53 = vmul.f32 %v1427_v54, %v1233_v46  ;;  %v1425_v41 = vpop.permute.xlu0 %1424  ;;  %v1214_v54 = vadd.f32 %v6659_v24, %v1184_v12 }
 0x13c   : > { %v1496_v5 = vmul.f32 %v1425_v41, %v1232_v10 }
 0x13d   : > { %v1238_v35 = vadd.f32 %v1214_v54, %v6450_v56 }
 0x13e   : > { %5638 = vmatprep.mubr.msk.f32.mxu0 %vm1531_vm0, %v1496_v5  ;;  %v1431_v62 = vpop.permute.xlu1 %1430  ;;  %v1217_v5 = vadd.f32 %v6659_v24, %v1187_v26 }
 0x13f   : > { %v1499_v15 = vmul.f32 %v1431_v62, %v1235_v16  ;;  %5639 = vmatmul.mubr.msk.f32.vlgmr.msra.gmra.mxu0 %vm1531_vm0, %v1497_v53  ;;  %v1429_v52 = vpop.permute.xlu0 %1428  ;;  %v1219_v16 = vadd.f32 %v6659_v24, %v1189_v44  ;;  %v1218_v62 = vadd.f32 %v6659_v24, %v1188_v45  ;;  %v7661_v45 = vld [vmem:[#allocation3_spill] sm:$0xff] }
 0x140   : > { %v1498_v36 = vmul.f32 %v1429_v52, %v1234_v1  ;;  %v1241_v9 = vadd.f32 %v1217_v5, %v6465_v6 }
 0x141   : > { %v1243_v4 = vadd.f32 %v1219_v16, %v6476_v28  ;;  %v1242_v52 = vadd.f32 %v1218_v62, %v6480_v32  ;;  %v1221_v28 = vadd.f32 %v6659_v24, %v1191_v22 }
 0x142   : > { %5641 = vmatprep.mubr.msk.f32.mxu0 %vm1531_vm0, %v1498_v36  ;;  %v1435_v17 = vpop.permute.xlu1 %1434 }
 0x143   : > { %5642 = vmatmul.mubr.msk.f32.gmra.mxu0 %vm1531_vm0, %v1499_v15  ;;  %v1501_v42 = vmul.f32 %v1435_v17, %v1237_v48  ;;  %v1433_v37 = vpop.permute.xlu0 %1432  ;;  %v1245_v32 = vadd.f32 %v1221_v28, %v6512_v33  ;;  %v1244_v48 = vadd.f32 %v1220_v14, %v6517_v39  ;;  %v1193_v17 = vmul.f32 %v6652_v2, %v6505_v23 }
 0x144   : > { %v1500_v46 = vmul.f32 %v1433_v37, %v1236_v8  ;;  %v1194_v23 = vmul.f32 %v6652_v2, %v6533_v0 }
 0x145   : > { %v1223_v37 = vadd.f32 %v6659_v24, %v1193_v17 }
 0x146   : > { %5644 = vmatprep.mubr.msk.f32.mxu0 %vm1531_vm0, %v1500_v46  ;;  %v1439_v10 = vpop.permute.xlu1 %1438 }
 0x147   : > { %v1503_v53 = vmul.f32 %v1439_v10, %v1239_v31  ;;  %5645 = vmatmul.mubr.msk.f32.gmra.mxu0 %vm1531_vm0, %v1501_v42  ;;  %v1437_v41 = vpop.permute.xlu0 %1436  ;;  %v1192_v42 = vmul.f32 %v6652_v2, %v6507_v25  ;;  %v1247_v26 = vadd.f32 %v1223_v37, %v6540_v13  ;;  %v1224_v10 = vadd.f32 %v6659_v24, %v1194_v23 }
 0x148   : > { %v1502_v47 = vmul.f32 %v1437_v41, %v1238_v35  ;;  %v1196_v13 = vmul.f32 %v6652_v2, %v6554_v30 }
 0x149   : > { %v1222_v39 = vadd.f32 %v6659_v24, %v1192_v42  ;;  %v1248_v0 = vadd.f32 %v1224_v10, %v6577_v21 }
 0x14a   : > { %5647 = vmatprep.mubr.msk.f32.mxu0 %vm1531_vm0, %v1502_v47  ;;  %v1199_v47 = vmul.f32 %v6652_v2, %v6573_v18  ;;  %v1226_v21 = vadd.f32 %v6659_v24, %v1196_v13 }
 0x14b   : > { %5648 = vmatmul.mubr.msk.f32.gmra.mxu0 %vm1531_vm0, %v1503_v53  ;;  %v1246_v25 = vadd.f32 %v1222_v39, %v6547_v34  ;;  %v1197_v53 = vmul.f32 %v6652_v2, %v6552_v40  ;;  %v1198_v40 = vmul.f32 %v6652_v2, %v6582_v7  ;;  %v1200_v7 = vmul.f32 %v6652_v2, %v6615_v51 }
 0x14c   : > { %v1443_v56 = vpop.permute.xlu1 %1442  ;;  %v1250_v55 = vadd.f32 %v1226_v21, %v6606_v29  ;;  %v1229_v16 = vadd.f32 %v6659_v24, %v1199_v47 }
 0x14d   : > { %v1505_v3 = vmul.f32 %v1443_v56, %v1241_v9  ;;  %v1441_v60 = vpop.permute.xlu0 %1440  ;;  %v1227_v57 = vadd.f32 %v6659_v24, %v1197_v53  ;;  %v7662_v9 = vld [vmem:[#allocation4_spill] sm:$0xff]  ;;  %v1228_v62 = vadd.f32 %v6659_v24, %v1198_v40  ;;  %v1230_v51 = vadd.f32 %v6659_v24, %v1200_v7 }
 0x14e   : > { %v1504_v1 = vmul.f32 %v1441_v60, %v1240_v59  ;;  %v1201_v56 = vmul.f32 %v6652_v2, %v7662_v9 }
 0x14f   : > { %v1251_v30 = vadd.f32 %v1227_v57, %v7661_v45  ;;  %v1252_v29 = vadd.f32 %v1228_v62, %v6620_v20 }
 0x150   : > { %5650 = vmatprep.mubr.msk.f32.mxu0 %vm1531_vm0, %v1504_v1  ;;  %v1447_v15 = vpop.permute.xlu1 %1446  ;;  %v1253_v1 = vadd.f32 %v1229_v16, %v6613_v49  ;;  %v1254_v49 = vadd.f32 %v1230_v51, %v6633_v43 }
 0x151   : > { %v1507_v6 = vmul.f32 %v1447_v15, %v1243_v4  ;;  %5651 = vmatmul.mubr.msk.f32.gmra.mxu0 %vm1531_vm0, %v1505_v3  ;;  %v1445_v36 = vpop.permute.xlu0 %1444 }
 0x152   : > { %v1506_v19 = vmul.f32 %v1445_v36, %v1242_v52  ;;  %v1231_v52 = vadd.f32 %v6659_v24, %v1201_v56  ;;  %v6788_v24 = vld [vmem:[%s7664_s27] ss:$0 sm:$0xff] }
 0x154   : > { %5653 = vmatprep.mubr.msk.f32.mxu0 %vm1531_vm0, %v1506_v19  ;;  %v1255_v2 = vadd.f32 %v1231_v52, %v6624_v38  ;;  %v834_v38 = vld [vmem:[%s7663_s0] sm:$0xff] }
 0x155   : > { %5654 = vmatmul.mubr.msk.f32.gmra.mxu0 %vm1531_vm0, %v1507_v6  ;;  %5676 = vmatprep.subr.mxu1 %v834_v38 }
 0x156   : > { %5677 = vmatpush3.msra.mxu1 %v834_v38 }
 0x15a   : > { %v1451_v12 = vpop.permute.xlu1 %1450 }
 0x15b   : > { %v1509_v61 = vmul.f32 %v1451_v12, %v1245_v32  ;;  %v1449_v8 = vpop.permute.xlu0 %1448 }
 0x15c   : > { %v1508_v63 = vmul.f32 %v1449_v8, %v1244_v48 }
 0x15e   : > { %5656 = vmatprep.mubr.msk.f32.mxu0 %vm1531_vm0, %v1508_v63 }
 0x15f   : > { %v1455_v33 = vpop.permute.xlu1 %1454  ;;  %5657 = vmatmul.mubr.msk.f32.gmra.mxu0 %vm1531_vm0, %v1509_v61 }
 0x160   : > { %v1511_v46 = vmul.f32 %v1455_v33, %v1247_v26 }
 0x162   : > { %v1453_v54 = vpop.permute.xlu0 %1452 }
 0x163   : > { %v1510_v31 = vmul.f32 %v1453_v54, %v1246_v25 }
 0x164   : > { %v1459_v35 = vpop.permute.xlu1 %1458 }
 0x165   : > { %5659 = vmatprep.mubr.msk.f32.mxu0 %vm1531_vm0, %v1510_v31  ;;  %v1513_v34 = vmul.f32 %v1459_v35, %v1249_v58 }
 0x166   : > { %5660 = vmatmul.mubr.msk.f32.gmra.mxu0 %vm1531_vm0, %v1511_v46  ;;  %v1457_v41 = vpop.permute.xlu0 %1456 }
 0x167   : > { %v1512_v44 = vmul.f32 %v1457_v41, %v1248_v0 }
 0x168   : > { %v1463_v5 = vpop.permute.xlu1 %1462 }
 0x169   : > { %5662 = vmatprep.mubr.msk.f32.mxu0 %vm1531_vm0, %v1512_v44  ;;  %v1515_v18 = vmul.f32 %v1463_v5, %v1251_v30 }
 0x16a   : > { %5663 = vmatmul.mubr.msk.f32.gmra.mxu0 %vm1531_vm0, %v1513_v34 }
 0x16c   : > { %v1461_v59 = vpop.permute.xlu0 %1460 }
 0x16d   : > { %v1514_v3 = vmul.f32 %v1461_v59, %v1250_v55  ;;  %v1467_v60 = vpop.permute.xlu1 %1466 }
 0x16e   : > { %v1517_v4 = vmul.f32 %v1467_v60, %v1253_v1 }
 0x16f   : > { %5665 = vmatprep.mubr.msk.f32.mxu0 %vm1531_vm0, %v1514_v3 }
 0x170   : > { %5666 = vmatmul.mubr.msk.f32.gmra.mxu0 %vm1531_vm0, %v1515_v18  ;;  %v1465_v15 = vpop.permute.xlu0 %1464 }
 0x171   : > { %v1516_v6 = vmul.f32 %v1465_v15, %v1252_v29  ;;  %v1471_v36 = vpop.permute.xlu1 %1470 }
 0x172   : > { %v1519_v19 = vmul.f32 %v1471_v36, %v1255_v2 }
 0x173   : > { %5668 = vmatprep.mubr.msk.f32.mxu0 %vm1531_vm0, %v1516_v6 }
 0x174   : > { %5669 = vmatmul.mubr.msk.f32.gmra.mxu0 %vm1531_vm0, %v1517_v4  ;;  %v1469_v20 = vpop.permute.xlu0 %1468 }
 0x175   : > { %v1518_v22 = vmul.f32 %v1469_v20, %v1254_v49 }
 0x177   : > { %5671 = vmatprep.mubr.msk.f32.mxu0 %vm1531_vm0, %v1518_v22  ;;  %v1523_v22 = vld [vmem:[%s7665_s25] sm:$0xff]  ;;  %s5454_s25 = sshll.u32 %s7669_s8, 4 }
 0x178   : > { %5672 = vmatmul.mubr.msk.f32.gmra.mxu0 %vm1531_vm0, %v1519_v19  ;;  %5696 = vmatprep.subr.mxu1 %v1523_v22  ;;  %s800_s9 = scalar_lea.vmem %s7636_s26, %s5454_s25 }
 0x1ff   : > { %v5640_v43 = vpop.f32.mrf.mxu0 }
 0x200   : > { %v6795_v48 = vadd.f32 %v5640_v43, %v6788_v24 }
 0x201   : > { %v1670_v28 = vpop.f32.mrf.mxu0 }
 0x202   : > { %v6791_v14 = vadd.f32 %v6788_v24, %v1670_v28 }
 0x203   : > { %v5643_v32 = vpop.f32.mrf.mxu0 }
 0x204   : > { %1789 = vxpose.xlu0.b32.start [1/2] (short) (narrow) %v6791_v14, 8  ;;  %v6803_v8 = vadd.f32 %v5643_v32, %v6788_v24 }
 0x205   : > { %v1680_v12 = vpop.f32.mrf.mxu0 }
 0x206   : > { %v6798_v17 = vadd.f32 %v6788_v24, %v1680_v12 }
 0x207   : > { %v5646_v61 = vpop.f32.mrf.mxu0 }
 0x208   : > { %1790 = vxpose.xlu0.b32.end [2/2] (short) (narrow) %v6795_v48, 8  ;;  %1821 = vxpose.xlu1.b32.start [1/2] (short) (narrow) %v6798_v17, 8  ;;  %v6811_v33 = vadd.f32 %v5646_v61, %v6788_v24 }
 0x209   : > { %v1690_v42 = vpop.f32.mrf.mxu0 }
 0x20a   : > { %v6806_v63 = vadd.f32 %v6788_v24, %v1690_v42 }
 0x20b   : > { %v5649_v37 = vpop.f32.mrf.mxu0 }
 0x20c   : > { %1822 = vxpose.xlu1.b32.end [2/2] (short) (narrow) %v6803_v8, 8  ;;  %1853 = vxpose.xlu0.b32.start [1/2] (short) (narrow) %v6806_v63, 8  ;;  %v6823_v54 = vadd.f32 %v5649_v37, %v6788_v24 }
 0x20d   : > { %v1700_v50 = vpop.f32.mrf.mxu0 }
 0x20e   : > { %v6815_v23 = vadd.f32 %v6788_v24, %v1700_v50 }
 0x210   : > { %1854 = vxpose.xlu0.b32.end [2/2] (short) (narrow) %v6811_v33, 8 }
 0x211   : > { %v5652_v39 = vpop.f32.mrf.mxu0 }
 0x212   : > { %v6826_v27 = vadd.f32 %v5652_v39, %v6788_v24 }
 0x213   : > { %v1710_v26 = vpop.f32.mrf.mxu0 }
 0x214   : > { %v6818_v25 = vadd.f32 %v6788_v24, %v1710_v26  ;;  %1885 = vxpose.xlu0.b32.start [1/2] (short) (narrow) %v6815_v23, 8  ;;  %v5325_v26 = vld [vmem:[%s7622_s12 + $0x8] sm:$0xff] }
 0x215   : > { %v5655_v46 = vpop.f32.mrf.mxu0  ;;  %5734 = vmatprep.subr.mxu0 %v5325_v26 }
 0x216   : > { %1917 = vxpose.xlu1.b32.start [1/2] (short) (narrow) %v6818_v25, 8  ;;  %v6835_v58 = vadd.f32 %v5655_v46, %v6788_v24  ;;  %5735 = vmatpush3.msra.mxu0 %v5325_v26 }
 0x217   : > { %v1720_v31 = vpop.f32.mrf.mxu0 }
 0x218   : > { %1886 = vxpose.xlu0.b32.end [2/2] (short) (narrow) %v6823_v54, 8  ;;  %v6831_v10 = vadd.f32 %v6788_v24, %v1720_v31 }
 0x21a   : > { %1918 = vxpose.xlu1.b32.end [2/2] (short) (narrow) %v6826_v27, 8 }
 0x21c   : > { %1949 = vxpose.xlu0.b32.start [1/2] (short) (narrow) %v6831_v10, 8 }
 0x21f   : > { %v5658_v35 = vpop.f32.mrf.mxu0 }
 0x220   : > { %1950 = vxpose.xlu0.b32.end [2/2] (short) (narrow) %v6835_v58, 8  ;;  %v6843_v13 = vadd.f32 %v5658_v35, %v6788_v24 }
 0x221   : > { %v1730_v53 = vpop.f32.mrf.mxu0 }
 0x222   : > { %v6839_v0 = vadd.f32 %v6788_v24, %v1730_v53 }
 0x224   : > { %1981 = vxpose.xlu1.b32.start [1/2] (short) (narrow) %v6839_v0, 8 }
 0x226   : > { %v5661_v34 = vpop.f32.mrf.mxu0 }
 0x227   : > { %v6851_v40 = vadd.f32 %v5661_v34, %v6788_v24 }
 0x228   : > { %v1740_v41 = vpop.f32.mrf.mxu0  ;;  %1982 = vxpose.xlu1.b32.end [2/2] (short) (narrow) %v6843_v13, 8 }
 0x229   : > { %v6847_v44 = vadd.f32 %v6788_v24, %v1740_v41 }
 0x22a   : > { %v5664_v47 = vpop.f32.mrf.mxu0 }
 0x22b   : > { %2013 = vxpose.xlu0.b32.start [1/2] (short) (narrow) %v6847_v44, 8  ;;  %v6859_v45 = vadd.f32 %v5664_v47, %v6788_v24 }
 0x22c   : > { %v1750_v57 = vpop.f32.mrf.mxu0 }
 0x22d   : > { %v6854_v5 = vadd.f32 %v6788_v24, %v1750_v57 }
 0x22f   : > { %2014 = vxpose.xlu0.b32.end [2/2] (short) (narrow) %v6851_v40, 8  ;;  %2045 = vxpose.xlu1.b32.start [1/2] (short) (narrow) %v6854_v5, 8 }
 0x230   : > { %v5667_v21 = vpop.f32.mrf.mxu0 }
 0x231   : > { %v6867_v18 = vadd.f32 %v5667_v21, %v6788_v24 }
 0x232   : > { %v1760_v30 = vpop.f32.mrf.mxu0 }
 0x233   : > { %v6862_v55 = vadd.f32 %v6788_v24, %v1760_v30  ;;  %2046 = vxpose.xlu1.b32.end [2/2] (short) (narrow) %v6859_v45, 8 }
 0x234   : > { %v5670_v9 = vpop.f32.mrf.mxu0 }
 0x235   : > { %2077 = vxpose.xlu0.b32.start [1/2] (short) (narrow) %v6862_v55, 8  ;;  %v6875_v3 = vadd.f32 %v5670_v9, %v6788_v24 }
 0x236   : > { %v1770_v56 = vpop.f32.mrf.mxu0 }
 0x237   : > { %v6870_v59 = vadd.f32 %v6788_v24, %v1770_v56 }
 0x238   : > { %v5673_v16 = vpop.f32.mrf.mxu0 }
 0x239   : > { %2078 = vxpose.xlu0.b32.end [2/2] (short) (narrow) %v6867_v18, 8  ;;  %2109 = vxpose.xlu1.b32.start [1/2] (short) (narrow) %v6870_v59, 8  ;;  %v6883_v62 = vadd.f32 %v5673_v16, %v6788_v24 }
 0x23a   : > { %v1780_v7 = vpop.f32.mrf.mxu0 }
 0x23b   : > { %v6878_v60 = vadd.f32 %v6788_v24, %v1780_v7 }
 0x23d   : > { %2110 = vxpose.xlu1.b32.end [2/2] (short) (narrow) %v6875_v3, 8  ;;  %2141 = vxpose.xlu0.b32.start [1/2] (short) (narrow) %v6878_v60, 8 }
 0x241   : > { %2142 = vxpose.xlu0.b32.end [2/2] (short) (narrow) %v6883_v62, 8 }
 0x280   : > { %v1805_v1 = vpop.trf.xlu0 }
 0x281   : > { %5678 = vmatprep.mubr.msk.f32.mxu1 %vm1531_vm0, %v1805_v1 }
 0x284   : > { %v1837_v29 = vpop.trf.xlu1 }
 0x285   : > { %5679 = vmatmul.mubr.msk.f32.vlgmr.msra.gmra.mxu1 %vm1531_vm0, %v1837_v29 }
 0x286   : > { %5697 = vmatpush3.msra.mxu1 %v1523_v22  ;;  %v3031_v22 = vld [vmem:[%s7666_s28] sm:$0xff] }
 0x288   : > { %v1869_v4 = vpop.trf.xlu0 }
 0x289   : > { %5681 = vmatprep.mubr.msk.f32.mxu1 %vm1531_vm0, %v1869_v4 }
 0x290   : > { %v1901_v15 = vpop.trf.xlu0 }
 0x291   : > { %5682 = vmatmul.mubr.msk.f32.gmra.mxu1 %vm1531_vm0, %v1901_v15 }
 0x292   : > { %v1933_v52 = vpop.trf.xlu1 }
 0x293   : > { %5684 = vmatprep.mubr.msk.f32.mxu1 %vm1531_vm0, %v1933_v52 }
 0x298   : > { %v1965_v6 = vpop.trf.xlu0 }
 0x299   : > { %5685 = vmatmul.mubr.msk.f32.gmra.mxu1 %vm1531_vm0, %v1965_v6 }
 0x2a0   : > { %v1997_v36 = vpop.trf.xlu1 }
 0x2a1   : > { %5687 = vmatprep.mubr.msk.f32.mxu1 %vm1531_vm0, %v1997_v36 }
 0x2a7   : > { %v2029_v51 = vpop.trf.xlu0 }
 0x2a8   : > { %5688 = vmatmul.mubr.msk.f32.gmra.mxu1 %vm1531_vm0, %v2029_v51 }
 0x2ab   : > { %v2061_v2 = vpop.trf.xlu1 }
 0x2ac   : > { %5690 = vmatprep.mubr.msk.f32.mxu1 %vm1531_vm0, %v2061_v2 }
 0x2b1   : > { %v2093_v49 = vpop.trf.xlu0 }
 0x2b2   : > { %5691 = vmatmul.mubr.msk.f32.gmra.mxu1 %vm1531_vm0, %v2093_v49 }
 0x2b5   : > { %v2125_v19 = vpop.trf.xlu1 }
 0x2b6   : > { %5693 = vmatprep.mubr.msk.f32.mxu1 %vm1531_vm0, %v2125_v19  ;;  %v3033_v19 = vld [vmem:[%s7622_s12] sm:$0xff] }
 0x2b7   : > { %5760 = vmatprep.subr.mxu1 %v3033_v19 }
 0x2b9   : > { %v2157_v20 = vpop.trf.xlu0 }
 0x2ba   : > { %5694 = vmatmul.mubr.msk.f32.gmra.mxu1 %vm1531_vm0, %v2157_v20  ;;  %v5358_v20 = vld [vmem:[%s7622_s12 + $0x10] sm:$0xff] }
 0x2bb   : > { %5786 = vmatprep.subr.mxu0 %v5358_v20 }
 0x345   : > { %v5680_v11 = vpop.f32.mrf.mxu1 }
 0x347   : > { %v2275_v38 = vpop.f32.mrf.mxu1 }
 0x348   : > { %2334 = vxpose.xlu1.b32.start.end [1/1] (short) (narrow) %v2275_v38, 16 }
 0x34d   : > { %2366 = vxpose.xlu1.b32.start.end [1/1] (short) (narrow) %v5680_v11, 16  ;;  %v6940_v11 = vld [vmem:[%s7667_s29] ss:$0 sm:$0xff] }
 0x351   : > { %v5683_v43 = vpop.f32.mrf.mxu1 }
 0x353   : > { %v2285_v24 = vpop.f32.mrf.mxu1 }
 0x354   : > { %2398 = vxpose.xlu0.b32.start.end [1/1] (short) (narrow) %v2285_v24, 16 }
 0x359   : > { %2430 = vxpose.xlu0.b32.start.end [1/1] (short) (narrow) %v5683_v43, 16  ;;  %v5686_v28 = vpop.f32.mrf.mxu1 }
 0x35b   : > { %v2295_v32 = vpop.f32.mrf.mxu1 }
 0x35c   : > { %2462 = vxpose.xlu1.b32.start.end [1/1] (short) (narrow) %v2295_v32, 16 }
 0x35e   : > { %2494 = vxpose.xlu0.b32.start.end [1/1] (short) (narrow) %v5686_v28, 16 }
 0x368   : > { %v5689_v12 = vpop.f32.mrf.mxu1 }
 0x369   : > { %2558 = vxpose.xlu0.b32.start.end [1/1] (short) (narrow) %v5689_v12, 16 }
 0x36a   : > { %v2305_v61 = vpop.f32.mrf.mxu1 }
 0x36b   : > { %2526 = vxpose.xlu1.b32.start.end [1/1] (short) (narrow) %v2305_v61, 16 }
 0x372   : > { %v5692_v42 = vpop.f32.mrf.mxu1 }
 0x373   : > { %2622 = vxpose.xlu0.b32.start.end [1/1] (short) (narrow) %v5692_v42, 16 }
 0x374   : > { %v2315_v37 = vpop.f32.mrf.mxu1 }
 0x375   : > { %2590 = vxpose.xlu1.b32.start.end [1/1] (short) (narrow) %v2315_v37, 16 }
 0x37a   : > { %v5695_v50 = vpop.f32.mrf.mxu1 }
 0x37b   : > { %2686 = vxpose.xlu0.b32.start.end [1/1] (short) (narrow) %v5695_v50, 16 }
 0x37c   : > { %v2325_v39 = vpop.f32.mrf.mxu1 }
 0x37d   : > { %2654 = vxpose.xlu1.b32.start.end [1/1] (short) (narrow) %v2325_v39, 16 }
 0x3c4   : > { %v2350_v46 = vpop.trf.xlu1 }
 0x3c5   : > { %5698 = vmatprep.mubr.msk.f32.mxu1 %vm2724_vm1, %v2350_v46 }
 0x3c8   : > { %v2351_v31 = vpop.trf.xlu1 }
 0x3c9   : > { %5699 = vmatmul.mubr.msk.f32.vlgmr.msra.gmra.mxu1 %vm2724_vm1, %v2351_v31 }
 0x3ca   : > { %5761 = vmatpush3.msra.mxu1 %v3033_v19 }
 0x3cb   : > { %5812 = vmatprep.subr.mxu1 %v3031_v22 }
 0x3cc   : > { %v2382_v35 = vpop.trf.xlu1 }
 0x3cd   : > { %5701 = vmatprep.mubr.msk.f32.mxu1 %vm2724_vm1, %v2382_v35 }
 0x3d0   : > { %v2383_v53 = vpop.trf.xlu1  ;;  %v2414_v34 = vpop.trf.xlu0 }
 0x3d1   : > { %5702 = vmatmul.mubr.msk.f32.gmra.mxu1 %vm2724_vm1, %v2383_v53 }
 0x3d2   : > { %5704 = vmatprep.mubr.msk.f32.mxu1 %vm2724_vm1, %v2414_v34 }
 0x3d4   : > { %v2415_v41 = vpop.trf.xlu0 }
 0x3d5   : > { %5705 = vmatmul.mubr.msk.f32.gmra.mxu1 %vm2724_vm1, %v2415_v41 }
 0x3d8   : > { %v2446_v47 = vpop.trf.xlu0  ;;  %v2478_v57 = vpop.trf.xlu1 }
 0x3d9   : > { %5707 = vmatprep.mubr.msk.f32.mxu1 %vm2724_vm1, %v2446_v47 }
 0x3dc   : > { %v2447_v21 = vpop.trf.xlu0  ;;  %v2479_v30 = vpop.trf.xlu1 }
 0x3dd   : > { %5708 = vmatmul.mubr.msk.f32.gmra.mxu1 %vm2724_vm1, %v2447_v21 }
 0x3de   : > { %5710 = vmatprep.mubr.msk.f32.mxu1 %vm2724_vm1, %v2478_v57 }
 0x3e0   : > { %v2510_v9 = vpop.trf.xlu0 }
 0x3e1   : > { %5711 = vmatmul.mubr.msk.f32.gmra.mxu1 %vm2724_vm1, %v2479_v30 }
 0x3e2   : > { %5713 = vmatprep.mubr.msk.f32.mxu1 %vm2724_vm1, %v2510_v9 }
 0x3e4   : > { %v2511_v56 = vpop.trf.xlu0 }
 0x3e5   : > { %5714 = vmatmul.mubr.msk.f32.gmra.mxu1 %vm2724_vm1, %v2511_v56 }
 0x3e7   : > { %v2542_v16 = vpop.trf.xlu1 }
 0x3e8   : > { %5716 = vmatprep.mubr.msk.f32.mxu1 %vm2724_vm1, %v2542_v16  ;;  %v2574_v7 = vpop.trf.xlu0 }
 0x3eb   : > { %v2543_v1 = vpop.trf.xlu1 }
 0x3ec   : > { %5717 = vmatmul.mubr.msk.f32.gmra.mxu1 %vm2724_vm1, %v2543_v1  ;;  %v2575_v29 = vpop.trf.xlu0 }
 0x3ed   : > { %5719 = vmatprep.mubr.msk.f32.mxu1 %vm2724_vm1, %v2574_v7 }
 0x3f0   : > { %5720 = vmatmul.mubr.msk.f32.gmra.mxu1 %vm2724_vm1, %v2575_v29  ;;  %v2638_v15 = vpop.trf.xlu0 }
 0x3f1   : > { %v2606_v4 = vpop.trf.xlu1 }
 0x3f2   : > { %5722 = vmatprep.mubr.msk.f32.mxu1 %vm2724_vm1, %v2606_v4 }
 0x3f4   : > { %v2639_v6 = vpop.trf.xlu0 }
 0x3f5   : > { %v2607_v52 = vpop.trf.xlu1 }
 0x3f6   : > { %5723 = vmatmul.mubr.msk.f32.gmra.mxu1 %vm2724_vm1, %v2607_v52 }
 0x3f7   : > { %5725 = vmatprep.mubr.msk.f32.mxu1 %vm2724_vm1, %v2638_v15 }
 0x3f8   : > { %v2702_v51 = vpop.trf.xlu0 }
 0x3f9   : > { %v2670_v36 = vpop.trf.xlu1 }
 0x3fa   : > { %5726 = vmatmul.mubr.msk.f32.gmra.mxu1 %vm2724_vm1, %v2639_v6 }
 0x3fb   : > { %5728 = vmatprep.mubr.msk.f32.mxu1 %vm2724_vm1, %v2670_v36 }
 0x3fc   : > { %v2703_v49 = vpop.trf.xlu0 }
 0x3fd   : > { %v2671_v2 = vpop.trf.xlu1 }
 0x3fe   : > { %5729 = vmatmul.mubr.msk.f32.gmra.mxu1 %vm2724_vm1, %v2671_v2 }
 0x3ff   : > { %5731 = vmatprep.mubr.msk.f32.mxu1 %vm2724_vm1, %v2702_v51 }
 0x402   : > { %5732 = vmatmul.mubr.msk.f32.gmra.mxu1 %vm2724_vm1, %v2703_v49 }
 0x489   : > { %v5700_v38 = vpop.f32.mrf.mxu1 }
 0x48a   : > { %v2869_v43 = vadd.f32 %v5700_v38, %v6940_v11 }
 0x48b   : > { %v2863_v24 = vpop.f32.mrf.mxu1 }
 0x48c   : > { %v2864_v28 = vadd.f32 %v6940_v11, %v2863_v24  ;;  %v2983_v32 = vadd.f32 %v2869_v43, %v6795_v48 }
 0x48e   : > { %v2982_v12 = vadd.f32 %v2864_v28, %v6791_v14  ;;  %v3007_v42 = vmax.f32 %v2983_v32, 0.0 }
 0x490   : > { %v3006_v61 = vmax.f32 %v2982_v12, 0.0 }
 0x491   : > { %v5703_v37 = vpop.f32.mrf.mxu1 }
 0x492   : > { %v2879_v50 = vadd.f32 %v5703_v37, %v6940_v11  ;;  %5762 = vmatprep.mubr.msk.f32.mxu1 %vm2724_vm1, %v3006_v61 }
 0x493   : > { %v2873_v39 = vpop.f32.mrf.mxu1  ;;  %5763 = vmatmul.mubr.msk.f32.vlgmr.msra.gmra.mxu1 %vm2724_vm1, %v3007_v42 }
 0x494   : > { %v2874_v26 = vadd.f32 %v6940_v11, %v2873_v39  ;;  %5813 = vmatpush3.msra.mxu1 %v3031_v22  ;;  %v2985_v46 = vadd.f32 %v2879_v50, %v6803_v8 }
 0x495   : > { %v5706_v48 = vpop.f32.mrf.mxu1 }
 0x496   : > { %v2984_v31 = vadd.f32 %v2874_v26, %v6798_v17  ;;  %v2889_v14 = vadd.f32 %v5706_v48, %v6940_v11  ;;  %v3009_v34 = vmax.f32 %v2985_v46, 0.0 }
 0x497   : > { %v2883_v53 = vpop.f32.mrf.mxu1 }
 0x498   : > { %v3008_v35 = vmax.f32 %v2984_v31, 0.0  ;;  %v2884_v41 = vadd.f32 %v6940_v11, %v2883_v53  ;;  %v2987_v47 = vadd.f32 %v2889_v14, %v6811_v33 }
 0x49a   : > { %5736 = vmatprep.mubr.msk.f32.mxu0 %vm2724_vm1, %v3008_v35  ;;  %5765 = vmatprep.mubr.msk.f32.mxu1 %vm2724_vm1, %v3008_v35  ;;  %v2986_v57 = vadd.f32 %v2884_v41, %v6806_v63  ;;  %v6962_v8 = vmax.f32 %v2987_v47, 0.0 }
 0x49b   : > { %5737 = vmatmul.mubr.msk.f32.vlgmr.msra.gmra.mxu0 %vm2724_vm1, %v3009_v34  ;;  %5766 = vmatmul.mubr.msk.f32.gmra.mxu1 %vm2724_vm1, %v3009_v34 }
 0x49c   : > { %5787 = vmatpush3.msra.mxu0 %v5358_v20  ;;  %v6960_v17 = vmax.f32 %v2986_v57, 0.0 }
 0x49d   : > { %v5709_v21 = vpop.f32.mrf.mxu1 }
 0x49e   : > { %v2899_v30 = vadd.f32 %v5709_v21, %v6940_v11  ;;  %5739 = vmatprep.mubr.msk.f32.mxu0 %vm2724_vm1, %v6960_v17  ;;  %5768 = vmatprep.mubr.msk.f32.mxu1 %vm2724_vm1, %v6960_v17 }
 0x49f   : > { %v2893_v33 = vpop.f32.mrf.mxu1  ;;  %5740 = vmatmul.mubr.msk.f32.gmra.mxu0 %vm2724_vm1, %v6962_v8  ;;  %5769 = vmatmul.mubr.msk.f32.gmra.mxu1 %vm2724_vm1, %v6962_v8 }
 0x4a0   : > { %v2894_v63 = vadd.f32 %v6940_v11, %v2893_v33  ;;  %v2989_v9 = vadd.f32 %v2899_v30, %v6823_v54 }
 0x4a1   : > { %v5712_v56 = vpop.f32.mrf.mxu1 }
 0x4a2   : > { %v2988_v16 = vadd.f32 %v2894_v63, %v6815_v23  ;;  %v2909_v7 = vadd.f32 %v5712_v56, %v6940_v11  ;;  %v6980_v15 = vmax.f32 %v2989_v9, 0.0 }
 0x4a3   : > { %v2903_v1 = vpop.f32.mrf.mxu1 }
 0x4a4   : > { %v6977_v29 = vmax.f32 %v2988_v16, 0.0  ;;  %v2904_v4 = vadd.f32 %v6940_v11, %v2903_v1  ;;  %v2991_v52 = vadd.f32 %v2909_v7, %v6826_v27 }
 0x4a5   : > { %v6983_v6 = vpop.f32.mrf.mxu1 }
 0x4a6   : > { %v2990_v36 = vadd.f32 %v2904_v4, %v6818_v25  ;;  %5742 = vmatprep.mubr.msk.f32.mxu0 %vm2724_vm1, %v6977_v29  ;;  %5771 = vmatprep.mubr.msk.f32.mxu1 %vm2724_vm1, %v6977_v29  ;;  %v6996_v27 = vmax.f32 %v2991_v52, 0.0 }
 0x4a7   : > { %v2913_v23 = vpop.f32.mrf.mxu1  ;;  %5743 = vmatmul.mubr.msk.f32.gmra.mxu0 %vm2724_vm1, %v6980_v15  ;;  %5772 = vmatmul.mubr.msk.f32.gmra.mxu1 %vm2724_vm1, %v6980_v15 }
 0x4a8   : > { %v6994_v54 = vmax.f32 %v2990_v36, 0.0  ;;  %v2914_v63 = vadd.f32 %v6940_v11, %v2913_v23 }
 0x4aa   : > { %5745 = vmatprep.mubr.msk.f32.mxu0 %vm2724_vm1, %v6994_v54 }
 0x4ab   : > { %5746 = vmatmul.mubr.msk.f32.gmra.mxu0 %vm2724_vm1, %v6996_v27 }
 0x4ac   : > { %v5718_v25 = vpop.f32.mrf.mxu1 }
 0x4ad   : > { %v2929_v51 = vadd.f32 %v5718_v25, %v6940_v11 }
 0x4ae   : > { %v2923_v2 = vpop.f32.mrf.mxu1 }
 0x4af   : > { %v2924_v49 = vadd.f32 %v6940_v11, %v2923_v2  ;;  %v2995_v19 = vadd.f32 %v2929_v51, %v6843_v13 }
 0x4b0   : > { %v5721_v20 = vpop.f32.mrf.mxu1 }
 0x4b1   : > { %v2994_v22 = vadd.f32 %v2924_v49, %v6839_v0  ;;  %v2939_v38 = vadd.f32 %v5721_v20, %v6940_v11  ;;  %v3019_v32 = vmax.f32 %v2995_v19, 0.0 }
 0x4b2   : > { %v2933_v43 = vpop.f32.mrf.mxu1 }
 0x4b3   : > { %v3018_v24 = vmax.f32 %v2994_v22, 0.0  ;;  %v2934_v28 = vadd.f32 %v6940_v11, %v2933_v43  ;;  %v2997_v12 = vadd.f32 %v2939_v38, %v6851_v40 }
 0x4b5   : > { %v2996_v61 = vadd.f32 %v2934_v28, %v6847_v44  ;;  %5774 = vmatprep.mubr.msk.f32.mxu1 %vm2724_vm1, %v3018_v24  ;;  %v3021_v0 = vmax.f32 %v2997_v12, 0.0 }
 0x4b6   : > { %v5724_v42 = vpop.f32.mrf.mxu1  ;;  %5775 = vmatmul.mubr.msk.f32.gmra.mxu1 %vm2724_vm1, %v3019_v32 }
 0x4b7   : > { %v3020_v13 = vmax.f32 %v2996_v61, 0.0  ;;  %v2949_v37 = vadd.f32 %v5724_v42, %v6940_v11 }
 0x4b8   : > { %v2943_v50 = vpop.f32.mrf.mxu1 }
 0x4b9   : > { %v2944_v39 = vadd.f32 %v6940_v11, %v2943_v50  ;;  %5748 = vmatprep.mubr.msk.f32.mxu0 %vm2724_vm1, %v3020_v13  ;;  %5777 = vmatprep.mubr.msk.f32.mxu1 %vm2724_vm1, %v3020_v13  ;;  %v2999_v40 = vadd.f32 %v2949_v37, %v6859_v45 }
 0x4ba   : > { %v5727_v26 = vpop.f32.mrf.mxu1  ;;  %5749 = vmatmul.mubr.msk.f32.gmra.mxu0 %vm2724_vm1, %v3021_v0  ;;  %5778 = vmatmul.mubr.msk.f32.gmra.mxu1 %vm2724_vm1, %v3021_v0 }
 0x4bb   : > { %v2998_v44 = vadd.f32 %v2944_v39, %v6854_v5  ;;  %v2959_v46 = vadd.f32 %v5727_v26, %v6940_v11  ;;  %v3023_v35 = vmax.f32 %v2999_v40, 0.0  ;;  %v7110_v26 = vld [vmem:[%s7623_s13] ss:$0 sm:$0xff] }
 0x4bc   : > { %v2953_v31 = vpop.f32.mrf.mxu1 }
 0x4bd   : > { %v3022_v48 = vmax.f32 %v2998_v44, 0.0  ;;  %v2954_v14 = vadd.f32 %v6940_v11, %v2953_v31  ;;  %v3001_v53 = vadd.f32 %v2959_v46, %v6867_v18 }
 0x4be   : > { %v5730_v34 = vpop.f32.mrf.mxu1 }
 0x4bf   : > { %v3000_v41 = vadd.f32 %v2954_v14, %v6862_v55  ;;  %v2969_v45 = vadd.f32 %v5730_v34, %v6940_v11  ;;  %5751 = vmatprep.mubr.msk.f32.mxu0 %vm2724_vm1, %v3022_v48  ;;  %5780 = vmatprep.mubr.msk.f32.mxu1 %vm2724_vm1, %v3022_v48  ;;  %v3025_v21 = vmax.f32 %v3001_v53, 0.0 }
 0x4c0   : > { %v2963_v47 = vpop.f32.mrf.mxu1  ;;  %5752 = vmatmul.mubr.msk.f32.gmra.mxu0 %vm2724_vm1, %v3023_v35  ;;  %5781 = vmatmul.mubr.msk.f32.gmra.mxu1 %vm2724_vm1, %v3023_v35 }
 0x4c1   : > { %v3024_v5 = vmax.f32 %v3000_v41, 0.0  ;;  %v2964_v57 = vadd.f32 %v6940_v11, %v2963_v47  ;;  %v3003_v18 = vadd.f32 %v2969_v45, %v6875_v3  ;;  %v2992_v3 = vadd.f32 %v2914_v63, %v6831_v10 }
 0x4c2   : > { %v5733_v56 = vpop.f32.mrf.mxu1 }
 0x4c3   : > { %v3002_v30 = vadd.f32 %v2964_v57, %v6870_v59  ;;  %5754 = vmatprep.mubr.msk.f32.mxu0 %vm2724_vm1, %v3024_v5  ;;  %5783 = vmatprep.mubr.msk.f32.mxu1 %vm2724_vm1, %v3024_v5  ;;  %v3027_v33 = vmax.f32 %v3003_v18, 0.0  ;;  %v2919_v59 = vadd.f32 %v6983_v6, %v6940_v11  ;;  %v3016_v9 = vmax.f32 %v2992_v3, 0.0 }
 0x4c4   : > { %5755 = vmatmul.mubr.msk.f32.gmra.mxu0 %vm2724_vm1, %v3025_v21  ;;  %5784 = vmatmul.mubr.msk.f32.gmra.mxu1 %vm2724_vm1, %v3025_v21  ;;  %v2979_v16 = vadd.f32 %v5733_v56, %v6940_v11 }
 0x4c5   : > { %v3026_v55 = vmax.f32 %v3002_v30, 0.0  ;;  %5814 = vmatprep.mubr.msk.f32.mxu1 %vm2724_vm1, %v6960_v17 }
 0x4c6   : > { %v3005_v1 = vadd.f32 %v2979_v16, %v6883_v62 }
 0x4c7   : > { %5757 = vmatprep.mubr.msk.f32.mxu0 %vm2724_vm1, %v3026_v55 }
 0x4c8   : > { %5758 = vmatmul.mubr.msk.f32.gmra.mxu0 %vm2724_vm1, %v3027_v33  ;;  %5815 = vmatmul.mubr.msk.f32.vlgmr.msra.gmra.mxu1 %vm2724_vm1, %v6962_v8 }
 0x4c9   : > { %5788 = vmatprep.mubr.msk.f32.mxu0 %vm2724_vm1, %v6960_v17  ;;  %5817 = vmatprep.mubr.msk.f32.mxu1 %vm2724_vm1, %v6977_v29  ;;  %v2993_v17 = vadd.f32 %v2919_v59, %v6835_v58 }
 0x4cb   : > { %v3017_v10 = vmax.f32 %v2993_v17, 0.0 }
 0x4cc   : > { %5789 = vmatmul.mubr.msk.f32.vlgmr.msra.gmra.mxu0 %vm2724_vm1, %v6962_v8  ;;  %5818 = vmatmul.mubr.msk.f32.gmra.mxu1 %vm2724_vm1, %v6980_v15  ;;  %v2973_v8 = vpop.f32.mrf.mxu1 }
 0x4cd   : > { %5791 = vmatprep.mubr.msk.f32.mxu0 %vm2724_vm1, %v6977_v29  ;;  %5820 = vmatprep.mubr.msk.f32.mxu1 %vm2724_vm1, %v6994_v54  ;;  %v2974_v58 = vadd.f32 %v6940_v11, %v2973_v8 }
 0x4cf   : > { %v3004_v7 = vadd.f32 %v2974_v58, %v6878_v60  ;;  %v3029_v60 = vmax.f32 %v3005_v1, 0.0 }
 0x4d0   : > { %5792 = vmatmul.mubr.msk.f32.gmra.mxu0 %vm2724_vm1, %v6980_v15  ;;  %5821 = vmatmul.mubr.msk.f32.gmra.mxu1 %vm2724_vm1, %v6996_v27 }
 0x4d1   : > { %5794 = vmatprep.mubr.msk.f32.mxu0 %vm2724_vm1, %v6994_v54  ;;  %5823 = vmatprep.mubr.msk.f32.mxu1 %vm2724_vm1, %v3016_v9  ;;  %v3028_v29 = vmax.f32 %v3004_v7, 0.0 }
 0x4d4   : > { %5795 = vmatmul.mubr.msk.f32.gmra.mxu0 %vm2724_vm1, %v6996_v27  ;;  %5824 = vmatmul.mubr.msk.f32.gmra.mxu1 %vm2724_vm1, %v3017_v10 }
 0x4d5   : > { %5797 = vmatprep.mubr.msk.f32.mxu0 %vm2724_vm1, %v3016_v9  ;;  %5826 = vmatprep.mubr.msk.f32.mxu1 %vm2724_vm1, %v3022_v48 }
 0x4d8   : > { %5798 = vmatmul.mubr.msk.f32.gmra.mxu0 %vm2724_vm1, %v3017_v10  ;;  %5827 = vmatmul.mubr.msk.f32.gmra.mxu1 %vm2724_vm1, %v3023_v35 }
 0x4d9   : > { %5800 = vmatprep.mubr.msk.f32.mxu0 %vm2724_vm1, %v3022_v48  ;;  %5829 = vmatprep.mubr.msk.f32.mxu1 %vm2724_vm1, %v3024_v5 }
 0x4dc   : > { %5801 = vmatmul.mubr.msk.f32.gmra.mxu0 %vm2724_vm1, %v3023_v35  ;;  %5830 = vmatmul.mubr.msk.f32.gmra.mxu1 %vm2724_vm1, %v3025_v21 }
 0x4dd   : > { %5803 = vmatprep.mubr.msk.f32.mxu0 %vm2724_vm1, %v3024_v5  ;;  %5832 = vmatprep.mubr.msk.f32.mxu1 %vm2724_vm1, %v3026_v55 }
 0x4e0   : > { %5804 = vmatmul.mubr.msk.f32.gmra.mxu0 %vm2724_vm1, %v3025_v21  ;;  %5833 = vmatmul.mubr.msk.f32.gmra.mxu1 %vm2724_vm1, %v3027_v33 }
 0x4e1   : > { %5806 = vmatprep.mubr.msk.f32.mxu0 %vm2724_vm1, %v3026_v55  ;;  %5835 = vmatprep.mubr.msk.f32.mxu1 %vm2724_vm1, %v3028_v29 }
 0x4e4   : > { %5807 = vmatmul.mubr.msk.f32.gmra.mxu0 %vm2724_vm1, %v3027_v33  ;;  %5836 = vmatmul.mubr.msk.f32.gmra.mxu1 %vm2724_vm1, %v3029_v60 }
 0x4e5   : > { %5809 = vmatprep.mubr.msk.f32.mxu0 %vm2724_vm1, %v3028_v29 }
 0x4e8   : > { %5810 = vmatmul.mubr.msk.f32.gmra.mxu0 %vm2724_vm1, %v3029_v60 }
 0x553   : > { %v5764_v36 = vpop.f32.mrf.mxu1 }
 0x555   : > { %v3307_v54 = vpop.f32.mrf.mxu1 }
 0x55b   : > { %v5738_v11 = vpop.f32.mrf.mxu0  ;;  %v5767_v27 = vpop.f32.mrf.mxu1 }
 0x55c   : > { %v3313_v9 = vadd.f32 %v5764_v36, %v5738_v11 }
 0x55d   : > { %v3150_v62 = vpop.f32.mrf.mxu0  ;;  %v3317_v2 = vpop.f32.mrf.mxu1 }
 0x55e   : > { %v3308_v37 = vadd.f32 %v3307_v54, %v3150_v62 }
 0x55f   : > { %v5741_v4 = vpop.f32.mrf.mxu0  ;;  %v7095_v19 = vpop.f32.mrf.mxu1 }
 0x560   : > { %v3323_v50 = vadd.f32 %v5767_v27, %v5741_v4 }
 0x561   : > { %v3160_v15 = vpop.f32.mrf.mxu0  ;;  %v3327_v38 = vpop.f32.mrf.mxu1 }
 0x562   : > { %v3318_v46 = vadd.f32 %v3317_v2, %v3160_v15 }
 0x567   : > { %v7091_v52 = vpop.f32.mrf.mxu0  ;;  %v7099_v24 = vpop.f32.mrf.mxu1 }
 0x569   : > { %v3170_v6 = vpop.f32.mrf.mxu0  ;;  %v3337_v12 = vpop.f32.mrf.mxu1 }
 0x56a   : > { %v3328_v57 = vadd.f32 %v3327_v38, %v3170_v6 }
 0x56b   : > { %v7093_v23 = vpop.f32.mrf.mxu0 }
 0x56d   : > { %v3180_v25 = vpop.f32.mrf.mxu0 }
 0x56e   : > { %v3338_v8 = vadd.f32 %v3337_v12, %v3180_v25 }
 0x576   : > { %v5776_v42 = vpop.f32.mrf.mxu1 }
 0x578   : > { %v3347_v40 = vpop.f32.mrf.mxu1 }
 0x57a   : > { %v5750_v51 = vpop.f32.mrf.mxu0  ;;  %v5779_v41 = vpop.f32.mrf.mxu1 }
 0x57b   : > { %v3353_v54 = vadd.f32 %v5776_v42, %v5750_v51 }
 0x57c   : > { %v3190_v49 = vpop.f32.mrf.mxu0  ;;  %v3357_v30 = vpop.f32.mrf.mxu1 }
 0x57d   : > { %v3348_v56 = vadd.f32 %v3347_v40, %v3190_v49 }
 0x580   : > { %v5753_v20 = vpop.f32.mrf.mxu0  ;;  %v5782_v59 = vpop.f32.mrf.mxu1 }
 0x581   : > { %v3363_v7 = vadd.f32 %v5779_v41, %v5753_v20 }
 0x582   : > { %v3200_v22 = vpop.f32.mrf.mxu0  ;;  %v3367_v1 = vpop.f32.mrf.mxu1 }
 0x583   : > { %v3358_v62 = vadd.f32 %v3357_v30, %v3200_v22 }
 0x584   : > { %v7097_v43 = vpop.f32.mrf.mxu0  ;;  %v5785_v38 = vpop.f32.mrf.mxu1 }
 0x586   : > { %v7101_v28 = vpop.f32.mrf.mxu0 }
 0x588   : > { %v7103_v32 = vpop.f32.mrf.mxu0 }
 0x58a   : > { %v7105_v61 = vpop.f32.mrf.mxu0 }
 0x58c   : > { %v5790_v13 = vpop.f32.mrf.mxu0 }
 0x58d   : > { %v3546_v58 = vadd.f32 %v5790_v13, %v3313_v9 }
 0x58e   : > { %v3466_v0 = vpop.f32.mrf.mxu0 }
 0x58f   : > { %v3545_v39 = vadd.f32 %v3466_v0, %v3308_v37  ;;  %v7134_v11 = vadd.f32 %v7110_v26, %v3546_v58 }
 0x590   : > { %v5793_v44 = vpop.f32.mrf.mxu0 }
 0x591   : > { %v7113_v31 = vadd.f32 %v7110_v26, %v3545_v39  ;;  %v3548_v48 = vadd.f32 %v5793_v44, %v3323_v50  ;;  %v3333_v50 = vadd.f32 %v7095_v19, %v7091_v52  ;;  %v3368_v39 = vadd.f32 %v3367_v1, %v7101_v28 }
 0x592   : > { %v3476_v14 = vpop.f32.mrf.mxu0  ;;  %v3373_v19 = vadd.f32 %v5782_v59, %v7097_v43 }
 0x593   : > { %v5393_v35 = vmul.f32 -1.442695, %v7113_v31  ;;  %v7117_v53 = vadd.f32 %v7110_v26, %v3548_v48  ;;  %v3547_v34 = vadd.f32 %v3476_v14, %v3318_v46  ;;  %v5394_v46 = vmul.f32 -1.442695, %v7134_v11 }
 0x594   : > { %v5796_v45 = vpop.f32.mrf.mxu0 }
 0x595   : > { %6026 = vpow2.f32 %v5393_v35  ;;  %v5396_v47 = vmul.f32 -1.442695, %v7117_v53  ;;  %v7121_v5 = vadd.f32 %v7110_v26, %v3547_v34  ;;  %v3377_v35 = vpop.f32.mrf.mxu1  ;;  %v3550_v34 = vadd.f32 %v5796_v45, %v3333_v50 }
 0x596   : > { %v3486_v21 = vpop.f32.mrf.mxu0  ;;  %v3378_v28 = vadd.f32 %v3377_v35, %v7105_v61  ;;  %v3343_v61 = vadd.f32 %v7099_v24, %v7093_v23 }
 0x597   : > { %6028 = vpow2.f32 %v5396_v47  ;;  %v5395_v18 = vmul.f32 -1.442695, %v7121_v5  ;;  %v3549_v55 = vadd.f32 %v3486_v21, %v3328_v57 }
 0x598   : > { %v7124_v33 = vpop.f32.mrf.mxu0 }
 0x599   : > { %6030 = vpow2.f32 %v5395_v18  ;;  %v7127_v3 = vadd.f32 %v7110_v26, %v3549_v55  ;;  %v7162_v55 = vadd.f32 %v7110_v26, %v3550_v34 }
 0x59a   : > { %v3496_v63 = vpop.f32.mrf.mxu0 }
 0x59b   : > { %v5397_v29 = vmul.f32 -1.442695, %v7127_v3  ;;  %v3551_v4 = vadd.f32 %v3496_v63, %v3338_v8 }
 0x59c   : > { %v5802_v17 = vpop.f32.mrf.mxu0 }
 0x59d   : > { %6032 = vpow2.f32 %v5397_v29  ;;  %v3554_v12 = vadd.f32 %v5802_v17, %v3353_v54  ;;  %v7141_v51 = vadd.f32 %v7110_v26, %v3551_v4  ;;  %v3552_v17 = vadd.f32 %v7124_v33, %v3343_v61 }
 0x59e   : > { %v3506_v10 = vpop.f32.mrf.mxu0 }
 0x59f   : > { %v3553_v16 = vadd.f32 %v3506_v10, %v3348_v56  ;;  %v7153_v41 = vadd.f32 %v7110_v26, %v3554_v12  ;;  %v5399_v57 = vmul.f32 -1.442695, %v7141_v51  ;;  %v5398_v10 = vmul.f32 -1.442695, %v7162_v55 }
 0x5a0   : > { %v5805_v60 = vpop.f32.mrf.mxu0  ;;  %v7179_v24 = vadd.f32 %v7110_v26, %v3552_v17 }
 0x5a1   : > { %v7131_v15 = vadd.f32 %v7110_v26, %v3553_v16  ;;  %v3556_v27 = vadd.f32 %v5805_v60, %v3363_v7  ;;  %v5402_v63 = vmul.f32 -1.442695, %v7153_v41  ;;  %v3383_v16 = vadd.f32 %v5785_v38, %v7103_v32 }
 0x5a2   : > { %v6027_v6 = vpop.eup %6026  ;;  %v3516_v2 = vpop.f32.mrf.mxu0  ;;  %v5400_v54 = vmul.f32 -1.442695, %v7179_v24 }
 0x5a3   : > { %v3798_v36 = vadd.f32 1.0, %v6027_v6  ;;  %v5401_v25 = vmul.f32 -1.442695, %v7131_v15  ;;  %v3555_v49 = vadd.f32 %v3516_v2, %v3358_v62  ;;  %v7138_v22 = vadd.f32 %v7110_v26, %v3556_v27 }
 0x5a4   : > { %v6029_v20 = vpop.eup %6028  ;;  %v5808_v13 = vpop.f32.mrf.mxu0 }
 0x5a5   : > { %6034 = vrcp.f32 %v3798_v36  ;;  %v3801_v37 = vadd.f32 1.0, %v6029_v20  ;;  %v7144_v42 = vadd.f32 %v7110_v26, %v3555_v49  ;;  %v5404_v40 = vmul.f32 -1.442695, %v7138_v22 }
 0x5a6   : > { %v6031_v0 = vpop.eup %6030  ;;  %6036 = vpow2.f32 %v5401_v25  ;;  %v3526_v44 = vpop.f32.mrf.mxu0  ;;  %v3558_v45 = vadd.f32 %v5808_v13, %v3373_v19 }
 0x5a7   : > { %6038 = vrcp.f32 %v3801_v37  ;;  %v3800_v48 = vadd.f32 1.0, %v6031_v0  ;;  %v5403_v14 = vmul.f32 -1.442695, %v7144_v42  ;;  %v3557_v47 = vadd.f32 %v3526_v44, %v3368_v39 }
 0x5a8   : > { %6040 = vpow2.f32 %v5404_v40  ;;  %v5811_v52 = vpop.f32.mrf.mxu0  ;;  %v7173_v9 = vadd.f32 %v7110_v26, %v3558_v45 }
 0x5a9   : > { %6042 = vrcp.f32 %v3800_v48  ;;  %v7159_v21 = vadd.f32 %v7110_v26, %v3557_v47  ;;  %v3560_v29 = vadd.f32 %v5811_v52, %v3383_v16 }
 0x5aa   : > { %6044 = vpow2.f32 %v5403_v14  ;;  %v3536_v18 = vpop.f32.mrf.mxu0  ;;  %v6033_v8 = vpop.eup %6032  ;;  %v5406_v7 = vmul.f32 -1.442695, %v7173_v9 }
 0x5ab   : > { %6046 = vpow2.f32 %v5394_v46  ;;  %v3559_v30 = vadd.f32 %v3536_v18, %v3378_v28  ;;  %v5405_v43 = vmul.f32 -1.442695, %v7159_v21  ;;  %v3802_v4 = vadd.f32 1.0, %v6033_v8 }
 0x5ac   : > { %6048 = vpow2.f32 %v5399_v57  ;;  %v7187_v36 = vadd.f32 %v7110_v26, %v3560_v29  ;;  %v7210_v29 = vld [vmem:[%s7621_s11] ss:$0 sm:$0xff] }
 0x5ad   : > { %v7169_v59 = vadd.f32 %v7110_v26, %v3559_v30  ;;  %6050 = vpow2.f32 %v5405_v43 }
 0x5ae   : > { %6052 = vpow2.f32 %v5402_v63  ;;  %v5408_v12 = vmul.f32 -1.442695, %v7187_v36 }
 0x5af   : > { %v5407_v56 = vmul.f32 -1.442695, %v7169_v59 }
 0x5b1   : > { %6054 = vpow2.f32 %v5407_v56 }
 0x5b2   : > { %v6035_v58 = vpop.eup %6034  ;;  %6056 = vpow2.f32 %v5398_v10  ;;  %v5816_v10 = vpop.f32.mrf.mxu1 }
 0x5b3   : > { %v6037_v23 = vpop.eup %6036  ;;  %3862 = vrot.lane.b32.xlu1 %v6035_v58, %s6135_s2 }
 0x5b4   : > { %v6039_v33 = vpop.eup %6038  ;;  %v3806_v1 = vadd.f32 1.0, %v6037_v23  ;;  %v3655_v8 = vpop.f32.mrf.mxu1 }
 0x5b5   : > { %v6041_v60 = vpop.eup %6040  ;;  %3868 = vrot.lane.b32.xlu0 %v6039_v33, %s6135_s2 }
 0x5b6   : > { %v6043_v62 = vpop.eup %6042  ;;  %6058 = vrcp.f32 %v3806_v1  ;;  %v3809_v32 = vadd.f32 1.0, %v6041_v60  ;;  %v5819_v58 = vpop.f32.mrf.mxu1 }
 0x5b7   : > { %v6045_v6 = vpop.eup %6044  ;;  %6060 = vpow2.f32 %v5406_v7  ;;  %3866 = vrot.lane.b32.xlu1 %v6043_v62, %s6135_s2  ;;  %v3671_v60 = vadd.f32 %v5819_v58, %v7210_v29 }
 0x5b8   : > { %v6047_v27 = vpop.eup %6046  ;;  %6062 = vrcp.f32 %v3809_v32  ;;  %v3808_v2 = vadd.f32 1.0, %v6045_v6  ;;  %v3665_v16 = vpop.f32.mrf.mxu1  ;;  %v3656_v32 = vadd.f32 %v7210_v29, %v3655_v8 }
 0x5b9   : > { %v6049_v25 = vpop.eup %6048  ;;  %6064 = vrcp.f32 %v3802_v4  ;;  %v3799_v20 = vadd.f32 1.0, %v6047_v27  ;;  %v3666_v6 = vadd.f32 %v7210_v29, %v3665_v16 }
 0x5ba   : > { %v6051_v49 = vpop.eup %6050  ;;  %6066 = vpow2.f32 %v5400_v54  ;;  %v3804_v37 = vadd.f32 1.0, %v6049_v25  ;;  %v7203_v23 = vpop.f32.mrf.mxu1  ;;  %v3737_v54 = vadd.f32 %v3671_v60, %v7117_v53  ;;  %v3734_v25 = vadd.f32 %v3656_v32, %v7113_v31 }
 0x5bb   : > { %6068 = vrcp.f32 %v3808_v2  ;;  %v3810_v38 = vadd.f32 1.0, %v6051_v49  ;;  %v6053_v13 = vpop.eup %6052 }
 0x5bc   : > { %v3807_v50 = vadd.f32 1.0, %v6053_v13  ;;  %v3675_v7 = vpop.f32.mrf.mxu1 }
 0x5bd   : > { %6070 = vrcp.f32 %v3810_v38 }
 0x5be   : > { %v6055_v0 = vpop.eup %6054  ;;  %6072 = vrcp.f32 %v3799_v20  ;;  %v7205_v33 = vpop.f32.mrf.mxu1  ;;  %v3736_v20 = vadd.f32 %v3666_v6, %v7121_v5 }
 0x5bf   : > { %6074 = vpow2.f32 %v5408_v12  ;;  %v6057_v39 = vpop.eup %6056  ;;  %v3812_v26 = vadd.f32 1.0, %v6055_v0 }
 0x5c0   : > { %6076 = vrcp.f32 %v3804_v37  ;;  %v3803_v46 = vadd.f32 1.0, %v6057_v39  ;;  %v3685_v1 = vpop.f32.mrf.mxu1 }
 0x5c1   : > { %6078 = vrcp.f32 %v3807_v50  ;;  %v3686_v8 = vadd.f32 %v7210_v29, %v3685_v1 }
 0x5c2   : > { %6080 = vrcp.f32 %v3812_v26  ;;  %v5828_v62 = vpop.f32.mrf.mxu1 }
 0x5c3   : > { %v6059_v40 = vpop.eup %6058  ;;  %6082 = vrcp.f32 %v3803_v46  ;;  %v3676_v46 = vadd.f32 %v7210_v29, %v3675_v7  ;;  %v3701_v60 = vadd.f32 %v5828_v62, %v7210_v29  ;;  %v3681_v62 = vadd.f32 %v7203_v23, %v7210_v29 }
 0x5c4   : > { %v6061_v44 = vpop.eup %6060  ;;  %3878 = vrot.lane.b32.xlu0 %v6059_v40, %s6135_s2  ;;  %v3695_v2 = vpop.f32.mrf.mxu1 }
 0x5c5   : > { %v6063_v48 = vpop.eup %6062  ;;  %v3811_v34 = vadd.f32 1.0, %v6061_v44  ;;  %v3696_v5 = vadd.f32 %v7210_v29, %v3695_v2 }
 0x5c6   : > { %3884 = vrot.lane.b32.xlu1 %v6063_v48, %s6135_s2  ;;  %v6065_v14 = vpop.eup %6064  ;;  %v5831_v0 = vpop.f32.mrf.mxu1 }
 0x5c7   : > { %v6067_v35 = vpop.eup %6066  ;;  %6084 = vrcp.f32 %v3811_v34  ;;  %v3711_v26 = vadd.f32 %v5831_v0, %v7210_v29  ;;  %v3742_v40 = vadd.f32 %v3696_v5, %v7131_v15 }
 0x5c8   : > { %3870 = vrot.lane.b32.xlu0 %v6065_v14, %s6135_s2  ;;  %v6069_v47 = vpop.eup %6068  ;;  %v3805_v28 = vadd.f32 1.0, %v6067_v35  ;;  %v3705_v50 = vpop.f32.mrf.mxu1 }
 0x5c9   : > { %v3745_v14 = vadd.f32 %v3711_v26, %v7138_v22 }
 0x5ca   : > { %3882 = vrot.lane.b32.xlu1 %v6069_v47, %s6135_s2  ;;  %v6071_v52 = vpop.eup %6070  ;;  %6086 = vrcp.f32 %v3805_v28  ;;  %v5834_v39 = vpop.f32.mrf.mxu1  ;;  %v3706_v47 = vadd.f32 %v7210_v29, %v3705_v50 }
 0x5cb   : > { %v6073_v19 = vpop.eup %6072  ;;  %v3721_v23 = vadd.f32 %v5834_v39, %v7210_v29 }
 0x5cc   : > { %3886 = vrot.lane.b32.xlu0 %v6071_v52, %s6135_s2  ;;  %v6075_v57 = vpop.eup %6074  ;;  %v3715_v35 = vpop.f32.mrf.mxu1 }
 0x5cd   : > { %v6077_v18 = vpop.eup %6076  ;;  %v3813_v45 = vadd.f32 1.0, %v6075_v57  ;;  %v3716_v15 = vadd.f32 %v7210_v29, %v3715_v35 }
 0x5ce   : > { %3864 = vrot.lane.b32.xlu1 %v6073_v19, %s6135_s2  ;;  %v6079_v30 = vpop.eup %6078  ;;  %v3738_v19 = vadd.f32 %v3676_v46, %v7127_v3 }
 0x5cf   : > { %v6081_v63 = vpop.eup %6080  ;;  %6088 = vrcp.f32 %v3813_v45  ;;  %v3744_v45 = vadd.f32 %v3706_v47, %v7144_v42 }
 0x5d0   : > { %3874 = vrot.lane.b32.xlu0 %v6077_v18, %s6135_s2  ;;  %v6083_v43 = vpop.eup %6082 }
 0x5d2   : > { %3880 = vrot.lane.b32.xlu1 %v6079_v30, %s6135_s2  ;;  %v5837_v30 = vpop.f32.mrf.mxu1 }
 0x5d4   : > { %3890 = vrot.lane.b32.xlu0 %v6081_v63, %s6135_s2  ;;  %v6085_v61 = vpop.eup %6084  ;;  %v3725_v7 = vpop.f32.mrf.mxu1 }
 0x5d5   : > { %v3726_v6 = vadd.f32 %v7210_v29, %v3725_v7 }
 0x5d6   : > { %3872 = vrot.lane.b32.xlu1 %v6083_v43, %s6135_s2  ;;  %v3661_v43 = vadd.f32 %v5816_v10, %v7210_v29 }
 0x5d7   : > { %v6087_v17 = vpop.eup %6086 }
 0x5d8   : > { %v3735_v58 = vadd.f32 %v3661_v43, %v7134_v11 }
 0x5da   : > { %3888 = vrot.lane.b32.xlu1 %v6085_v61, %s6135_s2  ;;  %v3746_v61 = vadd.f32 %v3716_v15, %v7159_v21 }
 0x5dc   : > { %v6089_v56 = vpop.eup %6088 }
 0x5de   : > { %3876 = vrot.lane.b32.xlu1 %v6087_v17, %s6135_s2 }
 0x5e2   : > { %3892 = vrot.lane.b32.xlu1 %v6089_v56, %s6135_s2 }
 0x625   : > { %v3863_v4 = vpop.permute.xlu1 %3862 }
 0x626   : > { %v7220_v12 = vmul.f32 %v3863_v4, %v3734_v25  ;;  %v3740_v4 = vadd.f32 %v3686_v8, %v7141_v51 }
 0x627   : > { %v3869_v27 = vpop.permute.xlu0 %3868 }
 0x628   : > { %v7217_v49 = vmul.f32 %v3869_v27, %v3737_v54  ;;  %v3930_v31 = vsel %vm1531_vm0, %v7220_v12, 0.0  ;;  %v3743_v54 = vadd.f32 %v3701_v60, %v7153_v41  ;;  %v3739_v41 = vadd.f32 %v3681_v62, %v7162_v55 }
 0x629   : > { %v3867_v38 = vpop.permute.xlu1 %3866  ;;  %v3691_v55 = vadd.f32 %v7205_v33, %v7210_v29 }
 0x62a   : > { %v7222_v13 = vmul.f32 %v3867_v38, %v3736_v20  ;;  %v3939_v37 = vsel %vm1531_vm0, %v7217_v49, 0.0  ;;  %v3748_v20 = vadd.f32 %v3726_v6, %v7169_v59  ;;  %v3747_v59 = vadd.f32 %v3721_v23, %v7173_v9 }
 0x62b   : > { %3940 = vadd.xlane.f32.xlu1 %v3939_v37  ;;  %v3741_v39 = vadd.f32 %v3691_v55, %v7179_v24 }
 0x62c   : > { %v3936_v53 = vsel %vm1531_vm0, %v7222_v13, 0.0 }
 0x62d   : > { %3937 = vadd.xlane.f32.xlu0 %v3936_v53 }
 0x62f   : > { %3931 = vadd.xlane.f32.xlu1 %v3930_v31 }
 0x636   : > { %v3879_v44 = vpop.permute.xlu0 %3878 }
 0x637   : > { %v7234_v48 = vmul.f32 %v3879_v44, %v3742_v40 }
 0x638   : > { %v3885_v34 = vpop.permute.xlu1 %3884 }
 0x639   : > { %v7238_v52 = vmul.f32 %v3885_v34, %v3745_v14  ;;  %v3954_v28 = vsel %vm1531_vm0, %v7234_v48, 0.0  ;;  %v3731_v14 = vadd.f32 %v5837_v30, %v7210_v29 }
 0x63a   : > { %v3871_v57 = vpop.permute.xlu0 %3870  ;;  %3955 = vadd.xlane.f32.xlu1 %v3954_v28 }
 0x63b   : > { %v7244_v18 = vmul.f32 %v3871_v57, %v3738_v19  ;;  %v3963_v22 = vsel %vm1531_vm0, %v7238_v52, 0.0  ;;  %v3749_v35 = vadd.f32 %v3731_v14, %v7187_v36 }
 0x63c   : > { %v3883_v63 = vpop.permute.xlu1 %3882  ;;  %3964 = vadd.xlane.f32.xlu0 %v3963_v22 }
 0x63d   : > { %v7250_v3 = vmul.f32 %v3883_v63, %v3744_v45  ;;  %v3942_v17 = vsel %vm1531_vm0, %v7244_v18, 0.0 }
 0x63e   : > { %v3887_v56 = vpop.permute.xlu0 %3886  ;;  %3943 = vadd.xlane.f32.xlu1 %v3942_v17 }
 0x63f   : > { %v7256_v42 = vmul.f32 %v3887_v56, %v3746_v61  ;;  %v3960_v16 = vsel %vm1531_vm0, %v7250_v3, 0.0 }
 0x640   : > { %v3865_v10 = vpop.permute.xlu1 %3864  ;;  %3961 = vadd.xlane.f32.xlu0 %v3960_v16 }
 0x641   : > { %v7262_v21 = vmul.f32 %v3865_v10, %v3735_v58  ;;  %v3966_v32 = vsel %vm1531_vm0, %v7256_v42, 0.0 }
 0x642   : > { %v3875_v1 = vpop.permute.xlu0 %3874  ;;  %3967 = vadd.xlane.f32.xlu1 %v3966_v32 }
 0x643   : > { %v7268_v11 = vmul.f32 %v3875_v1, %v3740_v4  ;;  %v3933_v27 = vsel %vm1531_vm0, %v7262_v21, 0.0 }
 0x644   : > { %v3881_v2 = vpop.permute.xlu1 %3880  ;;  %3934 = vadd.xlane.f32.xlu0 %v3933_v27 }
 0x645   : > { %v7275_v51 = vmul.f32 %v3881_v2, %v3743_v54  ;;  %v3948_v25 = vsel %vm1531_vm0, %v7268_v11, 0.0 }
 0x646   : > { %3949 = vadd.xlane.f32.xlu1 %v3948_v25  ;;  %v3891_v38 = vpop.permute.xlu0 %3890 }
 0x647   : > { %v7280_v37 = vmul.f32 %v3891_v38, %v3748_v20  ;;  %v3957_v0 = vsel %vm1531_vm0, %v7275_v51, 0.0 }
 0x648   : > { %v3873_v53 = vpop.permute.xlu1 %3872  ;;  %3958 = vadd.xlane.f32.xlu0 %v3957_v0 }
 0x649   : > { %v7286_v31 = vmul.f32 %v3873_v53, %v3739_v41  ;;  %v3972_v50 = vsel %vm1531_vm0, %v7280_v37, 0.0 }
 0x64a   : > { %3973 = vadd.xlane.f32.xlu1 %v3972_v50 }
 0x64b   : > { %v3945_v5 = vsel %vm1531_vm0, %v7286_v31, 0.0 }
 0x64c   : > { %v3889_v26 = vpop.permute.xlu1 %3888  ;;  %3946 = vadd.xlane.f32.xlu0 %v3945_v5 }
 0x64d   : > { %v7295_v40 = vmul.f32 %v3889_v26, %v3747_v59 }
 0x64f   : > { %v3969_v44 = vsel %vm1531_vm0, %v7295_v40, 0.0 }
 0x650   : > { %v3877_v46 = vpop.permute.xlu1 %3876  ;;  %3970 = vadd.xlane.f32.xlu0 %v3969_v44 }
 0x651   : > { %v7301_v9 = vmul.f32 %v3877_v46, %v3741_v39 }
 0x653   : > { %v3951_v34 = vsel %vm1531_vm0, %v7301_v9, 0.0 }
 0x654   : > { %v3893_v47 = vpop.permute.xlu1 %3892  ;;  %3952 = vadd.xlane.f32.xlu0 %v3951_v34 }
 0x655   : > { %v7306_v33 = vmul.f32 %v3893_v47, %v3749_v35 }
 0x657   : > { %v3975_v24 = vsel %vm1531_vm0, %v7306_v33, 0.0 }
 0x658   : > { %3976 = vadd.xlane.f32.xlu0 %v3975_v24 }
 0x6b4   : > { %v3941_v19 = vpop.xlane.xlu1 %3940 }
 0x6b5   : > { %v3982_v57 = vmul.f32 0.0625, %v3941_v19 }
 0x6b6   : > { %v3938_v28 = vpop.xlane.xlu0 %3937 }
 0x6b7   : > { %v3981_v15 = vmul.f32 0.0625, %v3938_v28 }
 0x6b8   : > { %v3932_v36 = vpop.xlane.xlu1 %3931 }
 0x6b9   : > { %v4002_v29 = vadd.f32 %v3982_v57, %v3981_v15 }
 0x6bb   : > { %v4003_v45 = vrot.slane %v4002_v29, 4 }
 0x6bd   : > { %v4004_v22 = vadd.f32 %v4003_v45, %v4002_v29 }
 0x6bf   : > { %v4005_v30 = vrot.slane %v4004_v22, 2 }
 0x6c1   : > { %v4006_v63 = vadd.f32 %v4005_v30, %v4004_v22 }
 0x6c3   : > { %v4007_v43 = vrot.slane %v4006_v63, 1  ;;  %v3956_v61 = vpop.xlane.xlu1 %3955 }
 0x6c4   : > { %v3987_v0 = vmul.f32 0.0625, %v3956_v61 }
 0x6c5   : > { %v3965_v17 = vpop.xlane.xlu0 %3964  ;;  %v4008_v56 = vadd.f32 %v4007_v43, %v4006_v63 }
 0x6c6   : > { %v3990_v10 = vmul.f32 0.0625, %v3965_v17 }
 0x6c7   : > { %v4052_v8 = vmul.f32 0.0625, %v4008_v56  ;;  %v3944_v60 = vpop.xlane.xlu1 %3943 }
 0x6c8   : > { %v3983_v55 = vmul.f32 0.0625, %v3944_v60 }
 0x6c9   : > { %v3962_v58 = vpop.xlane.xlu0 %3961  ;;  %v7311_v16 = vsub.f32 %v7217_v49, %v4052_v8  ;;  %v7314_v7 = vsub.f32 %v7222_v13, %v4052_v8  ;;  %v3979_v49 = vmul.f32 0.0625, %v3932_v36 }
 0x6ca   : > { %v3989_v4 = vmul.f32 0.0625, %v3962_v58 }
 0x6cb   : > { %v4078_v32 = vmul.f32 %v7311_v16, %v7311_v16  ;;  %v4077_v1 = vmul.f32 %v7314_v7, %v7314_v7  ;;  %v3968_v20 = vpop.xlane.xlu1 %3967 }
 0x6cc   : > { %v4030_v6 = vadd.f32 %v3990_v10, %v3989_v4  ;;  %v3991_v57 = vmul.f32 0.0625, %v3968_v20 }
 0x6cd   : > { %v3935_v54 = vpop.xlane.xlu0 %3934  ;;  %v4100_v27 = vsel %vm1531_vm0, %v4078_v32, 0.0  ;;  %v4097_v2 = vsel %vm1531_vm0, %v4077_v1, 0.0 }
 0x6ce   : > { %v4031_v62 = vrot.slane %v4030_v6, 4  ;;  %v3980_v25 = vmul.f32 0.0625, %v3935_v54  ;;  %4101 = vadd.xlane.f32.xlu0 %v4100_v27  ;;  %4098 = vadd.xlane.f32.xlu1 %v4097_v2 }
 0x6cf   : > { %v3950_v14 = vpop.xlane.xlu1 %3949 }
 0x6d0   : > { %v4032_v13 = vadd.f32 %v4031_v62, %v4030_v6  ;;  %v3995_v38 = vadd.f32 %v3980_v25, %v3979_v49  ;;  %v3985_v8 = vmul.f32 0.0625, %v3950_v14 }
 0x6d1   : > { %v3959_v41 = vpop.xlane.xlu0 %3958 }
 0x6d2   : > { %v4033_v53 = vrot.slane %v4032_v13, 2  ;;  %v3996_v23 = vrot.slane %v3995_v38, 4  ;;  %v3988_v50 = vmul.f32 0.0625, %v3959_v41 }
 0x6d3   : > { %v3974_v43 = vpop.xlane.xlu1 %3973 }
 0x6d4   : > { %v4034_v59 = vadd.f32 %v4033_v53, %v4032_v13  ;;  %v3997_v5 = vadd.f32 %v3996_v23, %v3995_v38  ;;  %v4023_v26 = vadd.f32 %v3988_v50, %v3987_v0  ;;  %v3993_v54 = vmul.f32 0.0625, %v3974_v43 }
 0x6d5   : > { %v3947_v39 = vpop.xlane.xlu0 %3946 }
 0x6d6   : > { %v4035_v44 = vrot.slane %v4034_v59, 1  ;;  %v3998_v46 = vrot.slane %v3997_v5, 2  ;;  %v4024_v35 = vrot.slane %v4023_v26, 4  ;;  %v3984_v34 = vmul.f32 0.0625, %v3947_v39 }
 0x6d8   : > { %v3999_v47 = vadd.f32 %v3998_v46, %v3997_v5  ;;  %v4025_v24 = vadd.f32 %v4024_v35, %v4023_v26  ;;  %v4009_v19 = vadd.f32 %v3984_v34, %v3983_v55  ;;  %v4036_v28 = vadd.f32 %v4035_v44, %v4034_v59 }
 0x6d9   : > { %v3971_v15 = vpop.xlane.xlu0 %3970 }
 0x6da   : > { %v4000_v29 = vrot.slane %v3999_v47, 1  ;;  %v4026_v45 = vrot.slane %v4025_v24, 2  ;;  %v4010_v22 = vrot.slane %v4009_v19, 4  ;;  %v3992_v30 = vmul.f32 0.0625, %v3971_v15 }
 0x6db   : > { %v4056_v36 = vmul.f32 0.0625, %v4036_v28 }
 0x6dc   : > { %v4027_v63 = vadd.f32 %v4026_v45, %v4025_v24  ;;  %v4011_v61 = vadd.f32 %v4010_v22, %v4009_v19  ;;  %v4037_v17 = vadd.f32 %v3992_v30, %v3991_v57  ;;  %v4001_v56 = vadd.f32 %v4000_v29, %v3999_v47 }
 0x6dd   : > { %v3953_v58 = vpop.xlane.xlu0 %3952  ;;  %v7323_v10 = vsub.f32 %v7238_v52, %v4056_v36  ;;  %v7326_v60 = vsub.f32 %v7250_v3, %v4056_v36 }
 0x6de   : > { %v4028_v4 = vrot.slane %v4027_v63, 1  ;;  %v4012_v32 = vrot.slane %v4011_v61, 2  ;;  %v4038_v1 = vrot.slane %v4037_v17, 4  ;;  %v3986_v6 = vmul.f32 0.0625, %v3953_v58 }
 0x6df   : > { %v4086_v27 = vmul.f32 %v7323_v10, %v7323_v10  ;;  %v4085_v2 = vmul.f32 %v7326_v60, %v7326_v60  ;;  %v4051_v49 = vmul.f32 0.0625, %v4001_v56 }
 0x6e0   : > { %v4013_v62 = vadd.f32 %v4012_v32, %v4011_v61  ;;  %v4039_v25 = vadd.f32 %v4038_v1, %v4037_v17  ;;  %v4016_v13 = vadd.f32 %v3986_v6, %v3985_v8  ;;  %v4029_v52 = vadd.f32 %v4028_v4, %v4027_v63 }
 0x6e1   : > { %v4124_v20 = vsel %vm1531_vm0, %v4086_v27, 0.0  ;;  %v3977_v3 = vpop.xlane.xlu0 %3976  ;;  %v4121_v38 = vsel %vm1531_vm0, %v4085_v2, 0.0  ;;  %v7335_v41 = vsub.f32 %v7262_v21, %v4051_v49  ;;  %v7338_v0 = vsub.f32 %v7220_v12, %v4051_v49 }
 0x6e2   : > { %v4014_v53 = vrot.slane %v4013_v62, 1  ;;  %v4040_v23 = vrot.slane %v4039_v25, 2  ;;  %v4017_v50 = vrot.slane %v4016_v13, 4  ;;  %4125 = vadd.xlane.f32.xlu0 %v4124_v20  ;;  %v3994_v59 = vmul.f32 0.0625, %v3977_v3  ;;  %4122 = vadd.xlane.f32.xlu1 %v4121_v38 }
 0x6e3   : > { %v4076_v5 = vmul.f32 %v7335_v41, %v7335_v41  ;;  %v4075_v26 = vmul.f32 %v7338_v0, %v7338_v0  ;;  %v4055_v55 = vmul.f32 0.0625, %v4029_v52 }
 0x6e4   : > { %v4041_v39 = vadd.f32 %v4040_v23, %v4039_v25  ;;  %v4018_v44 = vadd.f32 %v4017_v50, %v4016_v13  ;;  %v4044_v21 = vadd.f32 %v3994_v59, %v3993_v54  ;;  %v4015_v46 = vadd.f32 %v4014_v53, %v4013_v62  ;;  %v7415_v59 = vld [vmem:[%s7628_s18 + $0x8] sm:$0xff] }
 0x6e5   : > { %v4094_v12 = vsel %vm1531_vm0, %v4076_v5, 0.0  ;;  %v4091_v14 = vsel %vm1531_vm0, %v4075_v26, 0.0  ;;  %v7347_v35 = vsub.f32 %v7275_v51, %v4055_v55  ;;  %v7350_v34 = vsub.f32 %v7234_v48, %v4055_v55  ;;  %v4285_v5 = vld [vmem:[%s7626_s16 + $0x8] sm:$0xff]  ;;  %v4284_v26 = vld [vmem:[%s7626_s16] sm:$0xff] }
 0x6e6   : > { %v4042_v47 = vrot.slane %v4041_v39, 1  ;;  %v4019_v24 = vrot.slane %v4018_v44, 2  ;;  %v4045_v19 = vrot.slane %v4044_v21, 4  ;;  %4095 = vadd.xlane.f32.xlu0 %v4094_v12  ;;  %4092 = vadd.xlane.f32.xlu1 %v4091_v14  ;;  %v4053_v28 = vmul.f32 0.0625, %v4015_v46 }
 0x6e7   : > { %v4084_v57 = vmul.f32 %v7347_v35, %v7347_v35  ;;  %v4083_v15 = vmul.f32 %v7350_v34, %v7350_v34  ;;  %5878 = vmatprep.subr.mxu1 %v4285_v5 }
 0x6e8   : > { %v4020_v29 = vadd.f32 %v4019_v24, %v4018_v44  ;;  %v4046_v45 = vadd.f32 %v4045_v19, %v4044_v21  ;;  %v7357_v51 = vsub.f32 %v7286_v31, %v4053_v28  ;;  %v7360_v48 = vsub.f32 %v7244_v18, %v4053_v28  ;;  %5879 = vmatpush3.msra.mxu1 %v4285_v5  ;;  %v7427_v5 = vld [vmem:[%s7624_s14] sm:$0xff] }
 0x6e9   : > { %v4118_v22 = vsel %vm1531_vm0, %v4084_v57, 0.0  ;;  %v4115_v30 = vsel %vm1531_vm0, %v4083_v15, 0.0  ;;  %v4043_v36 = vadd.f32 %v4042_v47, %v4041_v39  ;;  %5880 = vmatprep.subr.mxu1 %v4284_v26 }
 0x6ea   : > { %v4021_v63 = vrot.slane %v4020_v29, 1  ;;  %v4047_v43 = vrot.slane %v4046_v45, 2  ;;  %4119 = vadd.xlane.f32.xlu0 %v4118_v22  ;;  %4116 = vadd.xlane.f32.xlu1 %v4115_v30  ;;  %v4080_v61 = vmul.f32 %v7357_v51, %v7357_v51  ;;  %v4079_v17 = vmul.f32 %v7360_v48, %v7360_v48 }
 0x6eb   : > { %v4057_v31 = vmul.f32 0.0625, %v4043_v36  ;;  %5881 = vmatpush3.msra.mxu1 %v4284_v26 }
 0x6ec   : > { %v4048_v56 = vadd.f32 %v4047_v43, %v4046_v45  ;;  %v4106_v18 = vsel %vm1531_vm0, %v4080_v61, 0.0  ;;  %v4103_v8 = vsel %vm1531_vm0, %v4079_v17, 0.0  ;;  %v4022_v58 = vadd.f32 %v4021_v63, %v4020_v29 }
 0x6ed   : > { %v7371_v4 = vsub.f32 %v7295_v40, %v4057_v31  ;;  %v7374_v32 = vsub.f32 %v7256_v42, %v4057_v31 }
 0x6ee   : > { %v4049_v1 = vrot.slane %v4048_v56, 1  ;;  %4107 = vadd.xlane.f32.xlu0 %v4106_v18  ;;  %4104 = vadd.xlane.f32.xlu1 %v4103_v8  ;;  %v4054_v6 = vmul.f32 0.0625, %v4022_v58 }
 0x6ef   : > { %v4088_v54 = vmul.f32 %v7371_v4, %v7371_v4  ;;  %v4087_v27 = vmul.f32 %v7374_v32, %v7374_v32 }
 0x6f0   : > { %v7381_v2 = vsub.f32 %v7301_v9, %v4054_v6  ;;  %v7384_v49 = vsub.f32 %v7268_v11, %v4054_v6  ;;  %v4050_v40 = vadd.f32 %v4049_v1, %v4048_v56 }
 0x6f1   : > { %v4130_v42 = vsel %vm1531_vm0, %v4088_v54, 0.0  ;;  %v4127_v62 = vsel %vm1531_vm0, %v4087_v27, 0.0 }
 0x6f2   : > { %4131 = vadd.xlane.f32.xlu0 %v4130_v42  ;;  %4128 = vadd.xlane.f32.xlu1 %v4127_v62  ;;  %v4082_v25 = vmul.f32 %v7381_v2, %v7381_v2  ;;  %v4081_v13 = vmul.f32 %v7384_v49, %v7384_v49  ;;  %v4058_v52 = vmul.f32 0.0625, %v4050_v40 }
 0x6f4   : > { %v4112_v9 = vsel %vm1531_vm0, %v4082_v25, 0.0  ;;  %v4109_v20 = vsel %vm1531_vm0, %v4081_v13, 0.0  ;;  %v7395_v11 = vsub.f32 %v7306_v33, %v4058_v52  ;;  %v7398_v3 = vsub.f32 %v7280_v37, %v4058_v52  ;;  %v5410_v33 = vld [vmem:[%s7628_s18 + $0x18] sm:$0xff]  ;;  %v5409_v37 = vld [vmem:[%s7628_s18 + $0x10] sm:$0xff] }
 0x6f5   : > { %5838 = vmatprep.subr.mxu0 %v5410_v33 }
 0x6f6   : > { %4113 = vadd.xlane.f32.xlu0 %v4112_v9  ;;  %4110 = vadd.xlane.f32.xlu1 %v4109_v20  ;;  %v4090_v38 = vmul.f32 %v7395_v11, %v7395_v11  ;;  %v4089_v53 = vmul.f32 %v7398_v3, %v7398_v3 }
 0x6f7   : > { %5839 = vmatpush3.msra.mxu0 %v5410_v33 }
 0x6f8   : > { %v4136_v23 = vsel %vm1531_vm0, %v4090_v38, 0.0  ;;  %v4133_v50 = vsel %vm1531_vm0, %v4089_v53, 0.0  ;;  %5840 = vmatprep.subr.mxu0 %v5409_v37 }
 0x6f9   : > { %5841 = vmatpush3.msra.mxu0 %v5409_v37 }
 0x6fa   : > { %4137 = vadd.xlane.f32.xlu0 %v4136_v23  ;;  %4134 = vadd.xlane.f32.xlu1 %v4133_v50 }
 0x6fb   : > { %5848 = vmatprep.subr.mxu0 %v7415_v59 }
 0x757   : > { %v4102_v55 = vpop.xlane.xlu0 %4101  ;;  %v4099_v39 = vpop.xlane.xlu1 %4098 }
 0x758   : > { %v4142_v44 = vmul.f32 0.0625, %v4102_v55  ;;  %v4141_v21 = vmul.f32 0.0625, %v4099_v39  ;;  %v7433_v55 = vld [vmem:[%s7624_s14 + $0x8] sm:$0xff] }
 0x75a   : > { %v4162_v46 = vadd.f32 %v4142_v44, %v4141_v21 }
 0x75c   : > { %v4163_v12 = vrot.slane %v4162_v46, 4 }
 0x75e   : > { %v4164_v14 = vadd.f32 %v4163_v12, %v4162_v46 }
 0x760   : > { %v4165_v47 = vrot.slane %v4164_v14, 2 }
 0x762   : > { %v4166_v24 = vadd.f32 %v4165_v47, %v4164_v14 }
 0x764   : > { %v4167_v19 = vrot.slane %v4166_v24, 1 }
 0x766   : > { %v4168_v28 = vadd.f32 %v4167_v19, %v4166_v24  ;;  %v7439_v19 = vld [vmem:[%s7625_s15] sm:$0xff] }
 0x768   : > { %v4212_v57 = vmul.f32 0.0625, %v4168_v28 }
 0x76a   : > { %v4220_v15 = vadd.f32 1e-05, %v4212_v57 }
 0x76b   : > { %v4126_v29 = vpop.xlane.xlu0 %4125  ;;  %v4123_v45 = vpop.xlane.xlu1 %4122 }
 0x76c   : > { %6090 = vrsqrt.f32 %v4220_v15  ;;  %v4150_v22 = vmul.f32 0.0625, %v4126_v29  ;;  %v4149_v30 = vmul.f32 0.0625, %v4123_v45 }
 0x76e   : > { %v4190_v36 = vadd.f32 %v4150_v22, %v4149_v30 }
 0x76f   : > { %v4096_v63 = vpop.xlane.xlu0 %4095  ;;  %v4093_v43 = vpop.xlane.xlu1 %4092 }
 0x770   : > { %v4191_v61 = vrot.slane %v4190_v36, 4  ;;  %v4140_v17 = vmul.f32 0.0625, %v4096_v63  ;;  %v4139_v31 = vmul.f32 0.0625, %v4093_v43 }
 0x772   : > { %v4192_v56 = vadd.f32 %v4191_v61, %v4190_v36  ;;  %v4155_v18 = vadd.f32 %v4140_v17, %v4139_v31 }
 0x773   : > { %v4120_v8 = vpop.xlane.xlu0 %4119  ;;  %v4117_v58 = vpop.xlane.xlu1 %4116 }
 0x774   : > { %v4193_v1 = vrot.slane %v4192_v56, 2  ;;  %v4156_v6 = vrot.slane %v4155_v18, 4  ;;  %v4148_v54 = vmul.f32 0.0625, %v4120_v8  ;;  %v4147_v27 = vmul.f32 0.0625, %v4117_v58 }
 0x776   : > { %v4194_v40 = vadd.f32 %v4193_v1, %v4192_v56  ;;  %v4157_v42 = vadd.f32 %v4156_v6, %v4155_v18  ;;  %v4183_v62 = vadd.f32 %v4148_v54, %v4147_v27  ;;  %v4287_v6 = vld [vmem:[%s7628_s18] sm:$0xff] }
 0x777   : > { %v4108_v25 = vpop.xlane.xlu0 %4107  ;;  %v4105_v13 = vpop.xlane.xlu1 %4104 }
 0x778   : > { %v4195_v52 = vrot.slane %v4194_v40, 1  ;;  %v4158_v9 = vrot.slane %v4157_v42, 2  ;;  %v4184_v20 = vrot.slane %v4183_v62, 4  ;;  %v4144_v38 = vmul.f32 0.0625, %v4108_v25 }
 0x779   : > { %v6091_v53 = vpop.eup %6090  ;;  %v4143_v23 = vmul.f32 0.0625, %v4105_v13 }
 0x77a   : > { %v4196_v50 = vadd.f32 %v4195_v52, %v4194_v40  ;;  %v4159_v33 = vadd.f32 %v4158_v9, %v4157_v42  ;;  %v4185_v37 = vadd.f32 %v4184_v20, %v4183_v62  ;;  %v4237_v26 = vmul.f32 %v6091_v53, %v7314_v7  ;;  %v7444_v7 = vld [vmem:[%s7625_s15 + $0x8] sm:$0xff] }
 0x77b   : > { %v4169_v39 = vadd.f32 %v4144_v38, %v4143_v23  ;;  %v4132_v44 = vpop.xlane.xlu0 %4131  ;;  %v4129_v21 = vpop.xlane.xlu1 %4128  ;;  %v4238_v46 = vmul.f32 %v6091_v53, %v7311_v16  ;;  %v7459_v52 = vld [vmem:[%s7628_s18 + $0x28] sm:$0xff] }
 0x77c   : > { %v4216_v12 = vmul.f32 0.0625, %v4196_v50  ;;  %v4160_v14 = vrot.slane %v4159_v33, 1  ;;  %v4186_v47 = vrot.slane %v4185_v37, 2  ;;  %v4152_v24 = vmul.f32 0.0625, %v4132_v44 }
 0x77d   : > { %v4170_v28 = vrot.slane %v4169_v39, 4  ;;  %v4151_v57 = vmul.f32 0.0625, %v4129_v21  ;;  %v4253_v15 = vmul.f32 %v4237_v26, %v7427_v5  ;;  %v4254_v16 = vmul.f32 %v4238_v46, %v7433_v55 }
 0x77e   : > { %v4224_v29 = vadd.f32 1e-05, %v4216_v12  ;;  %v4161_v45 = vadd.f32 %v4160_v14, %v4159_v33  ;;  %v4187_v22 = vadd.f32 %v4186_v47, %v4185_v37 }
 0x77f   : > { %v4171_v30 = vadd.f32 %v4170_v28, %v4169_v39  ;;  %v4197_v36 = vadd.f32 %v4152_v24, %v4151_v57  ;;  %v4114_v63 = vpop.xlane.xlu0 %4113  ;;  %v4111_v43 = vpop.xlane.xlu1 %4110  ;;  %v4269_v61 = vadd.f32 %v4253_v15, %v7439_v19  ;;  %v4270_v17 = vadd.f32 %v4254_v16, %v7444_v7 }
 0x780   : > { %6092 = vrsqrt.f32 %v4224_v29  ;;  %v4211_v31 = vmul.f32 0.0625, %v4161_v45  ;;  %v4188_v56 = vrot.slane %v4187_v22, 1  ;;  %v4146_v18 = vmul.f32 0.0625, %v4114_v63 }
 0x781   : > { %v4172_v8 = vrot.slane %v4171_v30, 2  ;;  %v4198_v58 = vrot.slane %v4197_v36, 4  ;;  %v4145_v1 = vmul.f32 0.0625, %v4111_v43  ;;  %5842 = vmatprep.mubr.msk.f32.mxu0 %vm1531_vm0, %v4269_v61 }
 0x782   : > { %v4219_v54 = vadd.f32 1e-05, %v4211_v31  ;;  %v4189_v27 = vadd.f32 %v4188_v56, %v4187_v22  ;;  %5843 = vmatmul.mubr.msk.f32.vlgmr.msra.gmra.mxu0 %vm1531_vm0, %v4270_v17 }
 0x783   : > { %v4173_v40 = vadd.f32 %v4172_v8, %v4171_v30  ;;  %v4199_v42 = vadd.f32 %v4198_v58, %v4197_v36  ;;  %v4176_v62 = vadd.f32 %v4146_v18, %v4145_v1  ;;  %v4138_v25 = vpop.xlane.xlu0 %4137  ;;  %v4135_v13 = vpop.xlane.xlu1 %4134  ;;  %5849 = vmatpush3.msra.mxu0 %v7415_v59 }
 0x784   : > { %6094 = vrsqrt.f32 %v4219_v54  ;;  %v4215_v9 = vmul.f32 0.0625, %v4189_v27  ;;  %v4154_v20 = vmul.f32 0.0625, %v4138_v25  ;;  %v4153_v38 = vmul.f32 0.0625, %v4135_v13  ;;  %5850 = vmatprep.subr.mxu0 %v4287_v6 }
 0x785   : > { %v4174_v53 = vrot.slane %v4173_v40, 1  ;;  %v4200_v23 = vrot.slane %v4199_v42, 2  ;;  %v4177_v50 = vrot.slane %v4176_v62, 4  ;;  %5851 = vmatpush3.msra.mxu0 %v4287_v6 }
 0x786   : > { %v4223_v33 = vadd.f32 1e-05, %v4215_v9  ;;  %v4204_v37 = vadd.f32 %v4154_v20, %v4153_v38  ;;  %5858 = vmatprep.subr.mxu0 %v7459_v52  ;;  %v5419_v9 = vld [vmem:[%s7628_s18 + $0x20] sm:$0xff] }
 0x787   : > { %v4175_v26 = vadd.f32 %v4174_v53, %v4173_v40  ;;  %v4201_v59 = vadd.f32 %v4200_v23, %v4199_v42  ;;  %v4178_v39 = vadd.f32 %v4177_v50, %v4176_v62  ;;  %v5426_v53 = vld [vmem:[%s7628_s18 + $0x38] sm:$0xff] }
 0x788   : > { %6096 = vrsqrt.f32 %v4223_v33  ;;  %v4205_v44 = vrot.slane %v4204_v37, 4 }
 0x789   : > { %v4213_v21 = vmul.f32 0.0625, %v4175_v26  ;;  %v4202_v46 = vrot.slane %v4201_v59, 1  ;;  %v4179_v12 = vrot.slane %v4178_v39, 2 }
 0x78a   : > { %v4206_v14 = vadd.f32 %v4205_v44, %v4204_v37  ;;  %v5425_v44 = vld [vmem:[%s7628_s18 + $0x30] sm:$0xff] }
 0x78b   : > { %v4221_v47 = vadd.f32 1e-05, %v4213_v21  ;;  %v4203_v24 = vadd.f32 %v4202_v46, %v4201_v59  ;;  %v4180_v28 = vadd.f32 %v4179_v12, %v4178_v39 }
 0x78c   : > { %v4207_v57 = vrot.slane %v4206_v14, 2 }
 0x78d   : > { %v6093_v15 = vpop.eup %6092  ;;  %6098 = vrsqrt.f32 %v4221_v47  ;;  %v4217_v16 = vmul.f32 0.0625, %v4203_v24  ;;  %v4181_v29 = vrot.slane %v4180_v28, 1 }
 0x78e   : > { %v4208_v45 = vadd.f32 %v4207_v57, %v4206_v14  ;;  %v4245_v22 = vmul.f32 %v6093_v15, %v7326_v60  ;;  %v4246_v30 = vmul.f32 %v6093_v15, %v7323_v10 }
 0x78f   : > { %v4225_v36 = vadd.f32 1e-05, %v4217_v16  ;;  %v4182_v63 = vadd.f32 %v4181_v29, %v4180_v28 }
 0x790   : > { %v4209_v43 = vrot.slane %v4208_v45, 1  ;;  %v4261_v61 = vmul.f32 %v4245_v22, %v7427_v5  ;;  %v4262_v17 = vmul.f32 %v4246_v30, %v7433_v55 }
 0x791   : > { %v6095_v31 = vpop.eup %6094  ;;  %6100 = vrsqrt.f32 %v4225_v36  ;;  %v4214_v56 = vmul.f32 0.0625, %v4182_v63 }
 0x792   : > { %v4210_v18 = vadd.f32 %v4209_v43, %v4208_v45  ;;  %v4277_v8 = vadd.f32 %v4261_v61, %v7439_v19  ;;  %v4278_v58 = vadd.f32 %v4262_v17, %v7444_v7  ;;  %v4235_v1 = vmul.f32 %v6095_v31, %v7338_v0 }
 0x793   : > { %v4222_v60 = vadd.f32 1e-05, %v4214_v56  ;;  %v4236_v10 = vmul.f32 %v6095_v31, %v7335_v41 }
 0x794   : > { %v4218_v6 = vmul.f32 0.0625, %v4210_v18  ;;  %5845 = vmatprep.mubr.msk.f32.mxu0 %vm1531_vm0, %v4277_v8  ;;  %v4251_v54 = vmul.f32 %v4235_v1, %v7427_v5  ;;  %v5431_v8 = vld [vmem:[%s7629_s19] ss:$0 sm:$0xff] }
 0x795   : > { %v6097_v27 = vpop.eup %6096  ;;  %6102 = vrsqrt.f32 %v4222_v60  ;;  %5846 = vmatmul.mubr.msk.f32.gmra.mxu0 %vm1531_vm0, %v4278_v58  ;;  %v4252_v40 = vmul.f32 %v4236_v10, %v7433_v55 }
 0x796   : > { %v4226_v42 = vadd.f32 1e-05, %v4218_v6  ;;  %v4267_v62 = vadd.f32 %v4251_v54, %v7439_v19  ;;  %v4243_v25 = vmul.f32 %v6097_v27, %v7350_v34  ;;  %v4244_v0 = vmul.f32 %v6097_v27, %v7347_v35 }
 0x797   : > { %v4268_v41 = vadd.f32 %v4252_v40, %v7444_v7 }
 0x798   : > { %6104 = vrsqrt.f32 %v4226_v42  ;;  %5852 = vmatprep.mubr.msk.f32.mxu0 %vm1531_vm0, %v4267_v62  ;;  %v4259_v13 = vmul.f32 %v4243_v25, %v7427_v5  ;;  %v4260_v20 = vmul.f32 %v4244_v0, %v7433_v55 }
 0x799   : > { %5853 = vmatmul.mubr.msk.f32.vlgmr.msra.gmra.mxu0 %vm1531_vm0, %v4268_v41 }
 0x79a   : > { %v6099_v38 = vpop.eup %6098  ;;  %5859 = vmatpush3.msra.mxu0 %v7459_v52  ;;  %v4275_v35 = vadd.f32 %v4259_v13, %v7439_v19  ;;  %v4276_v34 = vadd.f32 %v4260_v20, %v7444_v7 }
 0x79b   : > { %5860 = vmatprep.subr.mxu0 %v5419_v9  ;;  %v4239_v23 = vmul.f32 %v6099_v38, %v7360_v48  ;;  %v4240_v50 = vmul.f32 %v6099_v38, %v7357_v51 }
 0x79c   : > { %5855 = vmatprep.mubr.msk.f32.mxu0 %vm1531_vm0, %v4275_v35  ;;  %5861 = vmatpush3.msra.mxu0 %v5419_v9 }
 0x79d   : > { %5856 = vmatmul.mubr.msk.f32.gmra.mxu0 %vm1531_vm0, %v4276_v34  ;;  %v4255_v52 = vmul.f32 %v4239_v23, %v7427_v5  ;;  %5868 = vmatprep.subr.mxu0 %v5426_v53  ;;  %v4256_v33 = vmul.f32 %v4240_v50, %v7433_v55 }
 0x79e   : > { %v6101_v37 = vpop.eup %6100 }
 0x79f   : > { %v4271_v26 = vadd.f32 %v4255_v52, %v7439_v19  ;;  %v4272_v59 = vadd.f32 %v4256_v33, %v7444_v7  ;;  %v4247_v39 = vmul.f32 %v6101_v37, %v7374_v32  ;;  %v4248_v48 = vmul.f32 %v6101_v37, %v7371_v4 }
 0x7a1   : > { %5862 = vmatprep.mubr.msk.f32.mxu0 %vm1531_vm0, %v4271_v26  ;;  %v4263_v51 = vmul.f32 %v4247_v39, %v7427_v5  ;;  %v4264_v21 = vmul.f32 %v4248_v48, %v7433_v55 }
 0x7a2   : > { %v6103_v46 = vpop.eup %6102  ;;  %5863 = vmatmul.mubr.msk.f32.vlgmr.msra.gmra.mxu0 %vm1531_vm0, %v4272_v59 }
 0x7a3   : > { %5869 = vmatpush3.msra.mxu0 %v5426_v53  ;;  %v4279_v12 = vadd.f32 %v4263_v51, %v7439_v19  ;;  %v4280_v32 = vadd.f32 %v4264_v21, %v7444_v7  ;;  %v4241_v4 = vmul.f32 %v6103_v46, %v7384_v49  ;;  %v4242_v14 = vmul.f32 %v6103_v46, %v7381_v2 }
 0x7a4   : > { %5870 = vmatprep.subr.mxu0 %v5425_v44 }
 0x7a5   : > { %v6105_v47 = vpop.eup %6104  ;;  %5865 = vmatprep.mubr.msk.f32.mxu0 %vm1531_vm0, %v4279_v12  ;;  %5871 = vmatpush3.msra.mxu0 %v5425_v44  ;;  %v4257_v24 = vmul.f32 %v4241_v4, %v7427_v5  ;;  %v4258_v28 = vmul.f32 %v4242_v14, %v7433_v55  ;;  %v5432_v4 = vld [vmem:[%s7627_s17] ss:$0 sm:$0xff] }
 0x7a6   : > { %5866 = vmatmul.mubr.msk.f32.gmra.mxu0 %vm1531_vm0, %v4280_v32  ;;  %v4249_v57 = vmul.f32 %v6105_v47, %v7398_v3  ;;  %v4250_v15 = vmul.f32 %v6105_v47, %v7395_v11 }
 0x7a7   : > { %v4273_v16 = vadd.f32 %v4257_v24, %v7439_v19  ;;  %v4274_v49 = vadd.f32 %v4258_v28, %v7444_v7 }
 0x7a8   : > { %v4265_v2 = vmul.f32 %v4249_v57, %v7427_v5  ;;  %v4266_v29 = vmul.f32 %v4250_v15, %v7433_v55 }
 0x7a9   : > { %5872 = vmatprep.mubr.msk.f32.mxu0 %vm1531_vm0, %v4273_v16  ;;  %5882 = vmatprep.mubr.msk.f32.mxu1 %vm1531_vm0, %v4273_v16 }
 0x7aa   : > { %5873 = vmatmul.mubr.msk.f32.vlgmr.msra.gmra.mxu0 %vm1531_vm0, %v4274_v49  ;;  %5883 = vmatmul.mubr.msk.f32.vlgmr.msra.gmra.mxu1 %vm1531_vm0, %v4274_v49  ;;  %v4281_v3 = vadd.f32 %v4265_v2, %v7439_v19  ;;  %v4282_v11 = vadd.f32 %v4266_v29, %v7444_v7 }
 0x7ac   : > { %5875 = vmatprep.mubr.msk.f32.mxu0 %vm1531_vm0, %v4281_v3  ;;  %5885 = vmatprep.mubr.msk.f32.mxu1 %vm1531_vm0, %v4281_v3 }
 0x7ae   : > { %5876 = vmatmul.mubr.msk.f32.gmra.mxu0 %vm1531_vm0, %v4282_v11  ;;  %5886 = vmatmul.mubr.msk.f32.gmra.mxu1 %vm1531_vm0, %v4282_v11 }
 0x842   : > { %v5844_v5 = vpop.f32.mrf.mxu0 }
 0x844   : > { %v4370_v55 = vpop.f32.mrf.mxu0 }
 0x855   : > { %v5847_v45 = vpop.f32.mrf.mxu0 }
 0x857   : > { %v4380_v22 = vpop.f32.mrf.mxu0 }
 0x859   : > { %v5854_v30 = vpop.f32.mrf.mxu0 }
 0x85a   : > { %v4473_v7 = vadd.f32 %v5854_v30, %v5844_v5 }
 0x85b   : > { %v4467_v36 = vpop.f32.mrf.mxu0 }
 0x85c   : > { %v4468_v56 = vadd.f32 %v4467_v36, %v4370_v55 }
 0x85d   : > { %v5857_v63 = vpop.f32.mrf.mxu0 }
 0x85e   : > { %v4483_v1 = vadd.f32 %v5857_v63, %v5847_v45 }
 0x85f   : > { %v4477_v43 = vpop.f32.mrf.mxu0 }
 0x860   : > { %v4478_v54 = vadd.f32 %v4477_v43, %v4380_v22 }
 0x862   : > { %v5864_v61 = vpop.f32.mrf.mxu0 }
 0x863   : > { %v4587_v18 = vadd.f32 %v5864_v61, %v4473_v7 }
 0x864   : > { %v4567_v19 = vpop.f32.mrf.mxu0 }
 0x865   : > { %v4586_v60 = vadd.f32 %v4567_v19, %v4468_v56 }
 0x866   : > { %v5867_v17 = vpop.f32.mrf.mxu0 }
 0x867   : > { %v4589_v27 = vadd.f32 %v5867_v17, %v4483_v1 }
 0x868   : > { %v4577_v31 = vpop.f32.mrf.mxu0 }
 0x869   : > { %v4588_v25 = vadd.f32 %v4577_v31, %v4478_v54 }
 0x86a   : > { %v5874_v58 = vpop.f32.mrf.mxu0  ;;  %v5884_v12 = vpop.f32.mrf.mxu1 }
 0x86b   : > { %v4691_v10 = vadd.f32 %v5874_v58, %v4587_v18  ;;  %v4782_v47 = vadd.f32 %v5884_v12, %v5432_v4  ;;  %v4937_v12 = vld [vmem:[%s7632_s22] sm:$0xff] }
 0x86c   : > { %v4671_v6 = vpop.f32.mrf.mxu0  ;;  %v4776_v32 = vpop.f32.mrf.mxu1 }
 0x86d   : > { %v4701_v40 = vadd.f32 %v5431_v8, %v4691_v10  ;;  %v4690_v42 = vadd.f32 %v4671_v6, %v4586_v60  ;;  %v4777_v24 = vadd.f32 %v5432_v4, %v4776_v32 }
 0x86e   : > { %v5877_v62 = vpop.f32.mrf.mxu0  ;;  %v5887_v14 = vpop.f32.mrf.mxu1 }
 0x86f   : > { %v5438_v0 = vmul.f32 -1.442695, %v4701_v40  ;;  %v4700_v41 = vadd.f32 %v5431_v8, %v4690_v42  ;;  %v4693_v13 = vadd.f32 %v5877_v62, %v4589_v27  ;;  %v4796_v28 = vadd.f32 %v4782_v47, %v4701_v40 }
 0x870   : > { %v4681_v9 = vpop.f32.mrf.mxu0  ;;  %v4786_v57 = vpop.f32.mrf.mxu1  ;;  %v4792_v22 = vadd.f32 %v5887_v14, %v5432_v4 }
 0x871   : > { %6106 = vpow2.f32 %v5438_v0  ;;  %v5437_v20 = vmul.f32 -1.442695, %v4700_v41  ;;  %v4703_v38 = vadd.f32 %v5431_v8, %v4693_v13  ;;  %v4692_v35 = vadd.f32 %v4681_v9, %v4588_v25 }
 0x872   : > { %v4795_v49 = vadd.f32 %v4777_v24, %v4700_v41  ;;  %v4787_v29 = vadd.f32 %v5432_v4, %v4786_v57 }
 0x873   : > { %6108 = vpow2.f32 %v5437_v20  ;;  %v5440_v34 = vmul.f32 -1.442695, %v4703_v38  ;;  %v4702_v53 = vadd.f32 %v5431_v8, %v4692_v35  ;;  %v4798_v63 = vadd.f32 %v4792_v22, %v4703_v38 }
 0x875   : > { %v5439_v23 = vmul.f32 -1.442695, %v4702_v53  ;;  %6110 = vpow2.f32 %v5440_v34  ;;  %v4797_v55 = vadd.f32 %v4787_v29, %v4702_v53 }
 0x877   : > { %6112 = vpow2.f32 %v5439_v23 }
 0x87e   : > { %v6107_v50 = vpop.eup %6106 }
 0x87f   : > { %v4812_v52 = vadd.f32 1.0, %v6107_v50 }
 0x880   : > { %v6109_v33 = vpop.eup %6108 }
 0x881   : > { %6114 = vrcp.f32 %v4812_v52  ;;  %v4811_v37 = vadd.f32 1.0, %v6109_v33 }
 0x882   : > { %v6111_v26 = vpop.eup %6110 }
 0x883   : > { %6116 = vrcp.f32 %v4811_v37  ;;  %v4814_v48 = vadd.f32 1.0, %v6111_v26 }
 0x884   : > { %v6113_v59 = vpop.eup %6112 }
 0x885   : > { %v4813_v39 = vadd.f32 1.0, %v6113_v59 }
 0x887   : > { %6118 = vrcp.f32 %v4813_v39 }
 0x888   : > { %6120 = vrcp.f32 %v4814_v48 }
 0x88e   : > { %v6115_v51 = vpop.eup %6114 }
 0x88f   : > { %4829 = vrot.lane.b32.xlu0 %v6115_v51, %s6136_s30 }
 0x890   : > { %v6117_v44 = vpop.eup %6116 }
 0x891   : > { %4827 = vrot.lane.b32.xlu1 %v6117_v44, %s6136_s30  ;;  %v4940_v44 = vld [vmem:[%s7632_s22 + $0x18] sm:$0xff] }
 0x892   : > { %5888 = vmatprep.subr.mxu0 %v4940_v44 }
 0x893   : > { %5889 = vmatpush3.msra.mxu0 %v4940_v44 }
 0x894   : > { %v6119_v21 = vpop.eup %6118 }
 0x895   : > { %4831 = vrot.lane.b32.xlu1 %v6119_v21, %s6136_s30  ;;  %v6121_v46 = vpop.eup %6120  ;;  %v4939_v21 = vld [vmem:[%s7632_s22 + $0x10] sm:$0xff] }
 0x896   : > { %5890 = vmatprep.subr.mxu0 %v4939_v21 }
 0x897   : > { %5891 = vmatpush3.msra.mxu0 %v4939_v21  ;;  %v5446_v21 = vld [vmem:[#allocation2] ss:$0 sm:$0xff] }
 0x899   : > { %4833 = vrot.lane.b32.xlu1 %v6121_v46, %s6136_s30  ;;  %v4938_v46 = vld [vmem:[%s7632_s22 + $0x8] sm:$0xff] }
 0x89a   : > { %5892 = vmatprep.subr.mxu0 %v4938_v46 }
 0x89b   : > { %5893 = vmatpush3.msra.mxu0 %v4938_v46 }
 0x89c   : > { %5894 = vmatprep.subr.mxu0 %v4937_v12 }
 0x89d   : > { %5895 = vmatpush3.msra.mxu0 %v4937_v12 }
 0x901   : > { %v4830_v15 = vpop.permute.xlu0 %4829 }
 0x902   : > { %v4840_v16 = vmul.f32 %v4830_v15, %v4796_v28 }
 0x903   : > { %v4828_v2 = vpop.permute.xlu1 %4827 }
 0x904   : > { %v4839_v3 = vmul.f32 %v4828_v2, %v4795_v49  ;;  %v4851_v11 = vsel %vm4847_vm2, %v4840_v16, 0.0 }
 0x905   : > { %4852 = vadd.xlane.f32.xlu1 %v4851_v11 }
 0x906   : > { %v4848_v5 = vsel %vm4847_vm2, %v4839_v3, 0.0 }
 0x907   : > { %4849 = vadd.xlane.f32.xlu0 %v4848_v5  ;;  %v4832_v45 = vpop.permute.xlu1 %4831 }
 0x908   : > { %v4841_v30 = vmul.f32 %v4832_v45, %v4797_v55 }
 0x90a   : > { %v4854_v36 = vsel %vm4847_vm2, %v4841_v30, 0.0 }
 0x90b   : > { %4855 = vadd.xlane.f32.xlu0 %v4854_v36  ;;  %v4834_v43 = vpop.permute.xlu1 %4833 }
 0x90c   : > { %v4842_v61 = vmul.f32 %v4834_v43, %v4798_v63 }
 0x90e   : > { %v4857_v19 = vsel %vm4847_vm2, %v4842_v61, 0.0 }
 0x90f   : > { %4858 = vadd.xlane.f32.xlu0 %v4857_v19 }
 0x98e   : > { %v4853_v17 = vpop.xlane.xlu1 %4852 }
 0x98f   : > { %v4862_v31 = vmul.f32 0.03125, %v4853_v17 }
 0x990   : > { %v4850_v7 = vpop.xlane.xlu0 %4849 }
 0x991   : > { %v4861_v56 = vmul.f32 0.03125, %v4850_v7 }
 0x993   : > { %v4865_v18 = vadd.f32 %v4862_v31, %v4861_v56  ;;  %v4843_v56 = vld [vmem:[%s7630_s20] sm:$0xff] }
 0x994   : > { %v4856_v8 = vpop.xlane.xlu0 %4855 }
 0x995   : > { %v4866_v58 = vrot.slane %v4865_v18, 4  ;;  %v4863_v6 = vmul.f32 0.03125, %v4856_v8 }
 0x997   : > { %v4867_v1 = vadd.f32 %v4866_v58, %v4865_v18  ;;  %v4844_v18 = vld [vmem:[%s7630_s20 + $0x8] sm:$0xff] }
 0x998   : > { %v4859_v60 = vpop.xlane.xlu0 %4858 }
 0x999   : > { %v4868_v10 = vrot.slane %v4867_v1, 2  ;;  %v4864_v54 = vmul.f32 0.03125, %v4859_v60  ;;  %v4846_v60 = vld [vmem:[%s7631_s21 + $0x8] sm:$0xff] }
 0x99b   : > { %v4869_v27 = vadd.f32 %v4868_v10, %v4867_v1  ;;  %v4872_v40 = vadd.f32 %v4864_v54, %v4863_v6  ;;  %v4845_v1 = vld [vmem:[%s7631_s21] sm:$0xff] }
 0x99d   : > { %v4870_v42 = vrot.slane %v4869_v27, 1  ;;  %v4873_v62 = vrot.slane %v4872_v40, 4 }
 0x99f   : > { %v4874_v25 = vadd.f32 %v4873_v62, %v4872_v40  ;;  %v4871_v0 = vadd.f32 %v4870_v42, %v4869_v27 }
 0x9a1   : > { %v4875_v41 = vrot.slane %v4874_v25, 2  ;;  %v4879_v13 = vmul.f32 0.0625, %v4871_v0 }
 0x9a3   : > { %v4876_v9 = vadd.f32 %v4875_v41, %v4874_v25  ;;  %v7542_v20 = vsub.f32 %v4840_v16, %v4879_v13  ;;  %v4881_v38 = vsub.f32 %v4839_v3, %v4879_v13 }
 0x9a5   : > { %v4877_v35 = vrot.slane %v4876_v9, 1  ;;  %v4886_v34 = vmul.f32 %v7542_v20, %v7542_v20  ;;  %v4885_v53 = vmul.f32 %v4881_v38, %v4881_v38 }
 0x9a7   : > { %v4892_v23 = vsel %vm4847_vm2, %v4886_v34, 0.0  ;;  %v4889_v50 = vsel %vm4847_vm2, %v4885_v53, 0.0  ;;  %v4878_v52 = vadd.f32 %v4877_v35, %v4876_v9  ;;  %v4945_v9 = vld [vmem:[%s7634_s24 + $0x18] sm:$0xff]  ;;  %v4942_v35 = vld [vmem:[%s7634_s24] sm:$0xff] }
 0x9a8   : > { %4893 = vadd.xlane.f32.xlu0 %v4892_v23  ;;  %4890 = vadd.xlane.f32.xlu1 %v4889_v50  ;;  %v5441_v34 = vld [vmem:[%s7633_s23] ss:$0 sm:$0xff] }
 0x9a9   : > { %v4880_v33 = vmul.f32 0.0625, %v4878_v52  ;;  %5902 = vmatprep.subr.mxu1 %v4945_v9 }
 0x9aa   : > { %5903 = vmatpush3.msra.mxu1 %v4945_v9 }
 0x9ab   : > { %v7548_v37 = vsub.f32 %v4842_v61, %v4880_v33  ;;  %v4883_v26 = vsub.f32 %v4841_v30, %v4880_v33 }
 0x9ad   : > { %v4888_v59 = vmul.f32 %v7548_v37, %v7548_v37  ;;  %v4887_v39 = vmul.f32 %v4883_v26, %v4883_v26 }
 0x9af   : > { %v4898_v48 = vsel %vm4847_vm2, %v4888_v59, 0.0  ;;  %v4895_v51 = vsel %vm4847_vm2, %v4887_v39, 0.0 }
 0x9b0   : > { %4899 = vadd.xlane.f32.xlu0 %v4898_v48  ;;  %4896 = vadd.xlane.f32.xlu1 %v4895_v51 }
 0xa31   : > { %v4894_v32 = vpop.xlane.xlu0 %4893  ;;  %v4891_v4 = vpop.xlane.xlu1 %4890 }
 0xa32   : > { %v4902_v14 = vmul.f32 0.03125, %v4894_v32  ;;  %v4901_v47 = vmul.f32 0.03125, %v4891_v4 }
 0xa34   : > { %v4905_v24 = vadd.f32 %v4902_v14, %v4901_v47 }
 0xa36   : > { %v4906_v28 = vrot.slane %v4905_v24, 4 }
 0xa38   : > { %v4907_v57 = vadd.f32 %v4906_v28, %v4905_v24 }
 0xa39   : > { %v4900_v15 = vpop.xlane.xlu0 %4899  ;;  %v4897_v16 = vpop.xlane.xlu1 %4896 }
 0xa3a   : > { %v4908_v49 = vrot.slane %v4907_v57, 2  ;;  %v4904_v2 = vmul.f32 0.03125, %v4900_v15  ;;  %v4903_v29 = vmul.f32 0.03125, %v4897_v16 }
 0xa3c   : > { %v4909_v3 = vadd.f32 %v4908_v49, %v4907_v57  ;;  %v4912_v11 = vadd.f32 %v4904_v2, %v4903_v29 }
 0xa3e   : > { %v4910_v5 = vrot.slane %v4909_v3, 1  ;;  %v4913_v55 = vrot.slane %v4912_v11, 4 }
 0xa40   : > { %v4911_v45 = vadd.f32 %v4910_v5, %v4909_v3  ;;  %v4914_v22 = vadd.f32 %v4913_v55, %v4912_v11 }
 0xa42   : > { %v4919_v30 = vmul.f32 0.0625, %v4911_v45  ;;  %v4915_v36 = vrot.slane %v4914_v22, 2 }
 0xa44   : > { %v4921_v63 = vadd.f32 1e-05, %v4919_v30  ;;  %v4916_v43 = vadd.f32 %v4915_v36, %v4914_v22 }
 0xa46   : > { %6122 = vrsqrt.f32 %v4921_v63  ;;  %v4917_v61 = vrot.slane %v4916_v43, 1 }
 0xa48   : > { %v4918_v19 = vadd.f32 %v4917_v61, %v4916_v43 }
 0xa4a   : > { %v4920_v17 = vmul.f32 0.0625, %v4918_v19 }
 0xa4c   : > { %v4922_v7 = vadd.f32 1e-05, %v4920_v17 }
 0xa4e   : > { %6124 = vrsqrt.f32 %v4922_v7 }
 0xa53   : > { %v6123_v31 = vpop.eup %6122 }
 0xa54   : > { %v4925_v8 = vmul.f32 %v6123_v31, %v4881_v38  ;;  %v4926_v58 = vmul.f32 %v6123_v31, %v7542_v20  ;;  %v4944_v20 = vld [vmem:[%s7634_s24 + $0x10] sm:$0xff]  ;;  %v4943_v38 = vld [vmem:[%s7634_s24 + $0x8] sm:$0xff] }
 0xa55   : > { %5904 = vmatprep.subr.mxu1 %v4944_v20 }
 0xa56   : > { %v4929_v10 = vmul.f32 %v4925_v8, %v4843_v56  ;;  %v4930_v6 = vmul.f32 %v4926_v58, %v4844_v18  ;;  %5905 = vmatpush3.msra.mxu1 %v4944_v20 }
 0xa57   : > { %5906 = vmatprep.subr.mxu1 %v4943_v38 }
 0xa58   : > { %v4933_v54 = vadd.f32 %v4929_v10, %v4845_v1  ;;  %v4934_v27 = vadd.f32 %v4930_v6, %v4846_v60  ;;  %5907 = vmatpush3.msra.mxu1 %v4943_v38 }
 0xa59   : > { %5908 = vmatprep.subr.mxu1 %v4942_v35 }
 0xa5a   : > { %5896 = vmatprep.mubr.msk.f32.mxu0 %vm4847_vm2, %v4933_v54  ;;  %5909 = vmatpush3.msra.mxu1 %v4942_v35 }
 0xa5b   : > { %v6125_v40 = vpop.eup %6124  ;;  %5897 = vmatmul.mubr.msk.f32.vlgmr.msra.gmra.mxu0 %vm4847_vm2, %v4934_v27 }
 0xa5c   : > { %v4927_v42 = vmul.f32 %v6125_v40, %v4883_v26  ;;  %v4928_v62 = vmul.f32 %v6125_v40, %v7548_v37 }
 0xa5e   : > { %v4931_v25 = vmul.f32 %v4927_v42, %v4843_v56  ;;  %v4932_v0 = vmul.f32 %v4928_v62, %v4844_v18 }
 0xa60   : > { %v4935_v41 = vadd.f32 %v4931_v25, %v4845_v1  ;;  %v4936_v13 = vadd.f32 %v4932_v0, %v4846_v60 }
 0xa62   : > { %5899 = vmatprep.mubr.msk.f32.mxu0 %vm4847_vm2, %v4935_v41 }
 0xa63   : > { %5900 = vmatmul.mubr.msk.f32.gmra.mxu0 %vm4847_vm2, %v4936_v13 }
 0xb1b   : > { %v5898_v53 = vpop.f32.mrf.mxu0 }
 0xb1c   : > { %v5037_v23 = vadd.f32 %v5898_v53, %v5441_v34 }
 0xb1d   : > { %v5031_v50 = vpop.f32.mrf.mxu0 }
 0xb1e   : > { %v5032_v52 = vadd.f32 %v5441_v34, %v5031_v50  ;;  %v5051_v37 = vmax.f32 %v5037_v23, 0.0 }
 0xb20   : > { %v5050_v33 = vmax.f32 %v5032_v52, 0.0 }
 0xb22   : > { %5910 = vmatprep.mubr.msk.f32.mxu1 %vm4847_vm2, %v5050_v33 }
 0xb23   : > { %v5901_v26 = vpop.f32.mrf.mxu0  ;;  %5911 = vmatmul.mubr.msk.f32.vlgmr.msra.gmra.mxu1 %vm4847_vm2, %v5051_v37 }
 0xb24   : > { %v5047_v59 = vadd.f32 %v5901_v26, %v5441_v34 }
 0xb25   : > { %v5041_v39 = vpop.f32.mrf.mxu0 }
 0xb26   : > { %v5042_v48 = vadd.f32 %v5441_v34, %v5041_v39  ;;  %v5053_v44 = vmax.f32 %v5047_v59, 0.0 }
 0xb28   : > { %v5052_v51 = vmax.f32 %v5042_v48, 0.0 }
 0xb2a   : > { %5913 = vmatprep.mubr.msk.f32.mxu1 %vm4847_vm2, %v5052_v51 }
 0xb2b   : > { %5914 = vmatmul.mubr.msk.f32.gmra.mxu1 %vm4847_vm2, %v5053_v44 }
 0xbe3   : > { %v5912_v46 = vpop.f32.mrf.mxu1 }
 0xbe4   : > { %v5144_v12 = vadd.f32 %v5912_v46, %v5446_v21 }
 0xbe5   : > { %v5138_v32 = vpop.f32.mrf.mxu1 }
 0xbe6   : > { %5159 = vst.msk [vmem:[%s800_s9 + $0x8] sm:$0xff] %vm5157_vm3, %v5144_v12  ;;  %v5139_v4 = vadd.f32 %v5446_v21, %v5138_v32 }
 0xbe8   : > { %5158 = vst.msk [vmem:[%s800_s9] sm:$0xff] %vm5157_vm3, %v5139_v4 }
 0xbeb   : > { %v5915_v14 = vpop.f32.mrf.mxu1 }
 0xbec   : > { %v5154_v47 = vadd.f32 %v5915_v14, %v5446_v21 }
 0xbed   : > { %v5148_v24 = vpop.f32.mrf.mxu1 }
 0xbee   : > { %5161 = vst.msk [vmem:[%s800_s9 + $0x18] sm:$0xff] %vm5157_vm3, %v5154_v47  ;;  %v5149_v28 = vadd.f32 %v5446_v21, %v5148_v24 }
 0xbf0   : > { %5160 = vst.msk [vmem:[%s800_s9 + $0x10] sm:$0xff] %vm5157_vm3, %v5149_v28 }
 0xbf1 PF: > { %s38_s7 = sadd.s32 1, %s6132_s7  }
 0xbf2   : > { %p35_p4 = scmp.ge.s32.totalorder %s38_s7, 4  }
 0xbf4   :  { %37 = sbr.rel (!%p35_p4) target bundleno = 12 (0xc), region = 161 }

</bundles_post_ra>
